<compile_context>
chip_gen: v7x
topology: tpu7x:2x2x1
jax: 0.10.0
libtpu: 0.0.40
codegen_flags: <defaults>
</compile_context>

<pallas_src>
import functools

import jax
import jax.numpy as jnp
from jax.experimental import pallas as pl
from jax.experimental.pallas import tpu as pltpu


_HIDDEN = 256
_LSTM_IN = {"conv4": 64, "conv5": 256, "conv6": 256, "conv7": 256, "conv8": 256}


def _round_up(x, m):
    return -(-x // m) * m


def _stem_tile_m():
    """tm for the stem conv: 64 on v7x (2 TensorCores -> 2 M tiles), else 128."""
    try:
        kind = jax.devices()[0].device_kind.lower()
    except Exception:
        kind = ""
    return 64 if "v7" in kind else 128


# ----------------------------------------------------------------------------
# Pallas kernels
# ----------------------------------------------------------------------------

def _mm_single_k_kernel(a_ref, w_ref, b_ref, o_ref, *, activation):
    """Single-K-step fast path: o = act(A @ W + b), no accumulator traffic."""
    z = jnp.dot(a_ref[...], w_ref[...],
                preferred_element_type=jnp.float32) + b_ref[...]
    if activation == "relu":
        z = jnp.maximum(z, 0.0)
    elif activation == "sigmoid":
        z = jax.nn.sigmoid(z)
    o_ref[...] = z.astype(o_ref.dtype)


def _mm_multi_k_kernel(a_ref, w_ref, b_ref, o_ref, acc_ref, *, activation):
    """General K-tiled path (unused at this model's shapes, kept for larger K)."""
    k = pl.program_id(2)

    @pl.when(k == 0)
    def _():
        acc_ref[...] = jnp.zeros_like(acc_ref)

    acc_ref[...] += jnp.dot(a_ref[...], w_ref[...],
                            preferred_element_type=jnp.float32)

    @pl.when(k == pl.num_programs(2) - 1)
    def _():
        z = acc_ref[...] + b_ref[...]
        if activation == "relu":
            z = jnp.maximum(z, 0.0)
        elif activation == "sigmoid":
            z = jax.nn.sigmoid(z)
        o_ref[...] = z.astype(o_ref.dtype)


def matmul_bias_act(a, w, b, activation="none", tm_max=256, tn_max=512,
                    out_dtype=jnp.float32):
    """out = act(a @ w + b); a:(M,K), w:(K,N), b:(N,) -> (M,N) out_dtype.
    bf16 MXU inputs, f32 accumulation, activation fused into the epilogue."""
    M, K = a.shape
    _, N = w.shape

    Mr = _round_up(M, 16)                  # bf16 sublane packing
    tm = min(tm_max, Mr)
    Mp = _round_up(M, tm)
    Nr = _round_up(N, 128)
    tn = min(tn_max, Nr)
    Np = _round_up(N, tn)
    Kr = _round_up(K, 128)
    tk = Kr if Kr <= 1024 else 512         # single K step whenever it fits
    Kp = _round_up(K, tk)
    nk = Kp // tk

    # The pads below fuse into the im2col producer of `a` at XLA level (the
    # cols buffer is materialized once, already at the padded extent).
    a_p = jnp.pad(a.astype(jnp.bfloat16), ((0, Mp - M), (0, Kp - K)))
    w_p = jnp.pad(w.astype(jnp.bfloat16), ((0, Kp - K), (0, Np - N)))
    b_p = jnp.pad(b.astype(jnp.float32).reshape(1, N), ((0, 0), (0, Np - N)))

    if nk == 1:
        out = pl.pallas_call(
            functools.partial(_mm_single_k_kernel, activation=activation),
            out_shape=jax.ShapeDtypeStruct((Mp, Np), out_dtype),
            grid_spec=pltpu.PrefetchScalarGridSpec(
                num_scalar_prefetch=0,
                grid=(Mp // tm, Np // tn),
                in_specs=[pl.BlockSpec((tm, Kp), lambda i, j: (i, 0)),
                          pl.BlockSpec((Kp, tn), lambda i, j: (0, j)),
                          pl.BlockSpec((1, tn), lambda i, j: (0, j))],
                out_specs=pl.BlockSpec((tm, tn), lambda i, j: (i, j))),
            compiler_params=pltpu.CompilerParams(
                dimension_semantics=("parallel", "parallel")),
        )(a_p, w_p, b_p)
    else:
        out = pl.pallas_call(
            functools.partial(_mm_multi_k_kernel, activation=activation),
            out_shape=jax.ShapeDtypeStruct((Mp, Np), out_dtype),
            grid_spec=pltpu.PrefetchScalarGridSpec(
                num_scalar_prefetch=0,
                grid=(Mp // tm, Np // tn, nk),
                in_specs=[pl.BlockSpec((tm, tk), lambda i, j, k: (i, k)),
                          pl.BlockSpec((tk, tn), lambda i, j, k: (k, j)),
                          pl.BlockSpec((1, tn), lambda i, j, k: (0, j))],
                out_specs=pl.BlockSpec((tm, tn), lambda i, j, k: (i, j)),
                scratch_shapes=[pltpu.VMEM((tm, tn), jnp.float32)]),
            compiler_params=pltpu.CompilerParams(
                dimension_semantics=("parallel", "parallel", "arbitrary")),
        )(a_p, w_p, b_p)
    return out[:M, :N]


def _lstm_chain_kernel(x_ref, w4_ref, b4_ref, ws_ref, bs_ref, h_ref,
                       *, hidden, n_extra_layers):
    """Fused 5-layer single-step ConvLSTM chain (zero initial h and c).

    Weights are pre-sliced to the centre tap / input-channel rows and to the
    live gate columns [i | o | g] (width 3*hidden).  The hidden state stays
    VMEM-resident across the statically unrolled layer loop; only the final
    (M, hidden) hidden state is written out."""
    def cell(z):
        i = jax.nn.sigmoid(z[:, :hidden])
        o = jax.nn.sigmoid(z[:, hidden:2 * hidden])
        g = jnp.tanh(z[:, 2 * hidden:3 * hidden])
        c = i * g                                   # c_next = f*0 + i*tanh_g
        return o * jnp.tanh(c)

    z = jnp.dot(x_ref[...], w4_ref[...],
                preferred_element_type=jnp.float32) + b4_ref[...]
    h = cell(z)
    for layer in range(n_extra_layers):             # static unroll (4 layers)
        z = jnp.dot(h.astype(jnp.bfloat16), ws_ref[layer],
                    preferred_element_type=jnp.float32) + bs_ref[layer]
        h = cell(z)
    h_ref[...] = h


def lstm_chain(x_flat, w4, b4, ws, bs, hidden=_HIDDEN):
    """x_flat:(M, Cin4); w4:(K4p, 3*hidden) bf16; ws:(L, hidden, 3*hidden) bf16;
    b4:(1, 3*hidden) f32; bs:(L, 1, 3*hidden) f32 -> (M, hidden) f32."""
    M, K4 = x_flat.shape
    N3 = 3 * hidden
    Mp = _round_up(max(M, 8), 8)
    K4p = w4.shape[0]
    n_extra = ws.shape[0]

    x_p = jnp.pad(x_flat.astype(jnp.bfloat16), ((0, Mp - M), (0, K4p - K4)))

    out = pl.pallas_call(
        functools.partial(_lstm_chain_kernel, hidden=hidden,
                          n_extra_layers=n_extra),
        out_shape=jax.ShapeDtypeStruct((Mp, hidden), jnp.float32),
        grid_spec=pltpu.PrefetchScalarGridSpec(
            num_scalar_prefetch=0,
            grid=(1,),
            in_specs=[pl.BlockSpec((Mp, K4p), lambda i: (0, 0)),
                      pl.BlockSpec((K4p, N3), lambda i: (0, 0)),
                      pl.BlockSpec((1, N3), lambda i: (0, 0)),
                      pl.BlockSpec((n_extra, hidden, N3), lambda i: (0, 0, 0)),
                      pl.BlockSpec((n_extra, 1, N3), lambda i: (0, 0, 0))],
            out_specs=pl.BlockSpec((Mp, hidden), lambda i: (0, 0))),
        compiler_params=pltpu.CompilerParams(
            dimension_semantics=("arbitrary",)),
    )(x_p, w4, b4, ws, bs)
    return out[:M]


# ----------------------------------------------------------------------------
# Plain-JAX glue (thin, XLA-fused): BN affine, im2col, SE pooling/gate/rescale
# ----------------------------------------------------------------------------

def bn_affine(x_nhwc, gamma, beta, eps=1e-5):
    """Training-mode BatchNorm as a per-channel affine (batch stats, biased
    variance, computed in f32), emitted in bf16 right before the consuming
    conv's im2col so XLA fuses the whole thing into one elementwise pass."""
    xf = x_nhwc.astype(jnp.float32)
    mean = jnp.mean(xf, axis=(0, 1, 2))
    var = jnp.mean(jnp.square(xf - mean), axis=(0, 1, 2))
    scale = gamma * jax.lax.rsqrt(var + eps)
    shift = beta - mean * scale
    return (xf * scale + shift).astype(jnp.bfloat16)


def im2col(x_nhwc, kh, kw, stride, padding):
    # TODO(synk): at realistic image sizes lower this to a direct Pallas conv
    # (per-tap accumulating matmuls) instead of materializing kh*kw patch copies.
    n, h, w, c = x_nhwc.shape
    xp = jnp.pad(x_nhwc, ((0, 0), (padding, padding), (padding, padding), (0, 0)))
    ho = (h + 2 * padding - kh) // stride + 1
    wo = (w + 2 * padding - kw) // stride + 1
    patches = []
    for i in range(kh):
        for j in range(kw):
            patches.append(xp[:, i:i + ho * stride:stride,
                               j:j + wo * stride:stride, :])
    cols = jnp.stack(patches, axis=-2)                 # (N,Ho,Wo,kh*kw,C)
    return cols.reshape(n * ho * wo, kh * kw * c), (n, ho, wo)


def conv2d(x_nhwc, w_hwio, bias, stride, padding, activation="none", tm_max=256):
    kh, kw, cin, cout = w_hwio.shape
    cols, (n, ho, wo) = im2col(x_nhwc.astype(jnp.bfloat16), kh, kw, stride, padding)
    out = matmul_bias_act(cols, w_hwio.reshape(kh * kw * cin, cout), bias,
                          activation, tm_max=tm_max, out_dtype=jnp.bfloat16)
    return out.reshape(n, ho, wo, cout)


def squeeze_excitation(x, p):
    x = bn_affine(x, p["bn1_g"], p["bn1_b"])
    x = conv2d(x, p["conv1_w"], p["conv1_b"], stride=2, padding=1, activation="relu")
    x = bn_affine(x, p["bn2_g"], p["bn2_b"])
    x = conv2d(x, p["conv2_w"], p["conv2_b"], stride=1, padding=1, activation="relu")
    x = bn_affine(x, p["bn3_g"], p["bn3_b"])
    x = conv2d(x, p["conv3_w"], p["conv3_b"], stride=2, padding=1, activation="none")
    x_left = x                                         # bf16 (B,h,w,C)
    # SE gate: (2 x 64) matmuls are pure launch overhead as Pallas calls ->
    # plain JAX so XLA fuses pool + lin5(relu) + lin6(sigmoid) + rescale.
    s = jnp.mean(x.astype(jnp.float32), axis=(1, 2))   # pool4 == global avg pool
    s = jax.nn.relu(s @ p["lin5_w"] + p["lin5_b"])
    s = jax.nn.sigmoid(s @ p["lin6_w"] + p["lin6_b"])
    return x_left.astype(jnp.float32) * (s[:, None, None, :] + 1.0)


def red_model_forward(params, x_nchw):
    x = jnp.transpose(x_nchw, (0, 2, 3, 1)).astype(jnp.float32)   # NCHW -> NHWC
    x = bn_affine(x, params["bn1_g"], params["bn1_b"])
    x = conv2d(x, params["conv1_w"], params["conv1_b"],
               stride=2, padding=3, activation="relu", tm_max=_stem_tile_m())
    x = squeeze_excitation(x, params["sq2"])
    x = squeeze_excitation(x, params["sq3"])
    n, h, w, c = x.shape
    # x.unsqueeze(dim=1) + five single-step ConvLSTMs, taking [0][-1] each time.
    # At this model's configuration the spatial extent here is 1x1, so with a
    # 3x3 kernel and padding=1 only the centre tap contributes and h0 == 0
    # kills both the hidden-channel weight rows and the f-gate columns.
    assert h == 1 and w == 1, "fused ConvLSTM chain assumes 1x1 spatial extent"
    # TODO(synk): general spatial extent would need the im2col + per-layer path.
    h_out = lstm_chain(x.reshape(n, c),
                       params["lstm_w4"], params["lstm_b4"],
                       params["lstm_w58"], params["lstm_b58"], hidden=_HIDDEN)
    out = h_out.reshape(n, 1, 1, _HIDDEN)
    # back to torch convention: (B, T=1, C, H, W)
    return jnp.transpose(out, (0, 3, 1, 2))[:, None]


# ----------------------------------------------------------------------------
# Deterministic parameter construction + one-time preparation
# ----------------------------------------------------------------------------

def _make_key_iter(seed):
    key = jax.random.PRNGKey(seed)
    while True:
        key, sub = jax.random.split(key)
        yield sub


def init_se_params(keys, cin, cout, scale=0.05):
    return dict(
        bn1_g=jnp.ones((cin,), jnp.float32), bn1_b=jnp.zeros((cin,), jnp.float32),
        conv1_w=scale * jax.random.normal(next(keys), (3, 3, cin, cout), jnp.float32),
        conv1_b=jnp.zeros((cout,), jnp.float32),
        bn2_g=jnp.ones((cout,), jnp.float32), bn2_b=jnp.zeros((cout,), jnp.float32),
        conv2_w=scale * jax.random.normal(next(keys), (3, 3, cout, cout), jnp.float32),
        conv2_b=jnp.zeros((cout,), jnp.float32),
        bn3_g=jnp.ones((cout,), jnp.float32), bn3_b=jnp.zeros((cout,), jnp.float32),
        conv3_w=scale * jax.random.normal(next(keys), (3, 3, cout, cout), jnp.float32),
        conv3_b=jnp.zeros((cout,), jnp.float32),
        lin5_w=scale * jax.random.normal(next(keys), (cout, cout), jnp.float32),
        lin5_b=jnp.zeros((cout,), jnp.float32),
        lin6_w=scale * jax.random.normal(next(keys), (cout, cout), jnp.float32),
        lin6_b=jnp.zeros((cout,), jnp.float32),
    )


def init_params(in_channels, scale=0.05):
    """Full-precision parameters matching the torch module's structure."""
    keys = _make_key_iter(1)
    p = dict(
        bn1_g=jnp.ones((in_channels,), jnp.float32),
        bn1_b=jnp.zeros((in_channels,), jnp.float32),
        conv1_w=scale * jax.random.normal(next(keys), (7, 7, in_channels, 32), jnp.float32),
        conv1_b=jnp.zeros((32,), jnp.float32),
        sq2=init_se_params(keys, 32, 64),
        sq3=init_se_params(keys, 64, 64),
    )
    for name, cin in _LSTM_IN.items():
        p[name + "_w"] = scale * jax.random.normal(
            next(keys), (3, 3, cin + _HIDDEN, 4 * _HIDDEN), jnp.float32)
        p[name + "_b"] = jnp.zeros((4 * _HIDDEN,), jnp.float32)
    return p


def prepare_params(p):
    """One-time weight preparation (at init, not per forward call):
       * conv weights cast to bf16 (the MXU kernels accumulate in f32),
       * ConvLSTM weights reduced exactly for the fused chain:
           - centre tap only (1x1 spatial extent with 3x3/pad=1),
           - input-channel rows only (h0 == 0),
           - f-gate columns dropped (c_prev == 0) -> [i | o | g], width 768,
         conv4 kept separate, conv5-8 stacked along a leading layer axis."""
    def prep_se(sp):
        q = dict(sp)
        for k in ("conv1_w", "conv2_w", "conv3_w"):
            q[k] = sp[k].astype(jnp.bfloat16)
        return q

    def lstm_prep(name, cin):
        w = p[name + "_w"][1, 1, :cin, :]                 # centre tap, x rows
        w = jnp.concatenate([w[:, :_HIDDEN], w[:, 2 * _HIDDEN:]], axis=1)
        b = p[name + "_b"]
        b = jnp.concatenate([b[:_HIDDEN], b[2 * _HIDDEN:]], axis=0)
        return w.astype(jnp.bfloat16), b.astype(jnp.float32)

    out = dict(
        bn1_g=p["bn1_g"], bn1_b=p["bn1_b"],
        conv1_w=p["conv1_w"].astype(jnp.bfloat16), conv1_b=p["conv1_b"],
        sq2=prep_se(p["sq2"]), sq3=prep_se(p["sq3"]),
    )

    w4, b4 = lstm_prep("conv4", _LSTM_IN["conv4"])
    k4p = _round_up(w4.shape[0], 128)
    out["lstm_w4"] = jnp.pad(w4, ((0, k4p - w4.shape[0]), (0, 0)))  # (128, 768)
    out["lstm_b4"] = b4.reshape(1, -1)                              # (1, 768)

    ws, bs = [], []
    for name in ("conv5", "conv6", "conv7", "conv8"):
        w, b = lstm_prep(name, _LSTM_IN[name])
        ws.append(w)
        bs.append(b.reshape(1, -1))
    out["lstm_w58"] = jnp.stack(ws, axis=0)                         # (4, 256, 768)
    out["lstm_b58"] = jnp.stack(bs, axis=0)                         # (4, 1, 768)
    return out


# ----------------------------------------------------------------------------

if __name__ == "__main__":
    B, C_IN, H, W = 2, 4, 16, 16               # small NCHW input (torch convention)
    x = jax.random.normal(jax.random.PRNGKey(0), (B, C_IN, H, W), jnp.float32)
    params = prepare_params(init_params(C_IN))

    fwd = jax.jit(red_model_forward)
    out = jax.block_until_ready(fwd(params, x))
    assert out.shape == (B, 1, 256, 1, 1), out.shape
    assert bool(jnp.all(jnp.isfinite(out)))
    print("KERNEL_OK")
</pallas_src>

<mosaic_0001>
module attributes {stable_mosaic.version = 11 : i64} {
  func.func @_mm_single_k_kernel(%arg0: i32, %arg1: i32, %arg2: memref<128x256xbf16, #tpu.memory_space<vmem>>, %arg3: memref<256x128xbf16, #tpu.memory_space<vmem>>, %arg4: memref<1x128xf32, #tpu.memory_space<vmem>>, %arg5: memref<128x128xbf16, #tpu.memory_space<vmem>>) attributes {dimension_semantics = [#tpu.dimension_semantics<parallel>, #tpu.dimension_semantics<parallel>], iteration_bounds = array<i64: 1, 1>, scalar_prefetch = 0 : i64, scratch_operands = 0 : i64, tpu.core_type = #tpu.core_type<tc>, window_params = [{transform_indices = @transform_0, window_bounds = array<i64: 128, 256>}, {transform_indices = @transform_1, window_bounds = array<i64: 256, 128>}, {transform_indices = @transform_2, window_bounds = array<i64: 1, 128>}, {transform_indices = @transform_3, window_bounds = array<i64: 128, 128>}]} {
    %c0 = arith.constant 0 : index
    %c0_0 = arith.constant 0 : index
    %0 = vector.load %arg2[%c0, %c0_0] : memref<128x256xbf16, #tpu.memory_space<vmem>>, vector<128x256xbf16>
    %c0_1 = arith.constant 0 : index
    %c0_2 = arith.constant 0 : index
    %1 = vector.load %arg3[%c0_1, %c0_2] : memref<256x128xbf16, #tpu.memory_space<vmem>>, vector<256x128xbf16>
    %cst = arith.constant dense<0.000000e+00> : vector<128x128xf32>
    %2 = tpu.matmul %0, %1, %cst {dimension_numbers = #tpu.dot_dimension_numbers<[1], [0], [0], [1], [0, 0, 1, 1], [], []>} : vector<128x256xbf16>, vector<256x128xbf16>, vector<128x128xf32> -> vector<128x128xf32>
    %c0_3 = arith.constant 0 : index
    %c0_4 = arith.constant 0 : index
    %3 = vector.load %arg4[%c0_3, %c0_4] : memref<1x128xf32, #tpu.memory_space<vmem>>, vector<1x128xf32>
    %4 = vector.broadcast %3 : vector<1x128xf32> to vector<128x128xf32>
    %5 = arith.addf %2, %4 : vector<128x128xf32>
    %cst_5 = arith.constant 0.000000e+00 : f32
    %6 = vector.broadcast %cst_5 : f32 to vector<128x128xf32>
    %7 = arith.maximumf %5, %6 : vector<128x128xf32>
    %8 = arith.truncf %7 : vector<128x128xf32> to vector<128x128xbf16>
    %c0_6 = arith.constant 0 : index
    %c0_7 = arith.constant 0 : index
    %9 = vector.load %arg5[%c0_6, %c0_7] : memref<128x128xbf16, #tpu.memory_space<vmem>>, vector<128x128xbf16>
    tpu.vector_store %arg5[%c0_6, %c0_7], %8 {strides = array<i32>} : memref<128x128xbf16, #tpu.memory_space<vmem>>, vector<128x128xbf16>,
    return
  }
  func.func @transform_0(%arg0: i32, %arg1: i32) -> (i32, i32) {
    %c0_i32 = arith.constant 0 : i32
    %c0_i32_0 = arith.constant 0 : i32
    return %arg0, %c0_i32 : i32, i32
  }
  func.func @transform_1(%arg0: i32, %arg1: i32) -> (i32, i32) {
    %c0_i32 = arith.constant 0 : i32
    %c0_i32_0 = arith.constant 0 : i32
    return %c0_i32, %arg1 : i32, i32
  }
  func.func @transform_2(%arg0: i32, %arg1: i32) -> (i32, i32) {
    %c0_i32 = arith.constant 0 : i32
    %c0_i32_0 = arith.constant 0 : i32
    return %c0_i32, %arg1 : i32, i32
  }
  func.func @transform_3(%arg0: i32, %arg1: i32) -> (i32, i32) {
    %c0_i32 = arith.constant 0 : i32
    return %arg0, %arg1 : i32, i32
  }
}

module attributes {stable_mosaic.version = 11 : i64} {
  func.func @_mm_single_k_kernel(%arg0: i32, %arg1: i32, %arg2: memref<32x384xbf16, #tpu.memory_space<vmem>>, %arg3: memref<384x128xbf16, #tpu.memory_space<vmem>>, %arg4: memref<1x128xf32, #tpu.memory_space<vmem>>, %arg5: memref<32x128xbf16, #tpu.memory_space<vmem>>) attributes {dimension_semantics = [#tpu.dimension_semantics<parallel>, #tpu.dimension_semantics<parallel>], iteration_bounds = array<i64: 1, 1>, scalar_prefetch = 0 : i64, scratch_operands = 0 : i64, tpu.core_type = #tpu.core_type<tc>, window_params = [{transform_indices = @transform_0, window_bounds = array<i64: 32, 384>}, {transform_indices = @transform_1, window_bounds = array<i64: 384, 128>}, {transform_indices = @transform_2, window_bounds = array<i64: 1, 128>}, {transform_indices = @transform_3, window_bounds = array<i64: 32, 128>}]} {
    %c0 = arith.constant 0 : index
    %c0_0 = arith.constant 0 : index
    %0 = vector.load %arg2[%c0, %c0_0] : memref<32x384xbf16, #tpu.memory_space<vmem>>, vector<32x384xbf16>
    %c0_1 = arith.constant 0 : index
    %c0_2 = arith.constant 0 : index
    %1 = vector.load %arg3[%c0_1, %c0_2] : memref<384x128xbf16, #tpu.memory_space<vmem>>, vector<384x128xbf16>
    %cst = arith.constant dense<0.000000e+00> : vector<32x128xf32>
    %2 = tpu.matmul %0, %1, %cst {dimension_numbers = #tpu.dot_dimension_numbers<[1], [0], [0], [1], [0, 0, 1, 1], [], []>} : vector<32x384xbf16>, vector<384x128xbf16>, vector<32x128xf32> -> vector<32x128xf32>
    %c0_3 = arith.constant 0 : index
    %c0_4 = arith.constant 0 : index
    %3 = vector.load %arg4[%c0_3, %c0_4] : memref<1x128xf32, #tpu.memory_space<vmem>>, vector<1x128xf32>
    %4 = vector.broadcast %3 : vector<1x128xf32> to vector<32x128xf32>
    %5 = arith.addf %2, %4 : vector<32x128xf32>
    %cst_5 = arith.constant 0.000000e+00 : f32
    %6 = vector.broadcast %cst_5 : f32 to vector<32x128xf32>
    %7 = arith.maximumf %5, %6 : vector<32x128xf32>
    %8 = arith.truncf %7 : vector<32x128xf32> to vector<32x128xbf16>
    %c0_6 = arith.constant 0 : index
    %c0_7 = arith.constant 0 : index
    %9 = vector.load %arg5[%c0_6, %c0_7] : memref<32x128xbf16, #tpu.memory_space<vmem>>, vector<32x128xbf16>
    tpu.vector_store %arg5[%c0_6, %c0_7], %8 {strides = array<i32>} : memref<32x128xbf16, #tpu.memory_space<vmem>>, vector<32x128xbf16>,
    return
  }
  func.func @transform_0(%arg0: i32, %arg1: i32) -> (i32, i32) {
    %c0_i32 = arith.constant 0 : i32
    %c0_i32_0 = arith.constant 0 : i32
    return %arg0, %c0_i32 : i32, i32
  }
  func.func @transform_1(%arg0: i32, %arg1: i32) -> (i32, i32) {
    %c0_i32 = arith.constant 0 : i32
    %c0_i32_0 = arith.constant 0 : i32
    return %c0_i32, %arg1 : i32, i32
  }
  func.func @transform_2(%arg0: i32, %arg1: i32) -> (i32, i32) {
    %c0_i32 = arith.constant 0 : i32
    %c0_i32_0 = arith.constant 0 : i32
    return %c0_i32, %arg1 : i32, i32
  }
  func.func @transform_3(%arg0: i32, %arg1: i32) -> (i32, i32) {
    %c0_i32 = arith.constant 0 : i32
    return %arg0, %arg1 : i32, i32
  }
}

module attributes {stable_mosaic.version = 11 : i64} {
  func.func @_mm_single_k_kernel(%arg0: i32, %arg1: i32, %arg2: memref<32x640xbf16, #tpu.memory_space<vmem>>, %arg3: memref<640x128xbf16, #tpu.memory_space<vmem>>, %arg4: memref<1x128xf32, #tpu.memory_space<vmem>>, %arg5: memref<32x128xbf16, #tpu.memory_space<vmem>>) attributes {dimension_semantics = [#tpu.dimension_semantics<parallel>, #tpu.dimension_semantics<parallel>], iteration_bounds = array<i64: 1, 1>, scalar_prefetch = 0 : i64, scratch_operands = 0 : i64, tpu.core_type = #tpu.core_type<tc>, window_params = [{transform_indices = @transform_0, window_bounds = array<i64: 32, 640>}, {transform_indices = @transform_1, window_bounds = array<i64: 640, 128>}, {transform_indices = @transform_2, window_bounds = array<i64: 1, 128>}, {transform_indices = @transform_3, window_bounds = array<i64: 32, 128>}]} {
    %c0 = arith.constant 0 : index
    %c0_0 = arith.constant 0 : index
    %0 = vector.load %arg2[%c0, %c0_0] : memref<32x640xbf16, #tpu.memory_space<vmem>>, vector<32x640xbf16>
    %c0_1 = arith.constant 0 : index
    %c0_2 = arith.constant 0 : index
    %1 = vector.load %arg3[%c0_1, %c0_2] : memref<640x128xbf16, #tpu.memory_space<vmem>>, vector<640x128xbf16>
    %cst = arith.constant dense<0.000000e+00> : vector<32x128xf32>
    %2 = tpu.matmul %0, %1, %cst {dimension_numbers = #tpu.dot_dimension_numbers<[1], [0], [0], [1], [0, 0, 1, 1], [], []>} : vector<32x640xbf16>, vector<640x128xbf16>, vector<32x128xf32> -> vector<32x128xf32>
    %c0_3 = arith.constant 0 : index
    %c0_4 = arith.constant 0 : index
    %3 = vector.load %arg4[%c0_3, %c0_4] : memref<1x128xf32, #tpu.memory_space<vmem>>, vector<1x128xf32>
    %4 = vector.broadcast %3 : vector<1x128xf32> to vector<32x128xf32>
    %5 = arith.addf %2, %4 : vector<32x128xf32>
    %cst_5 = arith.constant 0.000000e+00 : f32
    %6 = vector.broadcast %cst_5 : f32 to vector<32x128xf32>
    %7 = arith.maximumf %5, %6 : vector<32x128xf32>
    %8 = arith.truncf %7 : vector<32x128xf32> to vector<32x128xbf16>
    %c0_6 = arith.constant 0 : index
    %c0_7 = arith.constant 0 : index
    %9 = vector.load %arg5[%c0_6, %c0_7] : memref<32x128xbf16, #tpu.memory_space<vmem>>, vector<32x128xbf16>
    tpu.vector_store %arg5[%c0_6, %c0_7], %8 {strides = array<i32>} : memref<32x128xbf16, #tpu.memory_space<vmem>>, vector<32x128xbf16>,
    return
  }
  func.func @transform_0(%arg0: i32, %arg1: i32) -> (i32, i32) {
    %c0_i32 = arith.constant 0 : i32
    %c0_i32_0 = arith.constant 0 : i32
    return %arg0, %c0_i32 : i32, i32
  }
  func.func @transform_1(%arg0: i32, %arg1: i32) -> (i32, i32) {
    %c0_i32 = arith.constant 0 : i32
    %c0_i32_0 = arith.constant 0 : i32
    return %c0_i32, %arg1 : i32, i32
  }
  func.func @transform_2(%arg0: i32, %arg1: i32) -> (i32, i32) {
    %c0_i32 = arith.constant 0 : i32
    %c0_i32_0 = arith.constant 0 : i32
    return %c0_i32, %arg1 : i32, i32
  }
  func.func @transform_3(%arg0: i32, %arg1: i32) -> (i32, i32) {
    %c0_i32 = arith.constant 0 : i32
    return %arg0, %arg1 : i32, i32
  }
}

module attributes {stable_mosaic.version = 11 : i64} {
  func.func @_mm_single_k_kernel(%arg0: i32, %arg1: i32, %arg2: memref<16x640xbf16, #tpu.memory_space<vmem>>, %arg3: memref<640x128xbf16, #tpu.memory_space<vmem>>, %arg4: memref<1x128xf32, #tpu.memory_space<vmem>>, %arg5: memref<16x128xbf16, #tpu.memory_space<vmem>>) attributes {dimension_semantics = [#tpu.dimension_semantics<parallel>, #tpu.dimension_semantics<parallel>], iteration_bounds = array<i64: 1, 1>, scalar_prefetch = 0 : i64, scratch_operands = 0 : i64, tpu.core_type = #tpu.core_type<tc>, window_params = [{transform_indices = @transform_0, window_bounds = array<i64: 16, 640>}, {transform_indices = @transform_1, window_bounds = array<i64: 640, 128>}, {transform_indices = @transform_2, window_bounds = array<i64: 1, 128>}, {transform_indices = @transform_3, window_bounds = array<i64: 16, 128>}]} {
    %c0 = arith.constant 0 : index
    %c0_0 = arith.constant 0 : index
    %0 = vector.load %arg2[%c0, %c0_0] : memref<16x640xbf16, #tpu.memory_space<vmem>>, vector<16x640xbf16>
    %c0_1 = arith.constant 0 : index
    %c0_2 = arith.constant 0 : index
    %1 = vector.load %arg3[%c0_1, %c0_2] : memref<640x128xbf16, #tpu.memory_space<vmem>>, vector<640x128xbf16>
    %cst = arith.constant dense<0.000000e+00> : vector<16x128xf32>
    %2 = tpu.matmul %0, %1, %cst {dimension_numbers = #tpu.dot_dimension_numbers<[1], [0], [0], [1], [0, 0, 1, 1], [], []>} : vector<16x640xbf16>, vector<640x128xbf16>, vector<16x128xf32> -> vector<16x128xf32>
    %c0_3 = arith.constant 0 : index
    %c0_4 = arith.constant 0 : index
    %3 = vector.load %arg4[%c0_3, %c0_4] : memref<1x128xf32, #tpu.memory_space<vmem>>, vector<1x128xf32>
    %4 = vector.broadcast %3 : vector<1x128xf32> to vector<16x128xf32>
    %5 = arith.addf %2, %4 : vector<16x128xf32>
    %6 = arith.truncf %5 : vector<16x128xf32> to vector<16x128xbf16>
    %c0_5 = arith.constant 0 : index
    %c0_6 = arith.constant 0 : index
    %7 = vector.load %arg5[%c0_5, %c0_6] : memref<16x128xbf16, #tpu.memory_space<vmem>>, vector<16x128xbf16>
    tpu.vector_store %arg5[%c0_5, %c0_6], %6 {strides = array<i32>} : memref<16x128xbf16, #tpu.memory_space<vmem>>, vector<16x128xbf16>,
    return
  }
  func.func @transform_0(%arg0: i32, %arg1: i32) -> (i32, i32) {
    %c0_i32 = arith.constant 0 : i32
    %c0_i32_0 = arith.constant 0 : i32
    return %arg0, %c0_i32 : i32, i32
  }
  func.func @transform_1(%arg0: i32, %arg1: i32) -> (i32, i32) {
    %c0_i32 = arith.constant 0 : i32
    %c0_i32_0 = arith.constant 0 : i32
    return %c0_i32, %arg1 : i32, i32
  }
  func.func @transform_2(%arg0: i32, %arg1: i32) -> (i32, i32) {
    %c0_i32 = arith.constant 0 : i32
    %c0_i32_0 = arith.constant 0 : i32
    return %c0_i32, %arg1 : i32, i32
  }
  func.func @transform_3(%arg0: i32, %arg1: i32) -> (i32, i32) {
    %c0_i32 = arith.constant 0 : i32
    return %arg0, %arg1 : i32, i32
  }
}

module attributes {stable_mosaic.version = 11 : i64} {
  func.func @_mm_single_k_kernel(%arg0: i32, %arg1: i32, %arg2: memref<16x640xbf16, #tpu.memory_space<vmem>>, %arg3: memref<640x128xbf16, #tpu.memory_space<vmem>>, %arg4: memref<1x128xf32, #tpu.memory_space<vmem>>, %arg5: memref<16x128xbf16, #tpu.memory_space<vmem>>) attributes {dimension_semantics = [#tpu.dimension_semantics<parallel>, #tpu.dimension_semantics<parallel>], iteration_bounds = array<i64: 1, 1>, scalar_prefetch = 0 : i64, scratch_operands = 0 : i64, tpu.core_type = #tpu.core_type<tc>, window_params = [{transform_indices = @transform_0, window_bounds = array<i64: 16, 640>}, {transform_indices = @transform_1, window_bounds = array<i64: 640, 128>}, {transform_indices = @transform_2, window_bounds = array<i64: 1, 128>}, {transform_indices = @transform_3, window_bounds = array<i64: 16, 128>}]} {
    %c0 = arith.constant 0 : index
    %c0_0 = arith.constant 0 : index
    %0 = vector.load %arg2[%c0, %c0_0] : memref<16x640xbf16, #tpu.memory_space<vmem>>, vector<16x640xbf16>
    %c0_1 = arith.constant 0 : index
    %c0_2 = arith.constant 0 : index
    %1 = vector.load %arg3[%c0_1, %c0_2] : memref<640x128xbf16, #tpu.memory_space<vmem>>, vector<640x128xbf16>
    %cst = arith.constant dense<0.000000e+00> : vector<16x128xf32>
    %2 = tpu.matmul %0, %1, %cst {dimension_numbers = #tpu.dot_dimension_numbers<[1], [0], [0], [1], [0, 0, 1, 1], [], []>} : vector<16x640xbf16>, vector<640x128xbf16>, vector<16x128xf32> -> vector<16x128xf32>
    %c0_3 = arith.constant 0 : index
    %c0_4 = arith.constant 0 : index
    %3 = vector.load %arg4[%c0_3, %c0_4] : memref<1x128xf32, #tpu.memory_space<vmem>>, vector<1x128xf32>
    %4 = vector.broadcast %3 : vector<1x128xf32> to vector<16x128xf32>
    %5 = arith.addf %2, %4 : vector<16x128xf32>
    %cst_5 = arith.constant 0.000000e+00 : f32
    %6 = vector.broadcast %cst_5 : f32 to vector<16x128xf32>
    %7 = arith.maximumf %5, %6 : vector<16x128xf32>
    %8 = arith.truncf %7 : vector<16x128xf32> to vector<16x128xbf16>
    %c0_6 = arith.constant 0 : index
    %c0_7 = arith.constant 0 : index
    %9 = vector.load %arg5[%c0_6, %c0_7] : memref<16x128xbf16, #tpu.memory_space<vmem>>, vector<16x128xbf16>
    tpu.vector_store %arg5[%c0_6, %c0_7], %8 {strides = array<i32>} : memref<16x128xbf16, #tpu.memory_space<vmem>>, vector<16x128xbf16>,
    return
  }
  func.func @transform_0(%arg0: i32, %arg1: i32) -> (i32, i32) {
    %c0_i32 = arith.constant 0 : i32
    %c0_i32_0 = arith.constant 0 : i32
    return %arg0, %c0_i32 : i32, i32
  }
  func.func @transform_1(%arg0: i32, %arg1: i32) -> (i32, i32) {
    %c0_i32 = arith.constant 0 : i32
    %c0_i32_0 = arith.constant 0 : i32
    return %c0_i32, %arg1 : i32, i32
  }
  func.func @transform_2(%arg0: i32, %arg1: i32) -> (i32, i32) {
    %c0_i32 = arith.constant 0 : i32
    %c0_i32_0 = arith.constant 0 : i32
    return %c0_i32, %arg1 : i32, i32
  }
  func.func @transform_3(%arg0: i32, %arg1: i32) -> (i32, i32) {
    %c0_i32 = arith.constant 0 : i32
    return %arg0, %arg1 : i32, i32
  }
}

module attributes {stable_mosaic.version = 11 : i64} {
  func.func @_lstm_chain_kernel(%arg0: i32, %arg1: memref<8x128xbf16, #tpu.memory_space<vmem>>, %arg2: memref<128x768xbf16, #tpu.memory_space<vmem>>, %arg3: memref<1x768xf32, #tpu.memory_space<vmem>>, %arg4: memref<4x256x768xbf16, #tpu.memory_space<vmem>>, %arg5: memref<4x1x768xf32, #tpu.memory_space<vmem>>, %arg6: memref<8x256xf32, #tpu.memory_space<vmem>>) attributes {dimension_semantics = [#tpu.dimension_semantics<arbitrary>], iteration_bounds = array<i64: 1>, scalar_prefetch = 0 : i64, scratch_operands = 0 : i64, tpu.core_type = #tpu.core_type<tc>, window_params = [{pipeline_mode = #tpu.pipeline_mode<synchronous>, transform_indices = @transform_0, window_bounds = array<i64: 8, 128>}, {pipeline_mode = #tpu.pipeline_mode<synchronous>, transform_indices = @transform_1, window_bounds = array<i64: 128, 768>}, {pipeline_mode = #tpu.pipeline_mode<synchronous>, transform_indices = @transform_2, window_bounds = array<i64: 1, 768>}, {pipeline_mode = #tpu.pipeline_mode<synchronous>, transform_indices = @transform_3, window_bounds = array<i64: 4, 256, 768>}, {pipeline_mode = #tpu.pipeline_mode<synchronous>, transform_indices = @transform_4, window_bounds = array<i64: 4, 1, 768>}, {pipeline_mode = #tpu.pipeline_mode<synchronous>, transform_indices = @transform_5, window_bounds = array<i64: 8, 256>}]} {
    %c0 = arith.constant 0 : index
    %c0_0 = arith.constant 0 : index
    %0 = vector.load %arg1[%c0, %c0_0] : memref<8x128xbf16, #tpu.memory_space<vmem>>, vector<8x128xbf16>
    %c0_1 = arith.constant 0 : index
    %c0_2 = arith.constant 0 : index
    %1 = vector.load %arg2[%c0_1, %c0_2] : memref<128x768xbf16, #tpu.memory_space<vmem>>, vector<128x768xbf16>
    %cst = arith.constant dense<0.000000e+00> : vector<8x768xf32>
    %2 = tpu.matmul %0, %1, %cst {dimension_numbers = #tpu.dot_dimension_numbers<[1], [0], [0], [1], [0, 0, 1, 1], [], []>} : vector<8x128xbf16>, vector<128x768xbf16>, vector<8x768xf32> -> vector<8x768xf32>
    %c0_3 = arith.constant 0 : index
    %c0_4 = arith.constant 0 : index
    %3 = vector.load %arg3[%c0_3, %c0_4] : memref<1x768xf32, #tpu.memory_space<vmem>>, vector<1x768xf32>
    %4 = vector.broadcast %3 : vector<1x768xf32> to vector<8x768xf32>
    %5 = arith.addf %2, %4 : vector<8x768xf32>
    %6 = vector.extract_strided_slice %5 {offsets = [0, 0], sizes = [8, 256], strides = [1, 1]} : vector<8x768xf32> to vector<8x256xf32>
    %7 = arith.negf %6 : vector<8x256xf32>
    %8 = math.exp %7 : vector<8x256xf32>
    %cst_5 = arith.constant 1.000000e+00 : f32
    %9 = vector.broadcast %cst_5 : f32 to vector<8x256xf32>
    %10 = arith.addf %9, %8 : vector<8x256xf32>
    %11 = arith.divf %9, %10 : vector<8x256xf32>
    %12 = vector.extract_strided_slice %5 {offsets = [0, 256], sizes = [8, 256], strides = [1, 1]} : vector<8x768xf32> to vector<8x256xf32>
    %13 = arith.negf %12 : vector<8x256xf32>
    %14 = math.exp %13 : vector<8x256xf32>
    %cst_6 = arith.constant 1.000000e+00 : f32
    %15 = vector.broadcast %cst_6 : f32 to vector<8x256xf32>
    %16 = arith.addf %15, %14 : vector<8x256xf32>
    %17 = arith.divf %15, %16 : vector<8x256xf32>
    %18 = vector.extract_strided_slice %5 {offsets = [0, 512], sizes = [8, 256], strides = [1, 1]} : vector<8x768xf32> to vector<8x256xf32>
    %19 = math.tanh %18 : vector<8x256xf32>
    %20 = arith.mulf %11, %19 : vector<8x256xf32>
    %21 = math.tanh %20 : vector<8x256xf32>
    %22 = arith.mulf %17, %21 : vector<8x256xf32>
    %23 = arith.truncf %22 : vector<8x256xf32> to vector<8x256xbf16>
    %c0_7 = arith.constant 0 : index
    %c0_8 = arith.constant 0 : index
    %c0_9 = arith.constant 0 : index
    %24 = vector.load %arg4[%c0_7, %c0_8, %c0_9] : memref<4x256x768xbf16, #tpu.memory_space<vmem>>, vector<1x256x768xbf16>
    %25 = vector.shape_cast %24 : vector<1x256x768xbf16> to vector<256x768xbf16>
    %cst_10 = arith.constant dense<0.000000e+00> : vector<8x768xf32>
    %26 = tpu.matmul %23, %25, %cst_10 {dimension_numbers = #tpu.dot_dimension_numbers<[1], [0], [0], [1], [0, 0, 1, 1], [], []>} : vector<8x256xbf16>, vector<256x768xbf16>, vector<8x768xf32> -> vector<8x768xf32>
    %c0_11 = arith.constant 0 : index
    %c0_12 = arith.constant 0 : index
    %c0_13 = arith.constant 0 : index
    %27 = vector.load %arg5[%c0_11, %c0_12, %c0_13] : memref<4x1x768xf32, #tpu.memory_space<vmem>>, vector<1x1x768xf32>
    %28 = vector.shape_cast %27 : vector<1x1x768xf32> to vector<1x768xf32>
    %29 = vector.broadcast %28 : vector<1x768xf32> to vector<8x768xf32>
    %30 = arith.addf %26, %29 : vector<8x768xf32>
    %31 = vector.extract_strided_slice %30 {offsets = [0, 0], sizes = [8, 256], strides = [1, 1]} : vector<8x768xf32> to vector<8x256xf32>
    %32 = arith.negf %31 : vector<8x256xf32>
    %33 = math.exp %32 : vector<8x256xf32>
    %cst_14 = arith.constant 1.000000e+00 : f32
    %34 = vector.broadcast %cst_14 : f32 to vector<8x256xf32>
    %35 = arith.addf %34, %33 : vector<8x256xf32>
    %36 = arith.divf %34, %35 : vector<8x256xf32>
    %37 = vector.extract_strided_slice %30 {offsets = [0, 256], sizes = [8, 256], strides = [1, 1]} : vector<8x768xf32> to vector<8x256xf32>
    %38 = arith.negf %37 : vector<8x256xf32>
    %39 = math.exp %38 : vector<8x256xf32>
    %cst_15 = arith.constant 1.000000e+00 : f32
    %40 = vector.broadcast %cst_15 : f32 to vector<8x256xf32>
    %41 = arith.addf %40, %39 : vector<8x256xf32>
    %42 = arith.divf %40, %41 : vector<8x256xf32>
    %43 = vector.extract_strided_slice %30 {offsets = [0, 512], sizes = [8, 256], strides = [1, 1]} : vector<8x768xf32> to vector<8x256xf32>
    %44 = math.tanh %43 : vector<8x256xf32>
    %45 = arith.mulf %36, %44 : vector<8x256xf32>
    %46 = math.tanh %45 : vector<8x256xf32>
    %47 = arith.mulf %42, %46 : vector<8x256xf32>
    %48 = arith.truncf %47 : vector<8x256xf32> to vector<8x256xbf16>
    %c1 = arith.constant 1 : index
    %c0_16 = arith.constant 0 : index
    %c0_17 = arith.constant 0 : index
    %49 = vector.load %arg4[%c1, %c0_16, %c0_17] : memref<4x256x768xbf16, #tpu.memory_space<vmem>>, vector<1x256x768xbf16>
    %50 = vector.shape_cast %49 : vector<1x256x768xbf16> to vector<256x768xbf16>
    %cst_18 = arith.constant dense<0.000000e+00> : vector<8x768xf32>
    %51 = tpu.matmul %48, %50, %cst_18 {dimension_numbers = #tpu.dot_dimension_numbers<[1], [0], [0], [1], [0, 0, 1, 1], [], []>} : vector<8x256xbf16>, vector<256x768xbf16>, vector<8x768xf32> -> vector<8x768xf32>
    %c1_19 = arith.constant 1 : index
    %c0_20 = arith.constant 0 : index
    %c0_21 = arith.constant 0 : index
    %52 = vector.load %arg5[%c1_19, %c0_20, %c0_21] : memref<4x1x768xf32, #tpu.memory_space<vmem>>, vector<1x1x768xf32>
    %53 = vector.shape_cast %52 : vector<1x1x768xf32> to vector<1x768xf32>
    %54 = vector.broadcast %53 : vector<1x768xf32> to vector<8x768xf32>
    %55 = arith.addf %51, %54 : vector<8x768xf32>
    %56 = vector.extract_strided_slice %55 {offsets = [0, 0], sizes = [8, 256], strides = [1, 1]} : vector<8x768xf32> to vector<8x256xf32>
    %57 = arith.negf %56 : vector<8x256xf32>
    %58 = math.exp %57 : vector<8x256xf32>
    %cst_22 = arith.constant 1.000000e+00 : f32
    %59 = vector.broadcast %cst_22 : f32 to vector<8x256xf32>
    %60 = arith.addf %59, %58 : vector<8x256xf32>
    %61 = arith.divf %59, %60 : vector<8x256xf32>
    %62 = vector.extract_strided_slice %55 {offsets = [0, 256], sizes = [8, 256], strides = [1, 1]} : vector<8x768xf32> to vector<8x256xf32>
    %63 = arith.negf %62 : vector<8x256xf32>
    %64 = math.exp %63 : vector<8x256xf32>
    %cst_23 = arith.constant 1.000000e+00 : f32
    %65 = vector.broadcast %cst_23 : f32 to vector<8x256xf32>
    %66 = arith.addf %65, %64 : vector<8x256xf32>
    %67 = arith.divf %65, %66 : vector<8x256xf32>
    %68 = vector.extract_strided_slice %55 {offsets = [0, 512], sizes = [8, 256], strides = [1, 1]} : vector<8x768xf32> to vector<8x256xf32>
    %69 = math.tanh %68 : vector<8x256xf32>
    %70 = arith.mulf %61, %69 : vector<8x256xf32>
    %71 = math.tanh %70 : vector<8x256xf32>
    %72 = arith.mulf %67, %71 : vector<8x256xf32>
    %73 = arith.truncf %72 : vector<8x256xf32> to vector<8x256xbf16>
    %c2 = arith.constant 2 : index
    %c0_24 = arith.constant 0 : index
    %c0_25 = arith.constant 0 : index
    %74 = vector.load %arg4[%c2, %c0_24, %c0_25] : memref<4x256x768xbf16, #tpu.memory_space<vmem>>, vector<1x256x768xbf16>
    %75 = vector.shape_cast %74 : vector<1x256x768xbf16> to vector<256x768xbf16>
    %cst_26 = arith.constant dense<0.000000e+00> : vector<8x768xf32>
    %76 = tpu.matmul %73, %75, %cst_26 {dimension_numbers = #tpu.dot_dimension_numbers<[1], [0], [0], [1], [0, 0, 1, 1], [], []>} : vector<8x256xbf16>, vector<256x768xbf16>, vector<8x768xf32> -> vector<8x768xf32>
    %c2_27 = arith.constant 2 : index
    %c0_28 = arith.constant 0 : index
    %c0_29 = arith.constant 0 : index
    %77 = vector.load %arg5[%c2_27, %c0_28, %c0_29] : memref<4x1x768xf32, #tpu.memory_space<vmem>>, vector<1x1x768xf32>
    %78 = vector.shape_cast %77 : vector<1x1x768xf32> to vector<1x768xf32>
    %79 = vector.broadcast %78 : vector<1x768xf32> to vector<8x768xf32>
    %80 = arith.addf %76, %79 : vector<8x768xf32>
    %81 = vector.extract_strided_slice %80 {offsets = [0, 0], sizes = [8, 256], strides = [1, 1]} : vector<8x768xf32> to vector<8x256xf32>
    %82 = arith.negf %81 : vector<8x256xf32>
    %83 = math.exp %82 : vector<8x256xf32>
    %cst_30 = arith.constant 1.000000e+00 : f32
    %84 = vector.broadcast %cst_30 : f32 to vector<8x256xf32>
    %85 = arith.addf %84, %83 : vector<8x256xf32>
    %86 = arith.divf %84, %85 : vector<8x256xf32>
    %87 = vector.extract_strided_slice %80 {offsets = [0, 256], sizes = [8, 256], strides = [1, 1]} : vector<8x768xf32> to vector<8x256xf32>
    %88 = arith.negf %87 : vector<8x256xf32>
    %89 = math.exp %88 : vector<8x256xf32>
    %cst_31 = arith.constant 1.000000e+00 : f32
    %90 = vector.broadcast %cst_31 : f32 to vector<8x256xf32>
    %91 = arith.addf %90, %89 : vector<8x256xf32>
    %92 = arith.divf %90, %91 : vector<8x256xf32>
    %93 = vector.extract_strided_slice %80 {offsets = [0, 512], sizes = [8, 256], strides = [1, 1]} : vector<8x768xf32> to vector<8x256xf32>
    %94 = math.tanh %93 : vector<8x256xf32>
    %95 = arith.mulf %86, %94 : vector<8x256xf32>
    %96 = math.tanh %95 : vector<8x256xf32>
    %97 = arith.mulf %92, %96 : vector<8x256xf32>
    %98 = arith.truncf %97 : vector<8x256xf32> to vector<8x256xbf16>
    %c3 = arith.constant 3 : index
    %c0_32 = arith.constant 0 : index
    %c0_33 = arith.constant 0 : index
    %99 = vector.load %arg4[%c3, %c0_32, %c0_33] : memref<4x256x768xbf16, #tpu.memory_space<vmem>>, vector<1x256x768xbf16>
    %100 = vector.shape_cast %99 : vector<1x256x768xbf16> to vector<256x768xbf16>
    %cst_34 = arith.constant dense<0.000000e+00> : vector<8x768xf32>
    %101 = tpu.matmul %98, %100, %cst_34 {dimension_numbers = #tpu.dot_dimension_numbers<[1], [0], [0], [1], [0, 0, 1, 1], [], []>} : vector<8x256xbf16>, vector<256x768xbf16>, vector<8x768xf32> -> vector<8x768xf32>
    %c3_35 = arith.constant 3 : index
    %c0_36 = arith.constant 0 : index
    %c0_37 = arith.constant 0 : index
    %102 = vector.load %arg5[%c3_35, %c0_36, %c0_37] : memref<4x1x768xf32, #tpu.memory_space<vmem>>, vector<1x1x768xf32>
    %103 = vector.shape_cast %102 : vector<1x1x768xf32> to vector<1x768xf32>
    %104 = vector.broadcast %103 : vector<1x768xf32> to vector<8x768xf32>
    %105 = arith.addf %101, %104 : vector<8x768xf32>
    %106 = vector.extract_strided_slice %105 {offsets = [0, 0], sizes = [8, 256], strides = [1, 1]} : vector<8x768xf32> to vector<8x256xf32>
    %107 = arith.negf %106 : vector<8x256xf32>
    %108 = math.exp %107 : vector<8x256xf32>
    %cst_38 = arith.constant 1.000000e+00 : f32
    %109 = vector.broadcast %cst_38 : f32 to vector<8x256xf32>
    %110 = arith.addf %109, %108 : vector<8x256xf32>
    %111 = arith.divf %109, %110 : vector<8x256xf32>
    %112 = vector.extract_strided_slice %105 {offsets = [0, 256], sizes = [8, 256], strides = [1, 1]} : vector<8x768xf32> to vector<8x256xf32>
    %113 = arith.negf %112 : vector<8x256xf32>
    %114 = math.exp %113 : vector<8x256xf32>
    %cst_39 = arith.constant 1.000000e+00 : f32
    %115 = vector.broadcast %cst_39 : f32 to vector<8x256xf32>
    %116 = arith.addf %115, %114 : vector<8x256xf32>
    %117 = arith.divf %115, %116 : vector<8x256xf32>
    %118 = vector.extract_strided_slice %105 {offsets = [0, 512], sizes = [8, 256], strides = [1, 1]} : vector<8x768xf32> to vector<8x256xf32>
    %119 = math.tanh %118 : vector<8x256xf32>
    %120 = arith.mulf %111, %119 : vector<8x256xf32>
    %121 = math.tanh %120 : vector<8x256xf32>
    %122 = arith.mulf %117, %121 : vector<8x256xf32>
    %c0_40 = arith.constant 0 : index
    %c0_41 = arith.constant 0 : index
    %123 = vector.load %arg6[%c0_40, %c0_41] : memref<8x256xf32, #tpu.memory_space<vmem>>, vector<8x256xf32>
    tpu.vector_store %arg6[%c0_40, %c0_41], %122 {strides = array<i32>} : memref<8x256xf32, #tpu.memory_space<vmem>>, vector<8x256xf32>,
    return
  }
  func.func @transform_0(%arg0: i32) -> (i32, i32) {
    %c0_i32 = arith.constant 0 : i32
    %c0_i32_0 = arith.constant 0 : i32
    %c0_i32_1 = arith.constant 0 : i32
    return %c0_i32, %c0_i32_0 : i32, i32
  }
  func.func @transform_1(%arg0: i32) -> (i32, i32) {
    %c0_i32 = arith.constant 0 : i32
    %c0_i32_0 = arith.constant 0 : i32
    %c0_i32_1 = arith.constant 0 : i32
    return %c0_i32, %c0_i32_0 : i32, i32
  }
  func.func @transform_2(%arg0: i32) -> (i32, i32) {
    %c0_i32 = arith.constant 0 : i32
    %c0_i32_0 = arith.constant 0 : i32
    %c0_i32_1 = arith.constant 0 : i32
    return %c0_i32, %c0_i32_0 : i32, i32
  }
  func.func @transform_3(%arg0: i32) -> (i32, i32, i32) {
    %c0_i32 = arith.constant 0 : i32
    %c0_i32_0 = arith.constant 0 : i32
    %c0_i32_1 = arith.constant 0 : i32
    %c0_i32_2 = arith.constant 0 : i32
    return %c0_i32, %c0_i32_0, %c0_i32_1 : i32, i32, i32
  }
  func.func @transform_4(%arg0: i32) -> (i32, i32, i32) {
    %c0_i32 = arith.constant 0 : i32
    %c0_i32_0 = arith.constant 0 : i32
    %c0_i32_1 = arith.constant 0 : i32
    %c0_i32_2 = arith.constant 0 : i32
    return %c0_i32, %c0_i32_0, %c0_i32_1 : i32, i32, i32
  }
  func.func @transform_5(%arg0: i32) -> (i32, i32) {
    %c0_i32 = arith.constant 0 : i32
    %c0_i32_0 = arith.constant 0 : i32
    %c0_i32_1 = arith.constant 0 : i32
    return %c0_i32, %c0_i32_0 : i32, i32
  }
}

</mosaic_0001>

<bundles_post_ra>
// kernel: red_model_forward.8
= control target key start
LH: loop header
LB: loop body
LE: loop exit
PB: predicated region body
PF: predicated region fallthrough
CT: control target
= control target key end

     0   :  { %s836_s1 = inlined_call_operand.vmem [shape: bf16[256,128], index: 1, kind: input, shape index: {}]   ;;  %s837_s0 = inlined_call_operand.vmem [shape: bf16[128,256], index: 0, kind: input, shape index: {}]   ;;  %s838_s2 = inlined_call_operand.vmem [shape: f32[1,128], index: 2, kind: input, shape index: {}]   ;;  %s839_s3 = inlined_call_operand.vmem [shape: bf16[128,128], index: 3, kind: output, shape index: {}]  }
   0x1   :  { %v635_v0 = vld [vmem:[%s836_s1 + $0x40] sm:$0xff]   ;;  %v637_v2 = vld [vmem:[%s836_s1 + $0x48] sm:$0xff]   ;;  %v639_v4 = vld [vmem:[%s836_s1 + $0x50] sm:$0xff]  }
   0x2   :  { %v636_v1 = vld [vmem:[%s836_s1] sm:$0xff]   ;;  %555 = vmatprep.subr.bf16.mxu0 %v635_v0  ;;  %619 = vmatprep.subr.bf16.mxu1 %v635_v0  ;;  %v638_v3 = vld [vmem:[%s836_s1 + $0x8] sm:$0xff]   ;;  %v640_v5 = vld [vmem:[%s836_s1 + $0x10] sm:$0xff]  }
   0x3   :  { %556 = vmatpush3.bf16.msra.mxu0 %v636_v1  ;;  %627 = vmatpush3.bf16.msra.mxu1 %v636_v1  ;;  %v641_v6 = vld [vmem:[%s836_s1 + $0x58] sm:$0xff]   ;;  %v643_v8 = vld [vmem:[%s836_s1 + $0x60] sm:$0xff]   ;;  %v645_v10 = vld [vmem:[%s836_s1 + $0x68] sm:$0xff]  }
   0x4   :  { %557 = vmatprep.subr.bf16.mxu0 %v637_v2  ;;  %620 = vmatprep.subr.bf16.mxu1 %v637_v2  ;;  %v642_v7 = vld [vmem:[%s836_s1 + $0x18] sm:$0xff]   ;;  %v644_v9 = vld [vmem:[%s836_s1 + $0x20] sm:$0xff]   ;;  %v646_v13 = vld [vmem:[%s836_s1 + $0x28] sm:$0xff]  }
   0x5   :  { %v653_v11 = vld [vmem:[%s837_s0 + $0x4] ss:$8 sps:$4 sm:$0xff]   ;;  %v647_v14 = vld [vmem:[%s836_s1 + $0x70] sm:$0xff]   ;;  %v649_v16 = vld [vmem:[%s836_s1 + $0x78] sm:$0xff]  }
   0x6   :  { %v656_v12 = vld [vmem:[%s837_s0 + $0x44] ss:$8 sps:$4 sm:$0xff]   ;;  %278 = vmatprep.mubr.bf16.mxu0 %v653_v11  ;;  %v648_v15 = vld [vmem:[%s836_s1 + $0x30] sm:$0xff]   ;;  %v650_v17 = vld [vmem:[%s836_s1 + $0x38] sm:$0xff]  }
   0x7   :  { %558 = vmatpush3.bf16.msra.mxu0 %v638_v3  ;;  %628 = vmatpush3.bf16.msra.mxu1 %v638_v3  ;;  %v651_v18 = vld [vmem:[%s837_s0] ss:$8 sps:$4 sm:$0xff]   ;;  %v657_v20 = vld [vmem:[%s837_s0 + $0x14] ss:$8 sps:$4 sm:$0xff]   ;;  %v661_v22 = vld [vmem:[%s837_s0 + $0x10] ss:$8 sps:$4 sm:$0xff]  }
   0x8   :  { %559 = vmatprep.subr.bf16.mxu0 %v639_v4  ;;  %621 = vmatprep.subr.bf16.mxu1 %v639_v4  ;;  %v654_v19 = vld [vmem:[%s837_s0 + $0x40] ss:$8 sps:$4 sm:$0xff]   ;;  %v659_v21 = vld [vmem:[%s837_s0 + $0x54] ss:$8 sps:$4 sm:$0xff]   ;;  %v662_v23 = vld [vmem:[%s837_s0 + $0x50] ss:$8 sps:$4 sm:$0xff]  }
   0x9   :  { %310 = vmatprep.mubr.bf16.mxu1 %v656_v12  ;;  %v663_v24 = vld [vmem:[%s837_s0 + $0x24] ss:$8 sps:$4 sm:$0xff]   ;;  %v667_v26 = vld [vmem:[%s837_s0 + $0x20] ss:$8 sps:$4 sm:$0xff]   ;;  %v669_v28 = vld [vmem:[%s837_s0 + $0x34] ss:$8 sps:$4 sm:$0xff]  }
   0xa   :  { %v665_v25 = vld [vmem:[%s837_s0 + $0x64] ss:$8 sps:$4 sm:$0xff]   ;;  %v668_v27 = vld [vmem:[%s837_s0 + $0x60] ss:$8 sps:$4 sm:$0xff]   ;;  %v671_v29 = vld [vmem:[%s837_s0 + $0x74] ss:$8 sps:$4 sm:$0xff]  }
   0xb   :  { %560 = vmatpush3.bf16.msra.mxu0 %v640_v5  ;;  %629 = vmatpush3.bf16.msra.mxu1 %v640_v5  ;;  %v673_v30 = vld [vmem:[%s837_s0 + $0x30] ss:$8 sps:$4 sm:$0xff]   ;;  %v794_v34 = vld [vmem:[%s838_s2] ss:$0 sm:$0xff] }
   0xc   :  { %561 = vmatprep.subr.bf16.mxu0 %v641_v6  ;;  %622 = vmatprep.subr.bf16.mxu1 %v641_v6  ;;  %v674_v31 = vld [vmem:[%s837_s0 + $0x70] ss:$8 sps:$4 sm:$0xff]  }
   0xf   :  { %562 = vmatpush3.bf16.msra.mxu0 %v642_v7  ;;  %630 = vmatpush3.bf16.msra.mxu1 %v642_v7 }
  0x10   :  { %563 = vmatprep.subr.bf16.mxu0 %v643_v8  ;;  %623 = vmatprep.subr.bf16.mxu1 %v643_v8 }
  0x13   :  { %564 = vmatpush3.bf16.msra.mxu0 %v644_v9  ;;  %631 = vmatpush3.bf16.msra.mxu1 %v644_v9 }
  0x14   :  { %565 = vmatprep.subr.bf16.mxu0 %v645_v10  ;;  %624 = vmatprep.subr.bf16.mxu1 %v645_v10 }
  0x17   :  { %566 = vmatpush3.bf16.msra.mxu0 %v646_v13  ;;  %632 = vmatpush3.bf16.msra.mxu1 %v646_v13 }
  0x18   :  { %567 = vmatprep.subr.bf16.mxu0 %v647_v14  ;;  %625 = vmatprep.subr.bf16.mxu1 %v647_v14 }
  0x1b   :  { %568 = vmatpush3.bf16.msra.mxu0 %v648_v15  ;;  %633 = vmatpush3.bf16.msra.mxu1 %v648_v15 }
  0x1c   :  { %569 = vmatprep.subr.bf16.mxu0 %v649_v16  ;;  %626 = vmatprep.subr.bf16.mxu1 %v649_v16 }
  0x1f   :  { %570 = vmatpush3.bf16.msra.mxu0 %v650_v17  ;;  %634 = vmatpush3.bf16.msra.mxu1 %v650_v17 }
  0x22   :  { %279 = vmatmul.mubr.bf16.vlgmr.msra.gmra.mrb[0].mxu0 %v651_v18  ;;  %311 = vmatmul.mubr.bf16.vlgmr.msra.gmra.mrb[0].mxu1 %v654_v19 }
  0x23   :  { %286 = vmatprep.mubr.bf16.mxu0 %v657_v20  ;;  %318 = vmatprep.mubr.bf16.mxu1 %v659_v21 }
  0x2a   :  { %287 = vmatmul.mubr.bf16.gmra.mrb[4].mxu0 %v661_v22  ;;  %319 = vmatmul.mubr.bf16.gmra.mrb[4].mxu1 %v662_v23 }
  0x2b   :  { %294 = vmatprep.mubr.bf16.mxu0 %v663_v24  ;;  %326 = vmatprep.mubr.bf16.mxu1 %v665_v25 }
  0x32   :  { %295 = vmatmul.mubr.bf16.gmra.mrb[8].mxu0 %v667_v26  ;;  %327 = vmatmul.mubr.bf16.gmra.mrb[8].mxu1 %v668_v27 }
  0x33   :  { %302 = vmatprep.mubr.bf16.mxu0 %v669_v28  ;;  %334 = vmatprep.mubr.bf16.mxu1 %v671_v29 }
  0x3a   :  { %303 = vmatmul.mubr.bf16.gmra.mrb[12].mxu0 %v673_v30  ;;  %335 = vmatmul.mubr.bf16.gmra.mrb[12].mxu1 %v674_v31 }
  0xf5   :  { %v571_v32 = vpop.f32.mrb[0].mxu0  ;;  %v595_v33 = vpop.f32.mrb[0].mxu1 }
  0xf6   :  { %v572_v35 = vpop.f32.mrb[1].mxu0  ;;  %v596_v36 = vpop.f32.mrb[1].mxu1 }
  0xf7   :  { %v573_v37 = vadd.f32 %v572_v35, %v571_v32  ;;  %v597_v38 = vadd.f32 %v596_v36, %v595_v33  ;;  %v574_v39 = vpop.f32.mrb[2].mxu0  ;;  %v598_v40 = vpop.f32.mrb[2].mxu1 }
  0xf8   :  { %v575_v41 = vpop.f32.mrb[3].mxu0  ;;  %v599_v42 = vpop.f32.mrb[3].mxu1 }
  0xf9   :  { %v281_v43 = vadd.f32 %v573_v37, %v794_v34  ;;  %v313_v44 = vadd.f32 %v597_v38, %v794_v34  ;;  %v576_v45 = vadd.f32 %v575_v41, %v574_v39  ;;  %v600_v46 = vadd.f32 %v599_v42, %v598_v40 }
  0xfb   :  { %v284_v47 = vadd.f32 %v576_v45, %v794_v34  ;;  %v316_v48 = vadd.f32 %v600_v46, %v794_v34  ;;  %v343_v49 = vmax.f32 %v281_v43, 0.0  ;;  %v351_v50 = vmax.f32 %v313_v44, 0.0 }
  0xfd   :  { %v344_v51 = vmax.f32 %v284_v47, 0.0  ;;  %v352_v52 = vmax.f32 %v316_v48, 0.0  ;;  %v577_v53 = vpop.f32.mrb[4].mxu0  ;;  %v601_v54 = vpop.f32.mrb[4].mxu1 }
  0xfe   :  { %v578_v55 = vpop.f32.mrb[5].mxu0  ;;  %v602_v56 = vpop.f32.mrb[5].mxu1 }
  0xff   :  { %v511_v57 = vpack.c.bf16 %v344_v51, %v343_v49  ;;  %v531_v58 = vpack.c.bf16 %v352_v52, %v351_v50  ;;  %v579_v59 = vadd.f32 %v578_v55, %v577_v53  ;;  %v603_v60 = vadd.f32 %v602_v56, %v601_v54  ;;  %v580_v61 = vpop.f32.mrb[6].mxu0  ;;  %v604_v62 = vpop.f32.mrb[6].mxu1 }
 0x100   :  { %v581_v63 = vpop.f32.mrb[7].mxu0  ;;  %v605_v0 = vpop.f32.mrb[7].mxu1 }
 0x101   :  { %512 = vst [vmem:[%s839_s3] sm:$0xff] %v511_v57   ;;  %551 = vst [vmem:[%s839_s3 + $0x20] sm:$0xff] %v531_v58   ;;  %v289_v1 = vadd.f32 %v579_v59, %v794_v34  ;;  %v321_v2 = vadd.f32 %v603_v60, %v794_v34  ;;  %v582_v3 = vadd.f32 %v581_v63, %v580_v61 }
 0x102   :  { %v606_v4 = vadd.f32 %v605_v0, %v604_v62 }
 0x103   :  { %v292_v5 = vadd.f32 %v582_v3, %v794_v34  ;;  %v345_v7 = vmax.f32 %v289_v1, 0.0  ;;  %v353_v8 = vmax.f32 %v321_v2, 0.0 }
 0x104   :  { %v324_v6 = vadd.f32 %v606_v4, %v794_v34 }
 0x105   :  { %v346_v9 = vmax.f32 %v292_v5, 0.0  ;;  %v583_v11 = vpop.f32.mrb[8].mxu0  ;;  %v607_v12 = vpop.f32.mrb[8].mxu1 }
 0x106   :  { %v354_v10 = vmax.f32 %v324_v6, 0.0  ;;  %v584_v13 = vpop.f32.mrb[9].mxu0  ;;  %v608_v14 = vpop.f32.mrb[9].mxu1 }
 0x107   :  { %v516_v15 = vpack.c.bf16 %v346_v9, %v345_v7  ;;  %v585_v17 = vadd.f32 %v584_v13, %v583_v11  ;;  %v609_v18 = vadd.f32 %v608_v14, %v607_v12  ;;  %v586_v19 = vpop.f32.mrb[10].mxu0  ;;  %v610_v20 = vpop.f32.mrb[10].mxu1 }
 0x108   :  { %v536_v16 = vpack.c.bf16 %v354_v10, %v353_v8  ;;  %v587_v21 = vpop.f32.mrb[11].mxu0  ;;  %v611_v22 = vpop.f32.mrb[11].mxu1 }
 0x109   :  { %548 = vst [vmem:[%s839_s3 + $0x8] sm:$0xff] %v516_v15   ;;  %v297_v23 = vadd.f32 %v585_v17, %v794_v34  ;;  %v329_v24 = vadd.f32 %v609_v18, %v794_v34  ;;  %v588_v25 = vadd.f32 %v587_v21, %v586_v19  ;;  %v612_v26 = vadd.f32 %v611_v22, %v610_v20 }
 0x10a   :  { %552 = vst [vmem:[%s839_s3 + $0x28] sm:$0xff] %v536_v16  }
 0x10b   :  { %v300_v27 = vadd.f32 %v588_v25, %v794_v34  ;;  %v332_v28 = vadd.f32 %v612_v26, %v794_v34  ;;  %v347_v29 = vmax.f32 %v297_v23, 0.0  ;;  %v355_v30 = vmax.f32 %v329_v24, 0.0 }
 0x10d   :  { %v348_v31 = vmax.f32 %v300_v27, 0.0  ;;  %v356_v32 = vmax.f32 %v332_v28, 0.0  ;;  %v589_v33 = vpop.f32.mrb[12].mxu0  ;;  %v613_v35 = vpop.f32.mrb[12].mxu1 }
 0x10e   :  { %v590_v36 = vpop.f32.mrb[13].mxu0  ;;  %v614_v37 = vpop.f32.mrb[13].mxu1 }
 0x10f   :  { %v521_v38 = vpack.c.bf16 %v348_v31, %v347_v29  ;;  %v541_v39 = vpack.c.bf16 %v356_v32, %v355_v30  ;;  %v591_v40 = vadd.f32 %v590_v36, %v589_v33  ;;  %v615_v41 = vadd.f32 %v614_v37, %v613_v35  ;;  %v592_v42 = vpop.f32.mrb[14].mxu0  ;;  %v616_v43 = vpop.f32.mrb[14].mxu1 }
 0x110   :  { %v593_v44 = vpop.f32.mrb[15].mxu0  ;;  %v617_v45 = vpop.f32.mrb[15].mxu1 }
 0x111   :  { %549 = vst [vmem:[%s839_s3 + $0x10] sm:$0xff] %v521_v38   ;;  %553 = vst [vmem:[%s839_s3 + $0x30] sm:$0xff] %v541_v39   ;;  %v305_v46 = vadd.f32 %v591_v40, %v794_v34  ;;  %v337_v47 = vadd.f32 %v615_v41, %v794_v34  ;;  %v594_v48 = vadd.f32 %v593_v44, %v592_v42 }
 0x112   :  { %v618_v49 = vadd.f32 %v617_v45, %v616_v43 }
 0x113   :  { %v308_v50 = vadd.f32 %v594_v48, %v794_v34  ;;  %v349_v52 = vmax.f32 %v305_v46, 0.0  ;;  %v357_v53 = vmax.f32 %v337_v47, 0.0 }
 0x114   :  { %v340_v51 = vadd.f32 %v618_v49, %v794_v34 }
 0x115   :  { %v350_v54 = vmax.f32 %v308_v50, 0.0 }
 0x116   :  { %v358_v55 = vmax.f32 %v340_v51, 0.0 }
 0x117   :  { %v526_v56 = vpack.c.bf16 %v350_v54, %v349_v52 }
 0x118   :  { %v546_v57 = vpack.c.bf16 %v358_v55, %v357_v53 }
 0x119   :  { %550 = vst [vmem:[%s839_s3 + $0x18] sm:$0xff] %v526_v56  }
 0x11a   :  { %554 = vst [vmem:[%s839_s3 + $0x38] sm:$0xff] %v546_v57  }

// kernel: red_model_forward.9
= control target key start
LH: loop header
LB: loop body
LE: loop exit
PB: predicated region body
PF: predicated region fallthrough
CT: control target
= control target key end

     0   :  { %s639_s1 = inlined_call_operand.vmem [shape: bf16[384,128], index: 1, kind: input, shape index: {}]   ;;  %s640_s0 = inlined_call_operand.vmem [shape: bf16[32,384], index: 0, kind: input, shape index: {}]   ;;  %s641_s2 = inlined_call_operand.vmem [shape: f32[1,128], index: 2, kind: input, shape index: {}]   ;;  %s642_s3 = inlined_call_operand.vmem [shape: bf16[32,128], index: 3, kind: output, shape index: {}]  }
   0x1   :  { %v488_v0 = vld [vmem:[%s639_s1 + $0x40] sm:$0xff]   ;;  %v490_v2 = vld [vmem:[%s639_s1 + $0x48] sm:$0xff]   ;;  %v493_v5 = vld [vmem:[%s639_s1 + $0x50] sm:$0xff]  }
   0x2   :  { %v489_v1 = vld [vmem:[%s639_s1] sm:$0xff]   ;;  %430 = vmatprep.subr.bf16.mxu0 %v488_v0  ;;  %v492_v4 = vld [vmem:[%s639_s1 + $0x8] sm:$0xff]   ;;  %v495_v7 = vld [vmem:[%s639_s1 + $0x10] sm:$0xff]  }
   0x3   :  { %431 = vmatpush3.bf16.msra.mxu0 %v489_v1  ;;  %v491_v3 = vld [vmem:[%s639_s1 + $0x80] sm:$0xff]   ;;  %v494_v6 = vld [vmem:[%s639_s1 + $0x88] sm:$0xff]   ;;  %v496_v8 = vld [vmem:[%s639_s1 + $0x58] sm:$0xff]  }
   0x4   :  { %432 = vmatprep.subr.bf16.mxu0 %v490_v2  ;;  %468 = vmatprep.subr.bf16.mxu1 %v491_v3  ;;  %v497_v9 = vld [vmem:[%s639_s1 + $0x90] sm:$0xff]   ;;  %v498_v10 = vld [vmem:[%s639_s1 + $0x18] sm:$0xff]   ;;  %v499_v11 = vld [vmem:[%s639_s1 + $0x60] sm:$0xff]  }
   0x5   :  { %469 = vmatpush3.bf16.msra.mxu1 %v491_v3  ;;  %v500_v12 = vld [vmem:[%s639_s1 + $0x98] sm:$0xff]   ;;  %v501_v13 = vld [vmem:[%s639_s1 + $0x20] sm:$0xff]   ;;  %v502_v15 = vld [vmem:[%s639_s1 + $0x68] sm:$0xff]  }
   0x6   :  { %470 = vmatprep.subr.bf16.mxu1 %v494_v6  ;;  %v503_v14 = vld [vmem:[%s639_s1 + $0xa0] sm:$0xff]   ;;  %v504_v16 = vld [vmem:[%s639_s1 + $0x28] sm:$0xff]   ;;  %v505_v18 = vld [vmem:[%s639_s1 + $0x70] sm:$0xff]  }
   0x7   :  { %433 = vmatpush3.bf16.msra.mxu0 %v492_v4  ;;  %v506_v17 = vld [vmem:[%s639_s1 + $0xa8] sm:$0xff]   ;;  %v507_v19 = vld [vmem:[%s639_s1 + $0x30] sm:$0xff]   ;;  %v508_v20 = vld [vmem:[%s639_s1 + $0x78] sm:$0xff]  }
   0x8   :  { %434 = vmatprep.subr.bf16.mxu0 %v493_v5  ;;  %v509_v21 = vld [vmem:[%s639_s1 + $0xb0] sm:$0xff]   ;;  %v510_v23 = vld [vmem:[%s639_s1 + $0x38] sm:$0xff]   ;;  %v511_v26 = vld [vmem:[%s640_s0] ss:$12 sps:$4 sm:$0xff]  }
   0x9   :  { %471 = vmatpush3.bf16.msra.mxu1 %v494_v6  ;;  %v513_v22 = vld [vmem:[%s640_s0 + $0x4] ss:$12 sps:$4 sm:$0xff]   ;;  %v515_v24 = vld [vmem:[%s640_s0 + $0x8] ss:$12 sps:$4 sm:$0xff]   ;;  %v514_v25 = vld [vmem:[%s639_s1 + $0xb8] sm:$0xff]  }
   0xa   :  { %472 = vmatprep.subr.bf16.mxu1 %v497_v9  ;;  %286 = vmatprep.mubr.bf16.mxu0 %v513_v22  ;;  %v517_v27 = vld [vmem:[%s640_s0 + $0x1c] ss:$12 sps:$4 sm:$0xff]   ;;  %v516_v28 = vld [vmem:[%s640_s0 + $0x20] ss:$12 sps:$4 sm:$0xff]   ;;  %v519_v29 = vld [vmem:[%s640_s0 + $0x18] ss:$12 sps:$4 sm:$0xff]  }
   0xb   :  { %435 = vmatpush3.bf16.msra.mxu0 %v495_v7  ;;  %484 = vmatprep.mubr.bf16.mxu1 %v515_v24  ;;  %v380_v32 = vld [vmem:[%s641_s2] ss:$0 sm:$0xff] }
   0xc   :  { %436 = vmatprep.subr.bf16.mxu0 %v496_v8 }
   0xd   :  { %473 = vmatpush3.bf16.msra.mxu1 %v497_v9 }
   0xe   :  { %474 = vmatprep.subr.bf16.mxu1 %v500_v12 }
   0xf   :  { %437 = vmatpush3.bf16.msra.mxu0 %v498_v10 }
  0x10   :  { %438 = vmatprep.subr.bf16.mxu0 %v499_v11 }
  0x11   :  { %475 = vmatpush3.bf16.msra.mxu1 %v500_v12 }
  0x12   :  { %476 = vmatprep.subr.bf16.mxu1 %v503_v14 }
  0x13   :  { %439 = vmatpush3.bf16.msra.mxu0 %v501_v13 }
  0x14   :  { %440 = vmatprep.subr.bf16.mxu0 %v502_v15 }
  0x15   :  { %477 = vmatpush3.bf16.msra.mxu1 %v503_v14 }
  0x16   :  { %478 = vmatprep.subr.bf16.mxu1 %v506_v17 }
  0x17   :  { %441 = vmatpush3.bf16.msra.mxu0 %v504_v16 }
  0x18   :  { %442 = vmatprep.subr.bf16.mxu0 %v505_v18 }
  0x19   :  { %479 = vmatpush3.bf16.msra.mxu1 %v506_v17 }
  0x1a   :  { %480 = vmatprep.subr.bf16.mxu1 %v509_v21 }
  0x1b   :  { %443 = vmatpush3.bf16.msra.mxu0 %v507_v19 }
  0x1c   :  { %444 = vmatprep.subr.bf16.mxu0 %v508_v20 }
  0x1d   :  { %481 = vmatpush3.bf16.msra.mxu1 %v509_v21 }
  0x1e   :  { %482 = vmatprep.subr.bf16.mxu1 %v514_v25 }
  0x1f   :  { %445 = vmatpush3.bf16.msra.mxu0 %v510_v23 }
  0x21   :  { %483 = vmatpush3.bf16.msra.mxu1 %v514_v25 }
  0x22   :  { %287 = vmatmul.mubr.bf16.vlgmr.msra.gmra.mrb[0].mxu0 %v511_v26 }
  0x23   :  { %294 = vmatprep.mubr.bf16.mxu0 %v517_v27 }
  0x24   :  { %485 = vmatmul.mubr.bf16.vlgmr.msra.gmra.mrb[0].mxu1 %v516_v28 }
  0x2a   :  { %295 = vmatmul.mubr.bf16.gmra.mrb[4].mxu0 %v519_v29 }
  0xf5   :  { %v446_v30 = vpop.f32.mrb[0].mxu0 }
  0xf6   :  { %v447_v31 = vpop.f32.mrb[1].mxu0 }
  0xf7   :  { %v448_v33 = vadd.f32 %v447_v31, %v446_v30  ;;  %v449_v34 = vpop.f32.mrb[2].mxu0  ;;  %v486_v36 = vpop.f32.mrb[0].mxu1 }
  0xf8   :  { %v450_v35 = vpop.f32.mrb[3].mxu0  ;;  %v337_v39 = vpop.f32.mrb[1].mxu1 }
  0xf9   :  { %v451_v37 = vadd.f32 %v450_v35, %v449_v34  ;;  %v289_v38 = vadd.f32 %v448_v33, %v380_v32  ;;  %v487_v40 = vpop.f32.mrb[2].mxu1 }
  0xfa   :  { %v340_v43 = vpop.f32.mrb[3].mxu1 }
  0xfb   :  { %v338_v41 = vadd.f32 %v337_v39, %v289_v38  ;;  %v292_v42 = vadd.f32 %v451_v37, %v380_v32 }
  0xfd   :  { %v341_v44 = vadd.f32 %v340_v43, %v292_v42  ;;  %v452_v45 = vpop.f32.mrb[4].mxu0  ;;  %v352_v47 = vmax.f32 %v338_v41, 0.0 }
  0xfe   :  { %v453_v46 = vpop.f32.mrb[5].mxu0 }
  0xff   :  { %v353_v48 = vmax.f32 %v341_v44, 0.0  ;;  %v454_v49 = vadd.f32 %v453_v46, %v452_v45  ;;  %v455_v50 = vpop.f32.mrb[6].mxu0 }
 0x100   :  { %v456_v51 = vpop.f32.mrb[7].mxu0 }
 0x101   :  { %v422_v52 = vpack.c.bf16 %v353_v48, %v352_v47  ;;  %v297_v53 = vadd.f32 %v454_v49, %v380_v32  ;;  %v457_v54 = vadd.f32 %v456_v51, %v455_v50 }
 0x103   :  { %423 = vst [vmem:[%s642_s3] sm:$0xff] %v422_v52   ;;  %v346_v55 = vadd.f32 %v486_v36, %v297_v53  ;;  %v300_v56 = vadd.f32 %v457_v54, %v380_v32 }
 0x105   :  { %v349_v57 = vadd.f32 %v487_v40, %v300_v56  ;;  %v354_v58 = vmax.f32 %v346_v55, 0.0 }
 0x107   :  { %v355_v59 = vmax.f32 %v349_v57, 0.0 }
 0x109   :  { %v427_v60 = vpack.c.bf16 %v355_v59, %v354_v58 }
 0x10b   :  { %429 = vst [vmem:[%s642_s3 + $0x8] sm:$0xff] %v427_v60  }

// kernel: red_model_forward.10
= control target key start
LH: loop header
LB: loop body
LE: loop exit
PB: predicated region body
PF: predicated region fallthrough
CT: control target
= control target key end

     0   :  { %s970_s1 = inlined_call_operand.vmem [shape: bf16[640,128], index: 1, kind: input, shape index: {}]   ;;  %s971_s0 = inlined_call_operand.vmem [shape: bf16[32,640], index: 0, kind: input, shape index: {}]   ;;  %s972_s2 = inlined_call_operand.vmem [shape: f32[1,128], index: 2, kind: input, shape index: {}]   ;;  %s973_s3 = inlined_call_operand.vmem [shape: bf16[32,128], index: 3, kind: output, shape index: {}]  }
   0x1   :  { %v737_v0 = vld [vmem:[%s970_s1 + $0x40] sm:$0xff]   ;;  %v741_v4 = vld [vmem:[%s970_s1 + $0x48] sm:$0xff]   ;;  %v745_v8 = vld [vmem:[%s970_s1 + $0x50] sm:$0xff]  }
   0x2   :  { %v738_v1 = vld [vmem:[%s970_s1] sm:$0xff]   ;;  %651 = vmatprep.subr.bf16.mxu0 %v737_v0  ;;  %v742_v5 = vld [vmem:[%s970_s1 + $0x8] sm:$0xff]   ;;  %v746_v9 = vld [vmem:[%s970_s1 + $0x10] sm:$0xff]  }
   0x3   :  { %v739_v2 = vld [vmem:[%s970_s1 + $0xc0] sm:$0xff]   ;;  %652 = vmatpush3.bf16.msra.mxu0 %v738_v1  ;;  %v743_v6 = vld [vmem:[%s970_s1 + $0xc8] sm:$0xff]   ;;  %v747_v10 = vld [vmem:[%s970_s1 + $0xd0] sm:$0xff]  }
   0x4   :  { %v740_v3 = vld [vmem:[%s970_s1 + $0x80] sm:$0xff]   ;;  %679 = vmatprep.subr.bf16.mxu1 %v739_v2  ;;  %653 = vmatprep.subr.bf16.mxu0 %v741_v4  ;;  %v744_v7 = vld [vmem:[%s970_s1 + $0x88] sm:$0xff]   ;;  %v748_v11 = vld [vmem:[%s970_s1 + $0x90] sm:$0xff]  }
   0x5   :  { %680 = vmatpush3.bf16.msra.mxu1 %v740_v3  ;;  %v749_v12 = vld [vmem:[%s970_s1 + $0x58] sm:$0xff]   ;;  %v753_v16 = vld [vmem:[%s970_s1 + $0x60] sm:$0xff]   ;;  %v757_v20 = vld [vmem:[%s970_s1 + $0x68] sm:$0xff]  }
   0x6   :  { %681 = vmatprep.subr.bf16.mxu1 %v743_v6  ;;  %v750_v13 = vld [vmem:[%s970_s1 + $0x18] sm:$0xff]   ;;  %v754_v17 = vld [vmem:[%s970_s1 + $0x20] sm:$0xff]   ;;  %v758_v21 = vld [vmem:[%s970_s1 + $0x28] sm:$0xff]  }
   0x7   :  { %654 = vmatpush3.bf16.msra.mxu0 %v742_v5  ;;  %v751_v14 = vld [vmem:[%s970_s1 + $0xd8] sm:$0xff]   ;;  %v755_v18 = vld [vmem:[%s970_s1 + $0xe0] sm:$0xff]   ;;  %v759_v22 = vld [vmem:[%s970_s1 + $0xe8] sm:$0xff]  }
   0x8   :  { %655 = vmatprep.subr.bf16.mxu0 %v745_v8  ;;  %v752_v15 = vld [vmem:[%s970_s1 + $0x98] sm:$0xff]   ;;  %v756_v19 = vld [vmem:[%s970_s1 + $0xa0] sm:$0xff]   ;;  %v760_v23 = vld [vmem:[%s970_s1 + $0xa8] sm:$0xff]  }
   0x9   :  { %682 = vmatpush3.bf16.msra.mxu1 %v744_v7  ;;  %v761_v24 = vld [vmem:[%s970_s1 + $0x70] sm:$0xff]   ;;  %v765_v28 = vld [vmem:[%s970_s1 + $0x78] sm:$0xff]   ;;  %v772_v34 = vld [vmem:[%s970_s1 + $0x100] sm:$0xff]  }
   0xa   :  { %683 = vmatprep.subr.bf16.mxu1 %v747_v10  ;;  %v762_v25 = vld [vmem:[%s970_s1 + $0x30] sm:$0xff]   ;;  %v766_v29 = vld [vmem:[%s970_s1 + $0x38] sm:$0xff]   ;;  %v775_v36 = vld [vmem:[%s971_s0 + $0xc] ss:$20 sps:$4 sm:$0xff]  }
   0xb   :  { %656 = vmatpush3.bf16.msra.mxu0 %v746_v9  ;;  %v763_v26 = vld [vmem:[%s970_s1 + $0xf0] sm:$0xff]   ;;  %v767_v30 = vld [vmem:[%s970_s1 + $0xf8] sm:$0xff]   ;;  %v776_v37 = vld [vmem:[%s970_s1 + $0x108] sm:$0xff]   ;;  %487 = vmatprep.mubr.bf16.mxu1 %v775_v36 }
   0xc   :  { %657 = vmatprep.subr.bf16.mxu0 %v749_v12  ;;  %v764_v27 = vld [vmem:[%s970_s1 + $0xb0] sm:$0xff]   ;;  %v770_v32 = vld [vmem:[%s971_s0 + $0x4] ss:$20 sps:$4 sm:$0xff]   ;;  %v773_v35 = vld [vmem:[%s971_s0 + $0x8] ss:$20 sps:$4 sm:$0xff]  }
   0xd   :  { %684 = vmatpush3.bf16.msra.mxu1 %v748_v11  ;;  %v768_v31 = vld [vmem:[%s971_s0] ss:$20 sps:$4 sm:$0xff]   ;;  %v771_v33 = vld [vmem:[%s970_s1 + $0xb8] sm:$0xff]   ;;  %438 = vmatprep.mubr.bf16.mxu0 %v770_v32  ;;  %v786_v43 = vld [vmem:[%s971_s0 + $0x30] ss:$20 sps:$4 sm:$0xff]  }
   0xe   :  { %685 = vmatprep.subr.bf16.mxu1 %v751_v14  ;;  %v777_v38 = vld [vmem:[%s970_s1 + $0x110] sm:$0xff]   ;;  %v780_v39 = vld [vmem:[%s971_s0 + $0x2c] ss:$20 sps:$4 sm:$0xff]   ;;  %v778_v40 = vld [vmem:[%s970_s1 + $0x118] sm:$0xff]  }
   0xf   :  { %658 = vmatpush3.bf16.msra.mxu0 %v750_v13  ;;  %v783_v41 = vld [vmem:[%s971_s0 + $0x28] ss:$20 sps:$4 sm:$0xff]   ;;  %v779_v44 = vld [vmem:[%s970_s1 + $0x120] sm:$0xff]   ;;  %v787_v47 = vld [vmem:[%s970_s1 + $0x130] sm:$0xff]  }
  0x10   :  { %659 = vmatprep.subr.bf16.mxu0 %v753_v16  ;;  %v784_v42 = vld [vmem:[%s971_s0 + $0x34] ss:$20 sps:$4 sm:$0xff]   ;;  %v789_v45 = vld [vmem:[%s971_s0 + $0x10] ss:$20 sps:$4 sm:$0xff]   ;;  %v788_v48 = vld [vmem:[%s970_s1 + $0x138] sm:$0xff]  }
  0x11   :  { %686 = vmatpush3.bf16.msra.mxu1 %v752_v15  ;;  %v782_v46 = vld [vmem:[%s970_s1 + $0x128] sm:$0xff]   ;;  %v581_v51 = vld [vmem:[%s972_s2] ss:$0 sm:$0xff] }
  0x12   :  { %687 = vmatprep.subr.bf16.mxu1 %v755_v18  ;;  %v790_v49 = vld [vmem:[%s971_s0 + $0x38] ss:$20 sps:$4 sm:$0xff]  }
  0x13   :  { %660 = vmatpush3.bf16.msra.mxu0 %v754_v17 }
  0x14   :  { %661 = vmatprep.subr.bf16.mxu0 %v757_v20 }
  0x15   :  { %688 = vmatpush3.bf16.msra.mxu1 %v756_v19 }
  0x16   :  { %689 = vmatprep.subr.bf16.mxu1 %v759_v22 }
  0x17   :  { %662 = vmatpush3.bf16.msra.mxu0 %v758_v21 }
  0x18   :  { %663 = vmatprep.subr.bf16.mxu0 %v761_v24 }
  0x19   :  { %690 = vmatpush3.bf16.msra.mxu1 %v760_v23 }
  0x1a   :  { %691 = vmatprep.subr.bf16.mxu1 %v763_v26 }
  0x1b   :  { %664 = vmatpush3.bf16.msra.mxu0 %v762_v25 }
  0x1c   :  { %665 = vmatprep.subr.bf16.mxu0 %v765_v28 }
  0x1d   :  { %692 = vmatpush3.bf16.msra.mxu1 %v764_v27 }
  0x1e   :  { %693 = vmatprep.subr.bf16.mxu1 %v767_v30 }
  0x1f   :  { %666 = vmatpush3.bf16.msra.mxu0 %v766_v29 }
  0x20   :  { %717 = vmatprep.subr.bf16.mxu0 %v772_v34 }
  0x21   :  { %694 = vmatpush3.bf16.msra.mxu1 %v771_v33 }
  0x22   :  { %439 = vmatmul.mubr.bf16.vlgmr.msra.gmra.mrb[0].mxu0 %v768_v31 }
  0x23   :  { %718 = vmatpush3.bf16.msra.mxu0 %v772_v34  ;;  %446 = vmatprep.mubr.bf16.mxu0 %v780_v39 }
  0x24   :  { %488 = vmatmul.mubr.bf16.vlgmr.msra.gmra.mrb[0].mxu1 %v773_v35  ;;  %719 = vmatprep.subr.bf16.mxu0 %v776_v37 }
  0x25   :  { %495 = vmatprep.mubr.bf16.mxu1 %v784_v42 }
  0x27   :  { %720 = vmatpush3.bf16.msra.mxu0 %v776_v37 }
  0x28   :  { %721 = vmatprep.subr.bf16.mxu0 %v777_v38 }
  0x2a   :  { %447 = vmatmul.mubr.bf16.gmra.mrb[4].mxu0 %v783_v41 }
  0x2b   :  { %722 = vmatpush3.bf16.msra.mxu0 %v777_v38  ;;  %733 = vmatprep.mubr.bf16.mxu0 %v789_v45 }
  0x2c   :  { %723 = vmatprep.subr.bf16.mxu0 %v778_v40  ;;  %496 = vmatmul.mubr.bf16.gmra.mrb[4].mxu1 %v786_v43 }
  0x2f   :  { %724 = vmatpush3.bf16.msra.mxu0 %v778_v40 }
  0x30   :  { %725 = vmatprep.subr.bf16.mxu0 %v779_v44 }
  0x33   :  { %726 = vmatpush3.bf16.msra.mxu0 %v779_v44 }
  0x34   :  { %727 = vmatprep.subr.bf16.mxu0 %v782_v46 }
  0x37   :  { %728 = vmatpush3.bf16.msra.mxu0 %v782_v46 }
  0x38   :  { %729 = vmatprep.subr.bf16.mxu0 %v787_v47 }
  0x3b   :  { %730 = vmatpush3.bf16.msra.mxu0 %v787_v47 }
  0x3c   :  { %731 = vmatprep.subr.bf16.mxu0 %v788_v48 }
  0x3f   :  { %732 = vmatpush3.bf16.msra.mxu0 %v788_v48 }
  0x42   :  { %734 = vmatmul.mubr.bf16.vlgmr.msra.gmra.mrb[8].mxu0 %v790_v49 }
  0xf5   :  { %v667_v50 = vpop.f32.mrb[0].mxu0 }
  0xf6   :  { %v668_v52 = vpop.f32.mrb[1].mxu0 }
  0xf7   :  { %v669_v53 = vadd.f32 %v668_v52, %v667_v50  ;;  %v670_v54 = vpop.f32.mrb[2].mxu0  ;;  %v695_v55 = vpop.f32.mrb[0].mxu1 }
  0xf8   :  { %v671_v56 = vpop.f32.mrb[3].mxu0  ;;  %v696_v59 = vpop.f32.mrb[1].mxu1 }
  0xf9   :  { %v441_v57 = vadd.f32 %v669_v53, %v581_v51  ;;  %v672_v58 = vadd.f32 %v671_v56, %v670_v54  ;;  %v697_v60 = vadd.f32 %v696_v59, %v695_v55  ;;  %v698_v61 = vpop.f32.mrb[2].mxu1 }
  0xfa   :  { %v699_v63 = vpop.f32.mrb[3].mxu1 }
  0xfb   :  { %v444_v62 = vadd.f32 %v672_v58, %v581_v51  ;;  %v700_v0 = vadd.f32 %v699_v63, %v698_v61  ;;  %v490_v1 = vadd.f32 %v697_v60, %v441_v57 }
  0xfd   :  { %v673_v2 = vpop.f32.mrb[4].mxu0  ;;  %v493_v4 = vadd.f32 %v700_v0, %v444_v62 }
  0xfe   :  { %v674_v3 = vpop.f32.mrb[5].mxu0 }
  0xff   :  { %v675_v5 = vadd.f32 %v674_v3, %v673_v2  ;;  %v676_v6 = vpop.f32.mrb[6].mxu0  ;;  %v701_v7 = vpop.f32.mrb[4].mxu1 }
 0x100   :  { %v677_v8 = vpop.f32.mrb[7].mxu0  ;;  %v702_v11 = vpop.f32.mrb[5].mxu1 }
 0x101   :  { %v449_v9 = vadd.f32 %v675_v5, %v581_v51  ;;  %v678_v10 = vadd.f32 %v677_v8, %v676_v6  ;;  %v703_v12 = vadd.f32 %v702_v11, %v701_v7  ;;  %v704_v13 = vpop.f32.mrb[6].mxu1 }
 0x102   :  { %v705_v15 = vpop.f32.mrb[7].mxu1 }
 0x103   :  { %v452_v14 = vadd.f32 %v678_v10, %v581_v51  ;;  %v706_v16 = vadd.f32 %v705_v15, %v704_v13  ;;  %v498_v17 = vadd.f32 %v703_v12, %v449_v9 }
 0x105   :  { %v501_v18 = vadd.f32 %v706_v16, %v452_v14 }
 0x115   :  { %v735_v19 = vpop.f32.mrb[8].mxu0 }
 0x116   :  { %v547_v20 = vadd.f32 %v735_v19, %v498_v17  ;;  %v538_v21 = vpop.f32.mrb[9].mxu0 }
 0x117   :  { %v539_v22 = vadd.f32 %v538_v21, %v490_v1  ;;  %v736_v23 = vpop.f32.mrb[10].mxu0 }
 0x118   :  { %v550_v24 = vadd.f32 %v736_v23, %v501_v18  ;;  %v541_v25 = vpop.f32.mrb[11].mxu0  ;;  %v555_v27 = vmax.f32 %v547_v20, 0.0 }
 0x119   :  { %v542_v26 = vadd.f32 %v541_v25, %v493_v4  ;;  %v553_v29 = vmax.f32 %v539_v22, 0.0 }
 0x11a   :  { %v556_v28 = vmax.f32 %v550_v24, 0.0 }
 0x11b   :  { %v554_v30 = vmax.f32 %v542_v26, 0.0 }
 0x11c   :  { %v648_v31 = vpack.c.bf16 %v556_v28, %v555_v27 }
 0x11d   :  { %v643_v32 = vpack.c.bf16 %v554_v30, %v553_v29 }
 0x11e   :  { %650 = vst [vmem:[%s973_s3 + $0x8] sm:$0xff] %v648_v31  }
 0x11f   :  { %644 = vst [vmem:[%s973_s3] sm:$0xff] %v643_v32  }

// kernel: mul.73.clone
= control target key start
LH: loop header
LB: loop body
LE: loop exit
PB: predicated region body
PF: predicated region fallthrough
CT: control target
= control target key end

     0   :  { %s46_s0 = inlined_call_operand.vmem [shape: f32[2,64], index: 0, kind: input, shape index: {}]   ;;  %s47_s1 = inlined_call_operand.vmem [shape: f32[2,2,2,64], index: 1, kind: output, shape index: {}]  }
   0x1   :  { %v4_v0 = vld [vmem:[%s46_s0] ss:$0 sm:$0xff]  ;;  %v14_v1 = vld [vmem:[%s46_s0 + $0x1] ss:$0 sm:$0xff] }
   0x2   :  { %5 = vst [vmem:[%s47_s1] sm:$0x3] %v4_v0  ;;  %15 = vst [vmem:[%s47_s1 + $0x4] sm:$0x3] %v14_v1 }
   0x3   :  { %16 = vst [vmem:[%s47_s1 + $0x2] sm:$0x3] %v4_v0  ;;  %17 = vst [vmem:[%s47_s1 + $0x6] sm:$0x3] %v14_v1 }

// kernel: red_model_forward.11
= control target key start
LH: loop header
LB: loop body
LE: loop exit
PB: predicated region body
PF: predicated region fallthrough
CT: control target
= control target key end

     0   :  { %v688_v33 = vmov 0.0   ;;  %vm689_vm0 = vmmov 0   ;;  %s851_s1 = inlined_call_operand.vmem [shape: bf16[640,128], index: 1, kind: input, shape index: {}]   ;;  %s852_s0 = inlined_call_operand.vmem [shape: bf16[16,640], index: 0, kind: input, shape index: {}]   ;;  %s853_s2 = inlined_call_operand.vmem [shape: f32[1,128], index: 2, kind: input, shape index: {}]   ;;  %s854_s3 = inlined_call_operand.vmem [shape: bf16[16,128], index: 3, kind: output, shape index: {}]  }
   0x1   :  { %v641_v0 = vld [vmem:[%s851_s1 + $0x40] sm:$0xff]   ;;  %v645_v4 = vld [vmem:[%s851_s1 + $0x48] sm:$0xff]   ;;  %v649_v8 = vld [vmem:[%s851_s1 + $0x50] sm:$0xff]  }
   0x2   :  { %v642_v1 = vld [vmem:[%s851_s1] sm:$0xff]   ;;  %566 = vmatprep.subr.bf16.mxu0 %v641_v0  ;;  %v646_v5 = vld [vmem:[%s851_s1 + $0x8] sm:$0xff]   ;;  %v650_v9 = vld [vmem:[%s851_s1 + $0x10] sm:$0xff]  }
   0x3   :  { %v643_v2 = vld [vmem:[%s851_s1 + $0xc0] sm:$0xff]   ;;  %567 = vmatpush3.bf16.msra.mxu0 %v642_v1  ;;  %v647_v6 = vld [vmem:[%s851_s1 + $0xc8] sm:$0xff]   ;;  %v651_v10 = vld [vmem:[%s851_s1 + $0xd0] sm:$0xff]  }
   0x4   :  { %v644_v3 = vld [vmem:[%s851_s1 + $0x80] sm:$0xff]   ;;  %588 = vmatprep.subr.bf16.mxu1 %v643_v2  ;;  %568 = vmatprep.subr.bf16.mxu0 %v645_v4  ;;  %v648_v7 = vld [vmem:[%s851_s1 + $0x88] sm:$0xff]   ;;  %v652_v11 = vld [vmem:[%s851_s1 + $0x90] sm:$0xff]  }
   0x5   :  { %589 = vmatpush3.bf16.msra.mxu1 %v644_v3  ;;  %v653_v12 = vld [vmem:[%s851_s1 + $0x58] sm:$0xff]   ;;  %v657_v16 = vld [vmem:[%s851_s1 + $0x60] sm:$0xff]   ;;  %v661_v20 = vld [vmem:[%s851_s1 + $0x68] sm:$0xff]  }
   0x6   :  { %590 = vmatprep.subr.bf16.mxu1 %v647_v6  ;;  %v654_v13 = vld [vmem:[%s851_s1 + $0x18] sm:$0xff]   ;;  %v658_v17 = vld [vmem:[%s851_s1 + $0x20] sm:$0xff]   ;;  %v662_v21 = vld [vmem:[%s851_s1 + $0x28] sm:$0xff]  }
   0x7   :  { %569 = vmatpush3.bf16.msra.mxu0 %v646_v5  ;;  %v655_v14 = vld [vmem:[%s851_s1 + $0xd8] sm:$0xff]   ;;  %v659_v18 = vld [vmem:[%s851_s1 + $0xe0] sm:$0xff]   ;;  %v663_v22 = vld [vmem:[%s851_s1 + $0xe8] sm:$0xff]  }
   0x8   :  { %570 = vmatprep.subr.bf16.mxu0 %v649_v8  ;;  %v656_v15 = vld [vmem:[%s851_s1 + $0x98] sm:$0xff]   ;;  %v660_v19 = vld [vmem:[%s851_s1 + $0xa0] sm:$0xff]   ;;  %v664_v23 = vld [vmem:[%s851_s1 + $0xa8] sm:$0xff]  }
   0x9   :  { %591 = vmatpush3.bf16.msra.mxu1 %v648_v7  ;;  %v665_v24 = vld [vmem:[%s851_s1 + $0x70] sm:$0xff]   ;;  %v669_v28 = vld [vmem:[%s851_s1 + $0x78] sm:$0xff]   ;;  %v678_v36 = vld [vmem:[%s852_s0 + $0xc] ss:$20 sps:$4 sm:$0xff]  }
   0xa   :  { %592 = vmatprep.subr.bf16.mxu1 %v651_v10  ;;  %v666_v25 = vld [vmem:[%s851_s1 + $0x30] sm:$0xff]   ;;  %v670_v29 = vld [vmem:[%s851_s1 + $0x38] sm:$0xff]   ;;  %v679_v37 = vld [vmem:[%s851_s1 + $0x100] sm:$0xff]   ;;  %447 = vmatprep.mubr.bf16.mxu1 %v678_v36 }
   0xb   :  { %571 = vmatpush3.bf16.msra.mxu0 %v650_v9  ;;  %v667_v26 = vld [vmem:[%s851_s1 + $0xf0] sm:$0xff]   ;;  %v671_v30 = vld [vmem:[%s851_s1 + $0xf8] sm:$0xff]   ;;  %v680_v38 = vld [vmem:[%s851_s1 + $0x108] sm:$0xff]  }
   0xc   :  { %572 = vmatprep.subr.bf16.mxu0 %v653_v12  ;;  %v668_v27 = vld [vmem:[%s851_s1 + $0xb0] sm:$0xff]   ;;  %v674_v32 = vld [vmem:[%s852_s0 + $0x4] ss:$20 sps:$4 sm:$0xff]   ;;  %v676_v35 = vld [vmem:[%s852_s0 + $0x8] ss:$20 sps:$4 sm:$0xff]  }
   0xd   :  { %593 = vmatpush3.bf16.msra.mxu1 %v652_v11  ;;  %v672_v31 = vld [vmem:[%s852_s0] ss:$20 sps:$4 sm:$0xff]   ;;  %v675_v34 = vld [vmem:[%s851_s1 + $0xb8] sm:$0xff]   ;;  %406 = vmatprep.mubr.bf16.mxu0 %v674_v32  ;;  %v684_v42 = vld [vmem:[%s851_s1 + $0x128] sm:$0xff]  }
   0xe   :  { %594 = vmatprep.subr.bf16.mxu1 %v655_v14  ;;  %v681_v39 = vld [vmem:[%s851_s1 + $0x110] sm:$0xff]   ;;  %v682_v40 = vld [vmem:[%s851_s1 + $0x118] sm:$0xff]   ;;  %v683_v41 = vld [vmem:[%s851_s1 + $0x120] sm:$0xff]  }
   0xf   :  { %573 = vmatpush3.bf16.msra.mxu0 %v654_v13  ;;  %v685_v43 = vld [vmem:[%s851_s1 + $0x130] sm:$0xff]   ;;  %v686_v44 = vld [vmem:[%s851_s1 + $0x138] sm:$0xff]   ;;  %v511_v47 = vld [vmem:[%s853_s2] ss:$0 sm:$0xff] }
  0x10   :  { %574 = vmatprep.subr.bf16.mxu0 %v657_v16  ;;  %v687_v45 = vld [vmem:[%s852_s0 + $0x10] ss:$20 sps:$4 sm:$0xff]  }
  0x11   :  { %595 = vmatpush3.bf16.msra.mxu1 %v656_v15 }
  0x12   :  { %596 = vmatprep.subr.bf16.mxu1 %v659_v18 }
  0x13   :  { %575 = vmatpush3.bf16.msra.mxu0 %v658_v17 }
  0x14   :  { %576 = vmatprep.subr.bf16.mxu0 %v661_v20 }
  0x15   :  { %597 = vmatpush3.bf16.msra.mxu1 %v660_v19 }
  0x16   :  { %598 = vmatprep.subr.bf16.mxu1 %v663_v22 }
  0x17   :  { %577 = vmatpush3.bf16.msra.mxu0 %v662_v21 }
  0x18   :  { %578 = vmatprep.subr.bf16.mxu0 %v665_v24 }
  0x19   :  { %599 = vmatpush3.bf16.msra.mxu1 %v664_v23 }
  0x1a   :  { %600 = vmatprep.subr.bf16.mxu1 %v667_v26 }
  0x1b   :  { %579 = vmatpush3.bf16.msra.mxu0 %v666_v25 }
  0x1c   :  { %580 = vmatprep.subr.bf16.mxu0 %v669_v28 }
  0x1d   :  { %601 = vmatpush3.bf16.msra.mxu1 %v668_v27 }
  0x1e   :  { %602 = vmatprep.subr.bf16.mxu1 %v671_v30 }
  0x1f   :  { %581 = vmatpush3.bf16.msra.mxu0 %v670_v29 }
  0x20   :  { %619 = vmatprep.subr.bf16.mxu0 %v688_v33 }
  0x21   :  { %603 = vmatpush3.bf16.msra.mxu1 %v675_v34 }
  0x22   :  { %407 = vmatmul.mubr.bf16.vlgmr.msra.gmra.mrb[0].mxu0 %v672_v31 }
  0x23   :  { %635 = vmatprep.mubr.msk.bf16.mxu0 %vm689_vm0, %v688_v33  ;;  %620 = vmatpush3.bf16.msra.mxu0 %v679_v37 }
  0x24   :  { %448 = vmatmul.mubr.bf16.vlgmr.msra.gmra.mrb[0].mxu1 %v676_v35  ;;  %621 = vmatprep.subr.bf16.mxu0 %v688_v33 }
  0x27   :  { %622 = vmatpush3.bf16.msra.mxu0 %v680_v38 }
  0x28   :  { %623 = vmatprep.subr.bf16.mxu0 %v688_v33 }
  0x2b   :  { %624 = vmatpush3.bf16.msra.mxu0 %v681_v39 }
  0x2c   :  { %625 = vmatprep.subr.bf16.mxu0 %v688_v33 }
  0x2f   :  { %626 = vmatpush3.bf16.msra.mxu0 %v682_v40 }
  0x30   :  { %627 = vmatprep.subr.bf16.mxu0 %v688_v33 }
  0x33   :  { %628 = vmatpush3.bf16.msra.mxu0 %v683_v41 }
  0x34   :  { %629 = vmatprep.subr.bf16.mxu0 %v688_v33 }
  0x37   :  { %630 = vmatpush3.bf16.msra.mxu0 %v684_v42 }
  0x38   :  { %631 = vmatprep.subr.bf16.mxu0 %v688_v33 }
  0x3b   :  { %632 = vmatpush3.bf16.msra.mxu0 %v685_v43 }
  0x3c   :  { %633 = vmatprep.subr.bf16.mxu0 %v688_v33 }
  0x3f   :  { %634 = vmatpush3.bf16.msra.mxu0 %v686_v44 }
  0x42   :  { %636 = vmatmul.mubr.bf16.vlgmr.msra.gmra.mrb[4].mxu0 %v687_v45 }
  0xf5   :  { %v582_v46 = vpop.f32.mrb[0].mxu0 }
  0xf6   :  { %v583_v48 = vpop.f32.mrb[1].mxu0 }
  0xf7   :  { %v584_v49 = vadd.f32 %v583_v48, %v582_v46  ;;  %v585_v50 = vpop.f32.mrb[2].mxu0  ;;  %v604_v51 = vpop.f32.mrb[0].mxu1 }
  0xf8   :  { %v586_v52 = vpop.f32.mrb[3].mxu0  ;;  %v605_v55 = vpop.f32.mrb[1].mxu1 }
  0xf9   :  { %v409_v53 = vadd.f32 %v584_v49, %v511_v47  ;;  %v587_v54 = vadd.f32 %v586_v52, %v585_v50  ;;  %v606_v56 = vadd.f32 %v605_v55, %v604_v51  ;;  %v607_v57 = vpop.f32.mrb[2].mxu1 }
  0xfa   :  { %v608_v59 = vpop.f32.mrb[3].mxu1 }
  0xfb   :  { %v412_v58 = vadd.f32 %v587_v54, %v511_v47  ;;  %v609_v60 = vadd.f32 %v608_v59, %v607_v57  ;;  %v450_v61 = vadd.f32 %v606_v56, %v409_v53 }
  0xfd   :  { %v453_v62 = vadd.f32 %v609_v60, %v412_v58 }
 0x115   :  { %v490_v63 = vpop.f32.mrb[4].mxu0 }
 0x116   :  { %v491_v0 = vadd.f32 %v490_v63, %v450_v61  ;;  %v637_v1 = vpop.f32.mrb[5].mxu0 }
 0x117   :  { %v493_v2 = vpop.f32.mrb[6].mxu0 }
 0x118   :  { %v494_v3 = vadd.f32 %v493_v2, %v453_v62  ;;  %v638_v4 = vpop.f32.mrb[7].mxu0 }
 0x11a   :  { %v564_v5 = vpack.c.bf16 %v494_v3, %v491_v0 }
 0x11c   :  { %565 = vst [vmem:[%s854_s3] sm:$0xff] %v564_v5  }

// kernel: red_model_forward.12
= control target key start
LH: loop header
LB: loop body
LE: loop exit
PB: predicated region body
PF: predicated region fallthrough
CT: control target
= control target key end

     0   :  { %v690_v33 = vmov 0.0   ;;  %vm691_vm0 = vmmov 0   ;;  %s853_s1 = inlined_call_operand.vmem [shape: bf16[640,128], index: 1, kind: input, shape index: {}]   ;;  %s854_s0 = inlined_call_operand.vmem [shape: bf16[16,640], index: 0, kind: input, shape index: {}]   ;;  %s855_s2 = inlined_call_operand.vmem [shape: f32[1,128], index: 2, kind: input, shape index: {}]   ;;  %s856_s3 = inlined_call_operand.vmem [shape: bf16[16,128], index: 3, kind: output, shape index: {}]  }
   0x1   :  { %v643_v0 = vld [vmem:[%s853_s1 + $0x40] sm:$0xff]   ;;  %v647_v4 = vld [vmem:[%s853_s1 + $0x48] sm:$0xff]   ;;  %v651_v8 = vld [vmem:[%s853_s1 + $0x50] sm:$0xff]  }
   0x2   :  { %v644_v1 = vld [vmem:[%s853_s1] sm:$0xff]   ;;  %568 = vmatprep.subr.bf16.mxu0 %v643_v0  ;;  %v648_v5 = vld [vmem:[%s853_s1 + $0x8] sm:$0xff]   ;;  %v652_v9 = vld [vmem:[%s853_s1 + $0x10] sm:$0xff]  }
   0x3   :  { %v645_v2 = vld [vmem:[%s853_s1 + $0xc0] sm:$0xff]   ;;  %569 = vmatpush3.bf16.msra.mxu0 %v644_v1  ;;  %v649_v6 = vld [vmem:[%s853_s1 + $0xc8] sm:$0xff]   ;;  %v653_v10 = vld [vmem:[%s853_s1 + $0xd0] sm:$0xff]  }
   0x4   :  { %v646_v3 = vld [vmem:[%s853_s1 + $0x80] sm:$0xff]   ;;  %590 = vmatprep.subr.bf16.mxu1 %v645_v2  ;;  %570 = vmatprep.subr.bf16.mxu0 %v647_v4  ;;  %v650_v7 = vld [vmem:[%s853_s1 + $0x88] sm:$0xff]   ;;  %v654_v11 = vld [vmem:[%s853_s1 + $0x90] sm:$0xff]  }
   0x5   :  { %591 = vmatpush3.bf16.msra.mxu1 %v646_v3  ;;  %v655_v12 = vld [vmem:[%s853_s1 + $0x58] sm:$0xff]   ;;  %v659_v16 = vld [vmem:[%s853_s1 + $0x60] sm:$0xff]   ;;  %v663_v20 = vld [vmem:[%s853_s1 + $0x68] sm:$0xff]  }
   0x6   :  { %592 = vmatprep.subr.bf16.mxu1 %v649_v6  ;;  %v656_v13 = vld [vmem:[%s853_s1 + $0x18] sm:$0xff]   ;;  %v660_v17 = vld [vmem:[%s853_s1 + $0x20] sm:$0xff]   ;;  %v664_v21 = vld [vmem:[%s853_s1 + $0x28] sm:$0xff]  }
   0x7   :  { %571 = vmatpush3.bf16.msra.mxu0 %v648_v5  ;;  %v657_v14 = vld [vmem:[%s853_s1 + $0xd8] sm:$0xff]   ;;  %v661_v18 = vld [vmem:[%s853_s1 + $0xe0] sm:$0xff]   ;;  %v665_v22 = vld [vmem:[%s853_s1 + $0xe8] sm:$0xff]  }
   0x8   :  { %572 = vmatprep.subr.bf16.mxu0 %v651_v8  ;;  %v658_v15 = vld [vmem:[%s853_s1 + $0x98] sm:$0xff]   ;;  %v662_v19 = vld [vmem:[%s853_s1 + $0xa0] sm:$0xff]   ;;  %v666_v23 = vld [vmem:[%s853_s1 + $0xa8] sm:$0xff]  }
   0x9   :  { %593 = vmatpush3.bf16.msra.mxu1 %v650_v7  ;;  %v667_v24 = vld [vmem:[%s853_s1 + $0x70] sm:$0xff]   ;;  %v671_v28 = vld [vmem:[%s853_s1 + $0x78] sm:$0xff]   ;;  %v680_v36 = vld [vmem:[%s854_s0 + $0xc] ss:$20 sps:$4 sm:$0xff]  }
   0xa   :  { %594 = vmatprep.subr.bf16.mxu1 %v653_v10  ;;  %v668_v25 = vld [vmem:[%s853_s1 + $0x30] sm:$0xff]   ;;  %v672_v29 = vld [vmem:[%s853_s1 + $0x38] sm:$0xff]   ;;  %v681_v37 = vld [vmem:[%s853_s1 + $0x100] sm:$0xff]   ;;  %447 = vmatprep.mubr.bf16.mxu1 %v680_v36 }
   0xb   :  { %573 = vmatpush3.bf16.msra.mxu0 %v652_v9  ;;  %v669_v26 = vld [vmem:[%s853_s1 + $0xf0] sm:$0xff]   ;;  %v673_v30 = vld [vmem:[%s853_s1 + $0xf8] sm:$0xff]   ;;  %v682_v38 = vld [vmem:[%s853_s1 + $0x108] sm:$0xff]  }
   0xc   :  { %574 = vmatprep.subr.bf16.mxu0 %v655_v12  ;;  %v670_v27 = vld [vmem:[%s853_s1 + $0xb0] sm:$0xff]   ;;  %v676_v32 = vld [vmem:[%s854_s0 + $0x4] ss:$20 sps:$4 sm:$0xff]   ;;  %v678_v35 = vld [vmem:[%s854_s0 + $0x8] ss:$20 sps:$4 sm:$0xff]  }
   0xd   :  { %595 = vmatpush3.bf16.msra.mxu1 %v654_v11  ;;  %v674_v31 = vld [vmem:[%s854_s0] ss:$20 sps:$4 sm:$0xff]   ;;  %v677_v34 = vld [vmem:[%s853_s1 + $0xb8] sm:$0xff]   ;;  %406 = vmatprep.mubr.bf16.mxu0 %v676_v32  ;;  %v686_v42 = vld [vmem:[%s853_s1 + $0x128] sm:$0xff]  }
   0xe   :  { %596 = vmatprep.subr.bf16.mxu1 %v657_v14  ;;  %v683_v39 = vld [vmem:[%s853_s1 + $0x110] sm:$0xff]   ;;  %v684_v40 = vld [vmem:[%s853_s1 + $0x118] sm:$0xff]   ;;  %v685_v41 = vld [vmem:[%s853_s1 + $0x120] sm:$0xff]  }
   0xf   :  { %575 = vmatpush3.bf16.msra.mxu0 %v656_v13  ;;  %v687_v43 = vld [vmem:[%s853_s1 + $0x130] sm:$0xff]   ;;  %v688_v44 = vld [vmem:[%s853_s1 + $0x138] sm:$0xff]   ;;  %v513_v47 = vld [vmem:[%s855_s2] ss:$0 sm:$0xff] }
  0x10   :  { %576 = vmatprep.subr.bf16.mxu0 %v659_v16  ;;  %v689_v45 = vld [vmem:[%s854_s0 + $0x10] ss:$20 sps:$4 sm:$0xff]  }
  0x11   :  { %597 = vmatpush3.bf16.msra.mxu1 %v658_v15 }
  0x12   :  { %598 = vmatprep.subr.bf16.mxu1 %v661_v18 }
  0x13   :  { %577 = vmatpush3.bf16.msra.mxu0 %v660_v17 }
  0x14   :  { %578 = vmatprep.subr.bf16.mxu0 %v663_v20 }
  0x15   :  { %599 = vmatpush3.bf16.msra.mxu1 %v662_v19 }
  0x16   :  { %600 = vmatprep.subr.bf16.mxu1 %v665_v22 }
  0x17   :  { %579 = vmatpush3.bf16.msra.mxu0 %v664_v21 }
  0x18   :  { %580 = vmatprep.subr.bf16.mxu0 %v667_v24 }
  0x19   :  { %601 = vmatpush3.bf16.msra.mxu1 %v666_v23 }
  0x1a   :  { %602 = vmatprep.subr.bf16.mxu1 %v669_v26 }
  0x1b   :  { %581 = vmatpush3.bf16.msra.mxu0 %v668_v25 }
  0x1c   :  { %582 = vmatprep.subr.bf16.mxu0 %v671_v28 }
  0x1d   :  { %603 = vmatpush3.bf16.msra.mxu1 %v670_v27 }
  0x1e   :  { %604 = vmatprep.subr.bf16.mxu1 %v673_v30 }
  0x1f   :  { %583 = vmatpush3.bf16.msra.mxu0 %v672_v29 }
  0x20   :  { %621 = vmatprep.subr.bf16.mxu0 %v690_v33 }
  0x21   :  { %605 = vmatpush3.bf16.msra.mxu1 %v677_v34 }
  0x22   :  { %407 = vmatmul.mubr.bf16.vlgmr.msra.gmra.mrb[0].mxu0 %v674_v31 }
  0x23   :  { %637 = vmatprep.mubr.msk.bf16.mxu0 %vm691_vm0, %v690_v33  ;;  %622 = vmatpush3.bf16.msra.mxu0 %v681_v37 }
  0x24   :  { %448 = vmatmul.mubr.bf16.vlgmr.msra.gmra.mrb[0].mxu1 %v678_v35  ;;  %623 = vmatprep.subr.bf16.mxu0 %v690_v33 }
  0x27   :  { %624 = vmatpush3.bf16.msra.mxu0 %v682_v38 }
  0x28   :  { %625 = vmatprep.subr.bf16.mxu0 %v690_v33 }
  0x2b   :  { %626 = vmatpush3.bf16.msra.mxu0 %v683_v39 }
  0x2c   :  { %627 = vmatprep.subr.bf16.mxu0 %v690_v33 }
  0x2f   :  { %628 = vmatpush3.bf16.msra.mxu0 %v684_v40 }
  0x30   :  { %629 = vmatprep.subr.bf16.mxu0 %v690_v33 }
  0x33   :  { %630 = vmatpush3.bf16.msra.mxu0 %v685_v41 }
  0x34   :  { %631 = vmatprep.subr.bf16.mxu0 %v690_v33 }
  0x37   :  { %632 = vmatpush3.bf16.msra.mxu0 %v686_v42 }
  0x38   :  { %633 = vmatprep.subr.bf16.mxu0 %v690_v33 }
  0x3b   :  { %634 = vmatpush3.bf16.msra.mxu0 %v687_v43 }
  0x3c   :  { %635 = vmatprep.subr.bf16.mxu0 %v690_v33 }
  0x3f   :  { %636 = vmatpush3.bf16.msra.mxu0 %v688_v44 }
  0x42   :  { %638 = vmatmul.mubr.bf16.vlgmr.msra.gmra.mrb[4].mxu0 %v689_v45 }
  0xf5   :  { %v584_v46 = vpop.f32.mrb[0].mxu0 }
  0xf6   :  { %v585_v48 = vpop.f32.mrb[1].mxu0 }
  0xf7   :  { %v586_v49 = vadd.f32 %v585_v48, %v584_v46  ;;  %v587_v50 = vpop.f32.mrb[2].mxu0  ;;  %v606_v51 = vpop.f32.mrb[0].mxu1 }
  0xf8   :  { %v588_v52 = vpop.f32.mrb[3].mxu0  ;;  %v607_v55 = vpop.f32.mrb[1].mxu1 }
  0xf9   :  { %v409_v53 = vadd.f32 %v586_v49, %v513_v47  ;;  %v589_v54 = vadd.f32 %v588_v52, %v587_v50  ;;  %v608_v56 = vadd.f32 %v607_v55, %v606_v51  ;;  %v609_v57 = vpop.f32.mrb[2].mxu1 }
  0xfa   :  { %v610_v59 = vpop.f32.mrb[3].mxu1 }
  0xfb   :  { %v412_v58 = vadd.f32 %v589_v54, %v513_v47  ;;  %v611_v60 = vadd.f32 %v610_v59, %v609_v57  ;;  %v450_v61 = vadd.f32 %v608_v56, %v409_v53 }
  0xfd   :  { %v453_v62 = vadd.f32 %v611_v60, %v412_v58 }
 0x115   :  { %v490_v63 = vpop.f32.mrb[4].mxu0 }
 0x116   :  { %v491_v0 = vadd.f32 %v490_v63, %v450_v61  ;;  %v639_v1 = vpop.f32.mrb[5].mxu0 }
 0x117   :  { %v493_v2 = vpop.f32.mrb[6].mxu0 }
 0x118   :  { %v494_v3 = vadd.f32 %v493_v2, %v453_v62  ;;  %v640_v4 = vpop.f32.mrb[7].mxu0  ;;  %v497_v5 = vmax.f32 %v491_v0, 0.0 }
 0x11a   :  { %v498_v6 = vmax.f32 %v494_v3, 0.0 }
 0x11c   :  { %v566_v7 = vpack.c.bf16 %v498_v6, %v497_v5 }
 0x11e   :  { %567 = vst [vmem:[%s856_s3] sm:$0xff] %v566_v7  }

// kernel: red_model_forward.15
= control target key start
LH: loop header
LB: loop body
LE: loop exit
PB: predicated region body
PF: predicated region fallthrough
CT: control target
= control target key end

     0   :  { %v5081_v1 = vmov 0   ;;  %s6497_s1 = inlined_call_operand.vmem [shape: bf16[128,768], index: 1, kind: input, shape index: {}]   ;;  %s6498_s0 = inlined_call_operand.vmem [shape: bf16[8,128], index: 0, kind: input, shape index: {}]   ;;  %s6499_s3 = inlined_call_operand.vmem [shape: bf16[4,256,768], index: 3, kind: input, shape index: {}]   ;;  %s6500_s2 = inlined_call_operand.vmem [shape: f32[1,768], index: 2, kind: input, shape index: {}]   ;;  %s6501_s4 = inlined_call_operand.vmem [shape: f32[4,1,768], index: 4, kind: input, shape index: {}]   ;;  %s6502_s5 = inlined_call_operand.vmem [shape: f32[8,256], index: 5, kind: output, shape index: {}]  }
   0x1   :  { %v4313_v0 = vld [vmem:[%s6497_s1 + $0x4] ss:$24 sps:$4 sm:$0xff]   ;;  %374 = vmatprep.mubr.bf16.mxu0 %v5081_v1  ;;  %415 = vmatprep.mubr.bf16.mxu1 %v5081_v1  ;;  %v4315_v2 = vld [vmem:[%s6497_s1] ss:$24 sps:$4 sm:$0xff]   ;;  %v4316_v3 = vld [vmem:[%s6497_s1 + $0x34] ss:$24 sps:$4 sm:$0xff]  }
   0x2   :  { %342 = vmatprep.subr.bf16.mxu0 %v4313_v0  ;;  %v4318_v4 = vld [vmem:[%s6497_s1 + $0x30] ss:$24 sps:$4 sm:$0xff]   ;;  %v4319_v5 = vld [vmem:[%s6497_s1 + $0x64] ss:$24 sps:$4 sm:$0xff]   ;;  %v4321_v6 = vld [vmem:[%s6497_s1 + $0x60] ss:$24 sps:$4 sm:$0xff]  }
   0x3   :  { %343 = vmatpush1.bf16.msra.mxu0 %v4315_v2  ;;  %v4322_v7 = vld [vmem:[%s6497_s1 + $0x94] ss:$24 sps:$4 sm:$0xff]   ;;  %v4324_v9 = vld [vmem:[%s6497_s1 + $0x90] ss:$24 sps:$4 sm:$0xff]   ;;  %v4325_v10 = vld [vmem:[%s6497_s1 + $0xc4] ss:$24 sps:$4 sm:$0xff]  }
   0x4   :  { %344 = vmatprep.subr.bf16.mxu0 %v4316_v3  ;;  %v4334_v8 = vld [vmem:[%s6497_s1 + $0xc] ss:$24 sps:$4 sm:$0xff]   ;;  %v4338_v11 = vld [vmem:[%s6497_s1 + $0x8] ss:$24 sps:$4 sm:$0xff]   ;;  %v4340_v12 = vld [vmem:[%s6497_s1 + $0x3c] ss:$24 sps:$4 sm:$0xff]  }
   0x5   :  { %383 = vmatprep.subr.bf16.mxu1 %v4334_v8  ;;  %v4342_v13 = vld [vmem:[%s6497_s1 + $0x38] ss:$24 sps:$4 sm:$0xff]   ;;  %v4346_v15 = vld [vmem:[%s6497_s1 + $0x6c] ss:$24 sps:$4 sm:$0xff]   ;;  %v4348_v17 = vld [vmem:[%s6497_s1 + $0x68] ss:$24 sps:$4 sm:$0xff]  }
   0x6   :  { %384 = vmatpush1.bf16.msra.mxu1 %v4338_v11  ;;  %v4327_v14 = vld [vmem:[%s6497_s1 + $0xc0] ss:$24 sps:$4 sm:$0xff]   ;;  %v4328_v16 = vld [vmem:[%s6497_s1 + $0xf4] ss:$24 sps:$4 sm:$0xff]   ;;  %v4330_v19 = vld [vmem:[%s6497_s1 + $0xf0] ss:$24 sps:$4 sm:$0xff]  }
   0x7   :  { %345 = vmatpush1.bf16.msra.mxu0 %v4318_v4  ;;  %385 = vmatprep.subr.bf16.mxu1 %v4340_v12  ;;  %v4352_v18 = vld [vmem:[%s6497_s1 + $0x9c] ss:$24 sps:$4 sm:$0xff]   ;;  %v4354_v21 = vld [vmem:[%s6497_s1 + $0x98] ss:$24 sps:$4 sm:$0xff]   ;;  %v4358_v22 = vld [vmem:[%s6497_s1 + $0xcc] ss:$24 sps:$4 sm:$0xff]  }
   0x8   :  { %346 = vmatprep.subr.bf16.mxu0 %v4319_v5  ;;  %v4331_v20 = vld [vmem:[%s6497_s1 + $0x124] ss:$24 sps:$4 sm:$0xff]   ;;  %v4333_v23 = vld [vmem:[%s6497_s1 + $0x120] ss:$24 sps:$4 sm:$0xff]   ;;  %v4336_v24 = vld [vmem:[%s6497_s1 + $0x154] ss:$24 sps:$4 sm:$0xff]  }
   0x9   :  { %v4360_v25 = vld [vmem:[%s6497_s1 + $0xc8] ss:$24 sps:$4 sm:$0xff]   ;;  %v4364_v26 = vld [vmem:[%s6497_s1 + $0xfc] ss:$24 sps:$4 sm:$0xff]   ;;  %v4366_v29 = vld [vmem:[%s6497_s1 + $0xf8] ss:$24 sps:$4 sm:$0xff]  }
   0xa   :  { %386 = vmatpush1.bf16.msra.mxu1 %v4342_v13  ;;  %v4339_v27 = vld [vmem:[%s6497_s1 + $0x150] ss:$24 sps:$4 sm:$0xff]   ;;  %v4345_v28 = vld [vmem:[%s6497_s1 + $0x14] ss:$24 sps:$4 sm:$0xff]   ;;  %v21_v30 = vld [vmem:[%s6498_s0] sm:$0xf] }
   0xb   :  { %347 = vmatpush1.bf16.msra.mxu0 %v4321_v6  ;;  %387 = vmatprep.subr.bf16.mxu1 %v4346_v15  ;;  %v4370_v31 = vld [vmem:[%s6497_s1 + $0x12c] ss:$24 sps:$4 sm:$0xff]   ;;  %v4343_v32 = vld [vmem:[%s6497_s1 + $0x10] ss:$24 sps:$4 sm:$0xff]   ;;  %v4376_v35 = vld [vmem:[%s6497_s1 + $0x15c] ss:$24 sps:$4 sm:$0xff]  }
   0xc   :  { %348 = vmatprep.subr.bf16.mxu0 %v4322_v7  ;;  %v4351_v33 = vld [vmem:[%s6497_s1 + $0x44] ss:$24 sps:$4 sm:$0xff]   ;;  %v4372_v34 = vld [vmem:[%s6497_s1 + $0x128] ss:$24 sps:$4 sm:$0xff]   ;;  %v4357_v37 = vld [vmem:[%s6497_s1 + $0x74] ss:$24 sps:$4 sm:$0xff]  }
   0xd   :  { %v4349_v36 = vld [vmem:[%s6497_s1 + $0x40] ss:$24 sps:$4 sm:$0xff]   ;;  %v4355_v39 = vld [vmem:[%s6497_s1 + $0x70] ss:$24 sps:$4 sm:$0xff]   ;;  %v4363_v40 = vld [vmem:[%s6497_s1 + $0xa4] ss:$24 sps:$4 sm:$0xff]  }
   0xe   :  { %388 = vmatpush1.bf16.msra.mxu1 %v4348_v17  ;;  %v4378_v38 = vld [vmem:[%s6497_s1 + $0x158] ss:$24 sps:$4 sm:$0xff]   ;;  %v4369_v42 = vld [vmem:[%s6497_s1 + $0xd4] ss:$24 sps:$4 sm:$0xff]   ;;  %v4375_v44 = vld [vmem:[%s6497_s1 + $0x104] ss:$24 sps:$4 sm:$0xff]  }
   0xf   :  { %349 = vmatpush1.bf16.msra.mxu0 %v4324_v9  ;;  %389 = vmatprep.subr.bf16.mxu1 %v4352_v18  ;;  %v4361_v41 = vld [vmem:[%s6497_s1 + $0xa0] ss:$24 sps:$4 sm:$0xff]   ;;  %v4367_v43 = vld [vmem:[%s6497_s1 + $0xd0] ss:$24 sps:$4 sm:$0xff]   ;;  %v4381_v46 = vld [vmem:[%s6497_s1 + $0x134] ss:$24 sps:$4 sm:$0xff]  }
  0x10   :  { %350 = vmatprep.subr.bf16.mxu0 %v4325_v10  ;;  %v4373_v45 = vld [vmem:[%s6497_s1 + $0x100] ss:$24 sps:$4 sm:$0xff]   ;;  %v4379_v47 = vld [vmem:[%s6497_s1 + $0x130] ss:$24 sps:$4 sm:$0xff]   ;;  %v4384_v48 = vld [vmem:[%s6497_s1 + $0x164] ss:$24 sps:$4 sm:$0xff]  }
  0x11   :  { %v4382_v49 = vld [vmem:[%s6497_s1 + $0x160] ss:$24 sps:$4 sm:$0xff]   ;;  %v4387_v50 = vld [vmem:[%s6499_s3 + $0x4] ss:$24 sps:$4 sm:$0xff]   ;;  %v4393_v54 = vld [vmem:[%s6499_s3 + $0x34] ss:$24 sps:$4 sm:$0xff]  }
  0x12   :  { %390 = vmatpush1.bf16.msra.mxu1 %v4354_v21  ;;  %v4385_v51 = vld [vmem:[%s6499_s3] ss:$24 sps:$4 sm:$0xff]   ;;  %v4390_v53 = vld [vmem:[%s6499_s3 + $0xc] ss:$24 sps:$4 sm:$0xff]   ;;  %v4391_v55 = vld [vmem:[%s6499_s3 + $0x30] ss:$24 sps:$4 sm:$0xff]  }
  0x13   :  { %351 = vmatpush1.bf16.msra.mxu0 %v4327_v14  ;;  %391 = vmatprep.subr.bf16.mxu1 %v4358_v22  ;;  %v4388_v52 = vld [vmem:[%s6499_s3 + $0x8] ss:$24 sps:$4 sm:$0xff]   ;;  %v4396_v56 = vld [vmem:[%s6499_s3 + $0x3c] ss:$24 sps:$4 sm:$0xff]   ;;  %v4394_v57 = vld [vmem:[%s6499_s3 + $0x38] ss:$24 sps:$4 sm:$0xff]  }
  0x14   :  { %352 = vmatprep.subr.bf16.mxu0 %v4328_v16  ;;  %v4399_v58 = vld [vmem:[%s6499_s3 + $0x64] ss:$24 sps:$4 sm:$0xff]   ;;  %v4397_v59 = vld [vmem:[%s6499_s3 + $0x60] ss:$24 sps:$4 sm:$0xff]   ;;  %v4405_v62 = vld [vmem:[%s6499_s3 + $0x94] ss:$24 sps:$4 sm:$0xff]  }
  0x15   :  { %v4402_v60 = vld [vmem:[%s6499_s3 + $0x6c] ss:$24 sps:$4 sm:$0xff]   ;;  %v4400_v61 = vld [vmem:[%s6499_s3 + $0x68] ss:$24 sps:$4 sm:$0xff]   ;;  %v4408_v0 = vld [vmem:[%s6499_s3 + $0x9c] ss:$24 sps:$4 sm:$0xff]  }
  0x16   :  { %392 = vmatpush1.bf16.msra.mxu1 %v4360_v25  ;;  %v4403_v63 = vld [vmem:[%s6499_s3 + $0x90] ss:$24 sps:$4 sm:$0xff]   ;;  %v4411_v2 = vld [vmem:[%s6499_s3 + $0xc4] ss:$24 sps:$4 sm:$0xff]   ;;  %v4409_v3 = vld [vmem:[%s6499_s3 + $0xc0] ss:$24 sps:$4 sm:$0xff]  }
  0x17   :  { %353 = vmatpush1.bf16.msra.mxu0 %v4330_v19  ;;  %393 = vmatprep.subr.bf16.mxu1 %v4364_v26  ;;  %v4414_v4 = vld [vmem:[%s6499_s3 + $0xcc] ss:$24 sps:$4 sm:$0xff]   ;;  %v4412_v5 = vld [vmem:[%s6499_s3 + $0xc8] ss:$24 sps:$4 sm:$0xff]   ;;  %v4418_v8 = vld [vmem:[%s6499_s3 + $0xf8] ss:$24 sps:$4 sm:$0xff]  }
  0x18   :  { %354 = vmatprep.subr.bf16.mxu0 %v4331_v20  ;;  %v4417_v6 = vld [vmem:[%s6499_s3 + $0xf4] ss:$24 sps:$4 sm:$0xff]   ;;  %v4415_v7 = vld [vmem:[%s6499_s3 + $0xf0] ss:$24 sps:$4 sm:$0xff]   ;;  %v4421_v10 = vld [vmem:[%s6499_s3 + $0x120] ss:$24 sps:$4 sm:$0xff]  }
  0x19   :  { %v4420_v9 = vld [vmem:[%s6499_s3 + $0xfc] ss:$24 sps:$4 sm:$0xff]   ;;  %v4424_v12 = vld [vmem:[%s6499_s3 + $0x128] ss:$24 sps:$4 sm:$0xff]   ;;  %v4426_v13 = vld [vmem:[%s6499_s3 + $0x12c] ss:$24 sps:$4 sm:$0xff]  }
  0x1a   :  { %394 = vmatpush1.bf16.msra.mxu1 %v4366_v29  ;;  %v4423_v11 = vld [vmem:[%s6499_s3 + $0x124] ss:$24 sps:$4 sm:$0xff]   ;;  %v4429_v14 = vld [vmem:[%s6499_s3 + $0x154] ss:$24 sps:$4 sm:$0xff]   ;;  %v4427_v15 = vld [vmem:[%s6499_s3 + $0x150] ss:$24 sps:$4 sm:$0xff]  }
  0x1b   :  { %355 = vmatpush1.bf16.msra.mxu0 %v4333_v23  ;;  %395 = vmatprep.subr.bf16.mxu1 %v4370_v31  ;;  %v4432_v16 = vld [vmem:[%s6499_s3 + $0x15c] ss:$24 sps:$4 sm:$0xff]   ;;  %v4430_v17 = vld [vmem:[%s6499_s3 + $0x158] ss:$24 sps:$4 sm:$0xff]   ;;  %v4438_v20 = vld [vmem:[%s6499_s3 + $0x18c] ss:$24 sps:$4 sm:$0xff]  }
  0x1c   :  { %356 = vmatprep.subr.bf16.mxu0 %v4336_v24  ;;  %v4435_v18 = vld [vmem:[%s6499_s3 + $0x184] ss:$24 sps:$4 sm:$0xff]   ;;  %v4433_v19 = vld [vmem:[%s6499_s3 + $0x180] ss:$24 sps:$4 sm:$0xff]   ;;  %v4441_v22 = vld [vmem:[%s6499_s3 + $0x1b4] ss:$24 sps:$4 sm:$0xff]  }
  0x1d   :  { %v4436_v21 = vld [vmem:[%s6499_s3 + $0x188] ss:$24 sps:$4 sm:$0xff]   ;;  %v4444_v24 = vld [vmem:[%s6499_s3 + $0x1bc] ss:$24 sps:$4 sm:$0xff]   ;;  %v4442_v25 = vld [vmem:[%s6499_s3 + $0x1b8] ss:$24 sps:$4 sm:$0xff]  }
  0x1e   :  { %396 = vmatpush1.bf16.msra.mxu1 %v4372_v34  ;;  %v4439_v23 = vld [vmem:[%s6499_s3 + $0x1b0] ss:$24 sps:$4 sm:$0xff]   ;;  %v4447_v26 = vld [vmem:[%s6499_s3 + $0x1e4] ss:$24 sps:$4 sm:$0xff]  }
  0x1f   :  { %357 = vmatpush1.bf16.msra.mxu0 %v4339_v27  ;;  %397 = vmatprep.subr.bf16.mxu1 %v4376_v35  ;;  %v4445_v27 = vld [vmem:[%s6499_s3 + $0x1e0] ss:$24 sps:$4 sm:$0xff]   ;;  %v4451_v31 = vld [vmem:[%s6499_s3 + $0x210] ss:$24 sps:$4 sm:$0xff]   ;;  %v4459_v34 = vld [vmem:[%s6499_s3 + $0x244] ss:$24 sps:$4 sm:$0xff]  }
  0x20   :  { %424 = vmatprep.subr.bf16.mxu0 %v4345_v28  ;;  %v4450_v28 = vld [vmem:[%s6499_s3 + $0x1ec] ss:$24 sps:$4 sm:$0xff]   ;;  %v4448_v29 = vld [vmem:[%s6499_s3 + $0x1e8] ss:$24 sps:$4 sm:$0xff]  }
  0x21   :  { %v4457_v35 = vld [vmem:[%s6499_s3 + $0x240] ss:$24 sps:$4 sm:$0xff]  }
  0x22   :  { %375 = vmatmul.mubr.bf16.vlgmr.msra.gmra.mrb[0].mxu0 %v21_v30  ;;  %398 = vmatpush1.bf16.msra.mxu1 %v4378_v38  ;;  %v4463_v38 = vld [vmem:[%s6499_s3 + $0x270] ss:$24 sps:$4 sm:$0xff]  }
  0x23   :  { %425 = vmatpush1.bf16.msra.mxu0 %v4343_v32  ;;  %456 = vmatprep.mubr.bf16.mxu0 %v5081_v1  ;;  %v4406_v1 = vld [vmem:[%s6499_s3 + $0x98] ss:$24 sps:$4 sm:$0xff]   ;;  %v4456_v32 = vld [vmem:[%s6499_s3 + $0x21c] ss:$24 sps:$4 sm:$0xff]  }
  0x24   :  { %426 = vmatprep.subr.bf16.mxu0 %v4351_v33  ;;  %1107 = vmatprep.subr.bf16.mxu1 %v4387_v50  ;;  %v4454_v33 = vld [vmem:[%s6499_s3 + $0x218] ss:$24 sps:$4 sm:$0xff]   ;;  %v4483_v50 = vld [vmem:[%s6499_s3 + $0x14] ss:$24 sps:$4 sm:$0xff]  }
  0x25   :  { %416 = vmatmul.mubr.bf16.vlgmr.msra.gmra.mrb[0].mxu1 %v21_v30 }
  0x26   :  { %1108 = vmatpush1.bf16.msra.mxu1 %v4385_v51  ;;  %v72_v51 = vlaneseq }
  0x27   :  { %427 = vmatpush1.bf16.msra.mxu0 %v4349_v36  ;;  %1109 = vmatprep.subr.bf16.mxu1 %v4393_v54  ;;  %v4462_v36 = vld [vmem:[%s6499_s3 + $0x24c] ss:$24 sps:$4 sm:$0xff]  }
  0x28   :  { %428 = vmatprep.subr.bf16.mxu0 %v4357_v37  ;;  %v4460_v37 = vld [vmem:[%s6499_s3 + $0x248] ss:$24 sps:$4 sm:$0xff]  }
  0x2a   :  { %1110 = vmatpush1.bf16.msra.mxu1 %v4391_v55 }
  0x2b   :  { %429 = vmatpush1.bf16.msra.mxu0 %v4355_v39  ;;  %1111 = vmatprep.subr.bf16.mxu1 %v4399_v58  ;;  %v4465_v39 = vld [vmem:[%s6499_s3 + $0x274] ss:$24 sps:$4 sm:$0xff]  }
  0x2c   :  { %430 = vmatprep.subr.bf16.mxu0 %v4363_v40  ;;  %v4468_v40 = vld [vmem:[%s6499_s3 + $0x27c] ss:$24 sps:$4 sm:$0xff]  }
  0x2e   :  { %1112 = vmatpush1.bf16.msra.mxu1 %v4397_v59 }
  0x2f   :  { %431 = vmatpush1.bf16.msra.mxu0 %v4361_v41  ;;  %1113 = vmatprep.subr.bf16.mxu1 %v4405_v62  ;;  %v4471_v41 = vld [vmem:[%s6499_s3 + $0x2a4] ss:$24 sps:$4 sm:$0xff]  }
  0x30   :  { %432 = vmatprep.subr.bf16.mxu0 %v4369_v42  ;;  %v4466_v42 = vld [vmem:[%s6499_s3 + $0x278] ss:$24 sps:$4 sm:$0xff]  }
  0x32   :  { %1114 = vmatpush1.bf16.msra.mxu1 %v4403_v63 }
  0x33   :  { %433 = vmatpush1.bf16.msra.mxu0 %v4367_v43  ;;  %1115 = vmatprep.subr.bf16.mxu1 %v4411_v2  ;;  %v4469_v43 = vld [vmem:[%s6499_s3 + $0x2a0] ss:$24 sps:$4 sm:$0xff]  }
  0x34   :  { %434 = vmatprep.subr.bf16.mxu0 %v4375_v44  ;;  %v4474_v44 = vld [vmem:[%s6499_s3 + $0x2ac] ss:$24 sps:$4 sm:$0xff]  }
  0x36   :  { %1116 = vmatpush1.bf16.msra.mxu1 %v4409_v3 }
  0x37   :  { %435 = vmatpush1.bf16.msra.mxu0 %v4373_v45  ;;  %1117 = vmatprep.subr.bf16.mxu1 %v4417_v6  ;;  %v4477_v45 = vld [vmem:[%s6499_s3 + $0x2d4] ss:$24 sps:$4 sm:$0xff]  }
  0x38   :  { %436 = vmatprep.subr.bf16.mxu0 %v4381_v46  ;;  %v4472_v46 = vld [vmem:[%s6499_s3 + $0x2a8] ss:$24 sps:$4 sm:$0xff]  }
  0x3a   :  { %1118 = vmatpush1.bf16.msra.mxu1 %v4415_v7 }
  0x3b   :  { %437 = vmatpush1.bf16.msra.mxu0 %v4379_v47  ;;  %1119 = vmatprep.subr.bf16.mxu1 %v4423_v11  ;;  %v4480_v47 = vld [vmem:[%s6499_s3 + $0x2dc] ss:$24 sps:$4 sm:$0xff]  }
  0x3c   :  { %438 = vmatprep.subr.bf16.mxu0 %v4384_v48  ;;  %v4475_v48 = vld [vmem:[%s6499_s3 + $0x2d0] ss:$24 sps:$4 sm:$0xff]  }
  0x3e   :  { %1120 = vmatpush1.bf16.msra.mxu1 %v4421_v10 }
  0x3f   :  { %439 = vmatpush1.bf16.msra.mxu0 %v4382_v49  ;;  %1121 = vmatprep.subr.bf16.mxu1 %v4429_v14  ;;  %v4478_v49 = vld [vmem:[%s6499_s3 + $0x2d8] ss:$24 sps:$4 sm:$0xff]  }
  0x40   :  { %1148 = vmatprep.subr.bf16.mxu0 %v4390_v53  ;;  %v70_v53 = vld [vmem:[%s6500_s2] sm:$0x3f] }
  0x42   :  { %457 = vmatmul.mubr.bf16.vlgmr.msra.gmra.mrb[4].mxu0 %v21_v30  ;;  %1122 = vmatpush1.bf16.msra.mxu1 %v4427_v15  ;;  %v4453_v30 = vld [vmem:[%s6499_s3 + $0x214] ss:$24 sps:$4 sm:$0xff]  }
  0x43   :  { %1149 = vmatpush1.bf16.msra.mxu0 %v4388_v52  ;;  %1123 = vmatprep.subr.bf16.mxu1 %v4435_v18  ;;  %v73_v52 = vshrl.u32 %v72_v51, 7  ;;  %v4492_v51 = vld [vmem:[%s6499_s3 + $0xa4] ss:$24 sps:$4 sm:$0xff]  }
  0x44   :  { %1150 = vmatprep.subr.bf16.mxu0 %v4396_v56 }
  0x45   :  { %v5460_v54 = vsub.s32 0, %v73_v52  ;;  %v5462_v56 = vsub.s32 1, %v73_v52  ;;  %v5468_v7 = vsub.s32 3, %v73_v52 }
  0x46   :  { %1124 = vmatpush1.bf16.msra.mxu1 %v4433_v19 }
  0x47   :  { %1151 = vmatpush1.bf16.msra.mxu0 %v4394_v57  ;;  %1125 = vmatprep.subr.bf16.mxu1 %v4441_v22 }
  0x48   :  { %1152 = vmatprep.subr.bf16.mxu0 %v4402_v60  ;;  %v75_v60 = vrot.slane %v70_v53, %v5460_v54 }
  0x4a   :  { %1126 = vmatpush1.bf16.msra.mxu1 %v4439_v23 }
  0x4b   :  { %1153 = vmatpush1.bf16.msra.mxu0 %v4400_v61  ;;  %1127 = vmatprep.subr.bf16.mxu1 %v4447_v26  ;;  %v79_v61 = vrot.slane %v70_v53, %v5462_v56 }
  0x4c   :  { %1154 = vmatprep.subr.bf16.mxu0 %v4408_v0 }
  0x4e   :  { %1128 = vmatpush1.bf16.msra.mxu1 %v4445_v27 }
  0x4f   :  { %1155 = vmatpush1.bf16.msra.mxu0 %v4406_v1  ;;  %1129 = vmatprep.subr.bf16.mxu1 %v4453_v30  ;;  %v5466_v1 = vsub.s32 2, %v73_v52 }
  0x50   :  { %1156 = vmatprep.subr.bf16.mxu0 %v4414_v4 }
  0x52   :  { %1130 = vmatpush1.bf16.msra.mxu1 %v4451_v31 }
  0x53   :  { %1157 = vmatpush1.bf16.msra.mxu0 %v4412_v5  ;;  %1131 = vmatprep.subr.bf16.mxu1 %v4459_v34 }
  0x54   :  { %1158 = vmatprep.subr.bf16.mxu0 %v4420_v9  ;;  %v87_v9 = vrot.slane %v70_v53, %v5468_v7 }
  0x56   :  { %1132 = vmatpush1.bf16.msra.mxu1 %v4457_v35 }
  0x57   :  { %1159 = vmatpush1.bf16.msra.mxu0 %v4418_v8  ;;  %1133 = vmatprep.subr.bf16.mxu1 %v4465_v39  ;;  %v83_v8 = vrot.slane %v70_v53, %v5466_v1 }
  0x58   :  { %1160 = vmatprep.subr.bf16.mxu0 %v4426_v13  ;;  %v5472_v13 = vsub.s32 4, %v73_v52 }
  0x5a   :  { %1134 = vmatpush1.bf16.msra.mxu1 %v4463_v38  ;;  %v91_v19 = vrot.slane %v70_v53, %v5472_v13 }
  0x5b   :  { %1161 = vmatpush1.bf16.msra.mxu0 %v4424_v12  ;;  %1135 = vmatprep.subr.bf16.mxu1 %v4471_v41 }
  0x5c   :  { %1162 = vmatprep.subr.bf16.mxu0 %v4432_v16  ;;  %v5474_v16 = vsub.s32 5, %v73_v52  ;;  %v4490_v52 = vld [vmem:[%s6499_s3 + $0xa0] ss:$24 sps:$4 sm:$0xff]  }
  0x5e   :  { %1136 = vmatpush1.bf16.msra.mxu1 %v4469_v43 }
  0x5f   :  { %1163 = vmatpush1.bf16.msra.mxu0 %v4430_v17  ;;  %1137 = vmatprep.subr.bf16.mxu1 %v4477_v45  ;;  %v4481_v45 = vld [vmem:[%s6499_s3 + $0x10] ss:$24 sps:$4 sm:$0xff]  }
  0x60   :  { %1164 = vmatprep.subr.bf16.mxu0 %v4438_v20 }
  0x62   :  { %1138 = vmatpush1.bf16.msra.mxu1 %v4475_v48  ;;  %v4484_v48 = vld [vmem:[%s6499_s3 + $0x40] ss:$24 sps:$4 sm:$0xff]  }
  0x63   :  { %1165 = vmatpush1.bf16.msra.mxu0 %v4436_v21  ;;  %1189 = vmatprep.subr.bf16.mxu1 %v4483_v50  ;;  %v95_v21 = vrot.slane %v70_v53, %v5474_v16  ;;  %v4487_v50 = vld [vmem:[%s6499_s3 + $0x70] ss:$24 sps:$4 sm:$0xff]   ;;  %v4495_v53 = vld [vmem:[%s6499_s3 + $0xd4] ss:$24 sps:$4 sm:$0xff]  }
  0x64   :  { %1166 = vmatprep.subr.bf16.mxu0 %v4444_v24 }
  0x67   :  { %1167 = vmatpush1.bf16.msra.mxu0 %v4442_v25 }
  0x68   :  { %1168 = vmatprep.subr.bf16.mxu0 %v4450_v28 }
  0x6b   :  { %1169 = vmatpush1.bf16.msra.mxu0 %v4448_v29 }
  0x6c   :  { %1170 = vmatprep.subr.bf16.mxu0 %v4456_v32 }
  0x6f   :  { %1171 = vmatpush1.bf16.msra.mxu0 %v4454_v33 }
  0x70   :  { %1172 = vmatprep.subr.bf16.mxu0 %v4462_v36 }
  0x73   :  { %1173 = vmatpush1.bf16.msra.mxu0 %v4460_v37 }
  0x74   :  { %1174 = vmatprep.subr.bf16.mxu0 %v4468_v40 }
  0x77   :  { %1175 = vmatpush1.bf16.msra.mxu0 %v4466_v42 }
  0x78   :  { %1176 = vmatprep.subr.bf16.mxu0 %v4474_v44 }
  0x7b   :  { %1177 = vmatpush1.bf16.msra.mxu0 %v4472_v46 }
  0x7c   :  { %1178 = vmatprep.subr.bf16.mxu0 %v4480_v47  ;;  %v4486_v47 = vld [vmem:[%s6499_s3 + $0x44] ss:$24 sps:$4 sm:$0xff]  }
  0x7f   :  { %1179 = vmatpush1.bf16.msra.mxu0 %v4478_v49  ;;  %v4489_v49 = vld [vmem:[%s6499_s3 + $0x74] ss:$24 sps:$4 sm:$0xff]  }
  0xf5   :  { %v376_v55 = vpop.f32.mrb[0].mxu0 }
  0xf6   :  { %v378_v57 = vpop.f32.mrb[1].mxu0  ;;  %v377_v62 = vadd.f32 %v376_v55, %v75_v60  ;;  %v4493_v55 = vld [vmem:[%s6499_s3 + $0xd0] ss:$24 sps:$4 sm:$0xff]  }
  0xf7   :  { %v380_v58 = vpop.f32.mrb[2].mxu0  ;;  %v379_v63 = vadd.f32 %v378_v57, %v79_v61  ;;  %v4498_v57 = vld [vmem:[%s6499_s3 + $0x104] ss:$24 sps:$4 sm:$0xff]   ;;  %v4499_v60 = vld [vmem:[%s6499_s3 + $0x130] ss:$24 sps:$4 sm:$0xff]  }
  0xf8   :  { %v381_v59 = vpop.f32.mrb[3].mxu0  ;;  %v417_v0 = vpop.f32.mrb[0].mxu1  ;;  %v3617_v3 = vmul.f32 -1.442695, %v377_v62  ;;  %v4496_v58 = vld [vmem:[%s6499_s3 + $0x100] ss:$24 sps:$4 sm:$0xff]  }
  0xf9   :  { %v419_v2 = vpop.f32.mrb[1].mxu1  ;;  %v3618_v5 = vmul.f32 -1.442695, %v379_v63  ;;  %v418_v10 = vadd.f32 %v417_v0, %v83_v8  ;;  %v4501_v59 = vld [vmem:[%s6499_s3 + $0x134] ss:$24 sps:$4 sm:$0xff]  }
  0xfa   :  { %v421_v4 = vpop.f32.mrb[2].mxu1  ;;  %4961 = vpow2.f32 %v3617_v3  ;;  %v420_v11 = vadd.f32 %v419_v2, %v87_v9  ;;  %v4504_v61 = vld [vmem:[%s6499_s3 + $0x164] ss:$24 sps:$4 sm:$0xff]   ;;  %v4502_v62 = vld [vmem:[%s6499_s3 + $0x160] ss:$24 sps:$4 sm:$0xff]  }
  0xfb   :  { %v422_v6 = vpop.f32.mrb[3].mxu1  ;;  %4963 = vpow2.f32 %v3618_v5  ;;  %v3619_v12 = vmul.f32 -1.442695, %v418_v10  ;;  %v4507_v63 = vld [vmem:[%s6499_s3 + $0x194] ss:$24 sps:$4 sm:$0xff]  }
  0xfc   :  { %v3620_v15 = vmul.f32 -1.442695, %v420_v11  ;;  %v4505_v0 = vld [vmem:[%s6499_s3 + $0x190] ss:$24 sps:$4 sm:$0xff]   ;;  %v4510_v2 = vld [vmem:[%s6499_s3 + $0x1c4] ss:$24 sps:$4 sm:$0xff]  }
  0xfd   :  { %4965 = vpow2.f32 %v3619_v12  ;;  %v4508_v3 = vld [vmem:[%s6499_s3 + $0x1c0] ss:$24 sps:$4 sm:$0xff]   ;;  %v4513_v4 = vld [vmem:[%s6499_s3 + $0x1f4] ss:$24 sps:$4 sm:$0xff]   ;;  %v4511_v5 = vld [vmem:[%s6499_s3 + $0x1f0] ss:$24 sps:$4 sm:$0xff]  }
  0xfe   :  { %4967 = vpow2.f32 %v3620_v15  ;;  %v4516_v6 = vld [vmem:[%s6499_s3 + $0x224] ss:$24 sps:$4 sm:$0xff]   ;;  %v4514_v8 = vld [vmem:[%s6499_s3 + $0x220] ss:$24 sps:$4 sm:$0xff]   ;;  %v4519_v9 = vld [vmem:[%s6499_s3 + $0x254] ss:$24 sps:$4 sm:$0xff]  }
  0xff   :  { %v4517_v10 = vld [vmem:[%s6499_s3 + $0x250] ss:$24 sps:$4 sm:$0xff]   ;;  %v4522_v11 = vld [vmem:[%s6499_s3 + $0x284] ss:$24 sps:$4 sm:$0xff]   ;;  %v4520_v12 = vld [vmem:[%s6499_s3 + $0x280] ss:$24 sps:$4 sm:$0xff]  }
 0x100   :  { %v4523_v15 = vld [vmem:[%s6499_s3 + $0x2b0] ss:$24 sps:$4 sm:$0xff]  }
 0x104   :  { %v4962_v14 = vpop.eup %4961 }
 0x105   :  { %v4964_v17 = vpop.eup %4963  ;;  %v471_v18 = vadd.f32 1.0, %v4962_v14  ;;  %v4525_v14 = vld [vmem:[%s6499_s3 + $0x2b4] ss:$24 sps:$4 sm:$0xff]  }
 0x106   :  { %v472_v20 = vadd.f32 1.0, %v4964_v17  ;;  %v4528_v17 = vld [vmem:[%s6499_s3 + $0x2e4] ss:$24 sps:$4 sm:$0xff]  }
 0x107   :  { %4969 = vrcp.f32 %v471_v18  ;;  %v4966_v28 = vpop.eup %4965  ;;  %v4526_v18 = vld [vmem:[%s6499_s3 + $0x2e0] ss:$24 sps:$4 sm:$0xff]  }
 0x108   :  { %4971 = vrcp.f32 %v472_v20  ;;  %v4968_v29 = vpop.eup %4967  ;;  %v483_v30 = vadd.f32 1.0, %v4966_v28  ;;  %v4531_v20 = vld [vmem:[%s6499_s3 + $0x304] ss:$24 sps:$4 sm:$0xff]  }
 0x109   :  { %v484_v32 = vadd.f32 1.0, %v4968_v29  ;;  %1874 = vmatprep.subr.bf16.mxu0 %v4531_v20  ;;  %v4546_v28 = vld [vmem:[%s6499_s3 + $0x36c] ss:$24 sps:$4 sm:$0xff]   ;;  %v4541_v29 = vld [vmem:[%s6499_s3 + $0x360] ss:$24 sps:$4 sm:$0xff]  }
 0x10a   :  { %v4616_v20 = vld [vmem:[%s6499_s3 + $0x5a8] ss:$24 sps:$4 sm:$0xff]  }
 0x111   :  { %v4970_v31 = vpop.eup %4969 }
 0x112   :  { %v4972_v33 = vpop.eup %4971 }
 0x115   :  { %v458_v22 = vpop.f32.mrb[4].mxu0 }
 0x116   :  { %v459_v23 = vadd.f32 %v458_v22, %v91_v19  ;;  %v460_v24 = vpop.f32.mrb[5].mxu0  ;;  %v4529_v19 = vld [vmem:[%s6499_s3 + $0x300] ss:$24 sps:$4 sm:$0xff]   ;;  %v4534_v22 = vld [vmem:[%s6499_s3 + $0x30c] ss:$24 sps:$4 sm:$0xff]  }
 0x117   :  { %v461_v25 = vadd.f32 %v460_v24, %v95_v21  ;;  %v462_v26 = vpop.f32.mrb[6].mxu0  ;;  %v4532_v21 = vld [vmem:[%s6499_s3 + $0x308] ss:$24 sps:$4 sm:$0xff]   ;;  %v4540_v24 = vld [vmem:[%s6499_s3 + $0x33c] ss:$24 sps:$4 sm:$0xff]  }
 0x118   :  { %4973 = vtanh.f32 %v459_v23  ;;  %v463_v27 = vpop.f32.mrb[7].mxu0  ;;  %v4537_v23 = vld [vmem:[%s6499_s3 + $0x334] ss:$24 sps:$4 sm:$0xff]   ;;  %v4538_v26 = vld [vmem:[%s6499_s3 + $0x338] ss:$24 sps:$4 sm:$0xff]  }
 0x119   :  { %4975 = vtanh.f32 %v461_v25  ;;  %v4535_v25 = vld [vmem:[%s6499_s3 + $0x330] ss:$24 sps:$4 sm:$0xff]   ;;  %v4543_v27 = vld [vmem:[%s6499_s3 + $0x364] ss:$24 sps:$4 sm:$0xff]  }
 0x11a   :  { %4977 = vrcp.f32 %v483_v30  ;;  %v4544_v30 = vld [vmem:[%s6499_s3 + $0x368] ss:$24 sps:$4 sm:$0xff]  }
 0x11b   :  { %4979 = vrcp.f32 %v484_v32  ;;  %v4552_v32 = vld [vmem:[%s6499_s3 + $0x39c] ss:$24 sps:$4 sm:$0xff]  }
 0x122   :  { %v4974_v34 = vpop.eup %4973 }
 0x123   :  { %v4976_v35 = vpop.eup %4975  ;;  %v491_v36 = vmul.f32 %v4974_v34, %v4970_v31  ;;  %v4549_v31 = vld [vmem:[%s6499_s3 + $0x394] ss:$24 sps:$4 sm:$0xff]   ;;  %v4550_v34 = vld [vmem:[%s6499_s3 + $0x398] ss:$24 sps:$4 sm:$0xff]  }
 0x124   :  { %v492_v37 = vmul.f32 %v4976_v35, %v4972_v33  ;;  %v4978_v38 = vpop.eup %4977  ;;  %v4547_v33 = vld [vmem:[%s6499_s3 + $0x390] ss:$24 sps:$4 sm:$0xff]   ;;  %v4555_v35 = vld [vmem:[%s6499_s3 + $0x3c4] ss:$24 sps:$4 sm:$0xff]  }
 0x125   :  { %4981 = vtanh.f32 %v491_v36  ;;  %v4980_v39 = vpop.eup %4979  ;;  %v4558_v36 = vld [vmem:[%s6499_s3 + $0x3cc] ss:$24 sps:$4 sm:$0xff]  }
 0x126   :  { %4983 = vtanh.f32 %v492_v37  ;;  %v4553_v37 = vld [vmem:[%s6499_s3 + $0x3c0] ss:$24 sps:$4 sm:$0xff]  }
 0x12f   :  { %v4982_v40 = vpop.eup %4981 }
 0x130   :  { %v4984_v41 = vpop.eup %4983  ;;  %v495_v42 = vmul.f32 %v4982_v40, %v4978_v38  ;;  %v4556_v38 = vld [vmem:[%s6499_s3 + $0x3c8] ss:$24 sps:$4 sm:$0xff]   ;;  %v4564_v40 = vld [vmem:[%s6499_s3 + $0x3fc] ss:$24 sps:$4 sm:$0xff]  }
 0x131   :  { %v496_v43 = vmul.f32 %v4984_v41, %v4980_v39  ;;  %v4561_v39 = vld [vmem:[%s6499_s3 + $0x3f4] ss:$24 sps:$4 sm:$0xff]   ;;  %v4559_v41 = vld [vmem:[%s6499_s3 + $0x3f0] ss:$24 sps:$4 sm:$0xff]  }
 0x132   :  { %v5481_v46 = vpack.c.bf16 %v495_v42, %v495_v42  ;;  %v4562_v42 = vld [vmem:[%s6499_s3 + $0x3f8] ss:$24 sps:$4 sm:$0xff]  }
 0x133   :  { %v498_v44 = vpack.c.bf16 %v496_v43, %v496_v43  ;;  %v4567_v43 = vld [vmem:[%s6499_s3 + $0x424] ss:$24 sps:$4 sm:$0xff]  }
 0x135   :  { %1139 = vmatprep.mubr.bf16.mxu1 %v498_v44  ;;  %1180 = vmatprep.mubr.bf16.mxu0 %v498_v44 }
 0x136   :  { %1140 = vmatmul.mubr.bf16.vlgmr.msra.gmra.mrb[4].mxu1 %v5481_v46  ;;  %1181 = vmatmul.mubr.bf16.vlgmr.msra.gmra.mrb[8].mxu0 %v5481_v46 }
 0x137   :  { %1190 = vmatpush1.bf16.msra.mxu1 %v4481_v45  ;;  %1221 = vmatprep.mubr.bf16.mxu1 %v498_v44  ;;  %v4570_v44 = vld [vmem:[%s6499_s3 + $0x42c] ss:$24 sps:$4 sm:$0xff]   ;;  %v4565_v45 = vld [vmem:[%s6499_s3 + $0x420] ss:$24 sps:$4 sm:$0xff]  }
 0x138   :  { %1191 = vmatprep.subr.bf16.mxu1 %v4486_v47  ;;  %1875 = vmatpush1.bf16.msra.mxu0 %v4529_v19  ;;  %v4573_v47 = vld [vmem:[%s6499_s3 + $0x454] ss:$24 sps:$4 sm:$0xff]   ;;  %v4613_v19 = vld [vmem:[%s6499_s3 + $0x5a0] ss:$24 sps:$4 sm:$0xff]  }
 0x139   :  { %1876 = vmatprep.subr.bf16.mxu0 %v4537_v23  ;;  %v4619_v23 = vld [vmem:[%s6499_s3 + $0x5d0] ss:$24 sps:$4 sm:$0xff]  }
 0x13b   :  { %1192 = vmatpush1.bf16.msra.mxu1 %v4484_v48  ;;  %v4576_v48 = vld [vmem:[%s6499_s3 + $0x45c] ss:$24 sps:$4 sm:$0xff]  }
 0x13c   :  { %1193 = vmatprep.subr.bf16.mxu1 %v4489_v49  ;;  %1877 = vmatpush1.bf16.msra.mxu0 %v4535_v25  ;;  %v4571_v49 = vld [vmem:[%s6499_s3 + $0x450] ss:$24 sps:$4 sm:$0xff]   ;;  %v4627_v25 = vld [vmem:[%s6499_s3 + $0x314] ss:$24 sps:$4 sm:$0xff]  }
 0x13d   :  { %1878 = vmatprep.subr.bf16.mxu0 %v4543_v27 }
 0x13f   :  { %1194 = vmatpush1.bf16.msra.mxu1 %v4487_v50  ;;  %v4574_v50 = vld [vmem:[%s6499_s3 + $0x458] ss:$24 sps:$4 sm:$0xff]  }
 0x140   :  { %1195 = vmatprep.subr.bf16.mxu1 %v4492_v51  ;;  %1879 = vmatpush1.bf16.msra.mxu0 %v4541_v29  ;;  %v4579_v51 = vld [vmem:[%s6499_s3 + $0x484] ss:$24 sps:$4 sm:$0xff]  }
 0x141   :  { %1880 = vmatprep.subr.bf16.mxu0 %v4549_v31 }
 0x143   :  { %1196 = vmatpush1.bf16.msra.mxu1 %v4490_v52  ;;  %v4577_v52 = vld [vmem:[%s6499_s3 + $0x480] ss:$24 sps:$4 sm:$0xff]  }
 0x144   :  { %1197 = vmatprep.subr.bf16.mxu1 %v4495_v53  ;;  %1881 = vmatpush1.bf16.msra.mxu0 %v4547_v33  ;;  %v4582_v53 = vld [vmem:[%s6499_s3 + $0x48c] ss:$24 sps:$4 sm:$0xff]  }
 0x145   :  { %1882 = vmatprep.subr.bf16.mxu0 %v4555_v35 }
 0x147   :  { %1198 = vmatpush1.bf16.msra.mxu1 %v4493_v55  ;;  %v4580_v55 = vld [vmem:[%s6499_s3 + $0x488] ss:$24 sps:$4 sm:$0xff]  }
 0x148   :  { %1199 = vmatprep.subr.bf16.mxu1 %v4498_v57  ;;  %1883 = vmatpush1.bf16.msra.mxu0 %v4553_v37  ;;  %v4585_v57 = vld [vmem:[%s6499_s3 + $0x4b4] ss:$24 sps:$4 sm:$0xff]  }
 0x149   :  { %1884 = vmatprep.subr.bf16.mxu0 %v4561_v39 }
 0x14b   :  { %1200 = vmatpush1.bf16.msra.mxu1 %v4496_v58  ;;  %v4583_v58 = vld [vmem:[%s6499_s3 + $0x4b0] ss:$24 sps:$4 sm:$0xff]  }
 0x14c   :  { %1201 = vmatprep.subr.bf16.mxu1 %v4501_v59  ;;  %1885 = vmatpush1.bf16.msra.mxu0 %v4559_v41  ;;  %v4588_v59 = vld [vmem:[%s6499_s3 + $0x4bc] ss:$24 sps:$4 sm:$0xff]  }
 0x14d   :  { %1886 = vmatprep.subr.bf16.mxu0 %v4567_v43 }
 0x14f   :  { %1202 = vmatpush1.bf16.msra.mxu1 %v4499_v60  ;;  %v4586_v60 = vld [vmem:[%s6499_s3 + $0x4b8] ss:$24 sps:$4 sm:$0xff]  }
 0x150   :  { %1203 = vmatprep.subr.bf16.mxu1 %v4504_v61  ;;  %1887 = vmatpush1.bf16.msra.mxu0 %v4565_v45  ;;  %v4591_v61 = vld [vmem:[%s6499_s3 + $0x4e4] ss:$24 sps:$4 sm:$0xff]  }
 0x151   :  { %1888 = vmatprep.subr.bf16.mxu0 %v4573_v47 }
 0x153   :  { %1204 = vmatpush1.bf16.msra.mxu1 %v4502_v62  ;;  %v4589_v62 = vld [vmem:[%s6499_s3 + $0x4e0] ss:$24 sps:$4 sm:$0xff]  }
 0x154   :  { %1205 = vmatprep.subr.bf16.mxu1 %v4507_v63  ;;  %1889 = vmatpush1.bf16.msra.mxu0 %v4571_v49  ;;  %v4594_v63 = vld [vmem:[%s6499_s3 + $0x4ec] ss:$24 sps:$4 sm:$0xff]  }
 0x155   :  { %1890 = vmatprep.subr.bf16.mxu0 %v4579_v51 }
 0x157   :  { %1206 = vmatpush1.bf16.msra.mxu1 %v4505_v0  ;;  %v4592_v0 = vld [vmem:[%s6499_s3 + $0x4e8] ss:$24 sps:$4 sm:$0xff]  }
 0x158   :  { %1207 = vmatprep.subr.bf16.mxu1 %v4510_v2  ;;  %1891 = vmatpush1.bf16.msra.mxu0 %v4577_v52  ;;  %v4597_v2 = vld [vmem:[%s6499_s3 + $0x514] ss:$24 sps:$4 sm:$0xff]  }
 0x159   :  { %1892 = vmatprep.subr.bf16.mxu0 %v4585_v57 }
 0x15b   :  { %1208 = vmatpush1.bf16.msra.mxu1 %v4508_v3  ;;  %v4595_v3 = vld [vmem:[%s6499_s3 + $0x510] ss:$24 sps:$4 sm:$0xff]  }
 0x15c   :  { %1209 = vmatprep.subr.bf16.mxu1 %v4513_v4  ;;  %1893 = vmatpush1.bf16.msra.mxu0 %v4583_v58  ;;  %v4600_v4 = vld [vmem:[%s6499_s3 + $0x51c] ss:$24 sps:$4 sm:$0xff]  }
 0x15d   :  { %1894 = vmatprep.subr.bf16.mxu0 %v4591_v61 }
 0x15f   :  { %1210 = vmatpush1.bf16.msra.mxu1 %v4511_v5  ;;  %v4598_v5 = vld [vmem:[%s6499_s3 + $0x518] ss:$24 sps:$4 sm:$0xff]  }
 0x160   :  { %1211 = vmatprep.subr.bf16.mxu1 %v4516_v6  ;;  %1895 = vmatpush1.bf16.msra.mxu0 %v4589_v62  ;;  %v4603_v6 = vld [vmem:[%s6499_s3 + $0x544] ss:$24 sps:$4 sm:$0xff]  }
 0x161   :  { %1896 = vmatprep.subr.bf16.mxu0 %v4597_v2 }
 0x163   :  { %1212 = vmatpush1.bf16.msra.mxu1 %v4514_v8  ;;  %v4601_v8 = vld [vmem:[%s6499_s3 + $0x540] ss:$24 sps:$4 sm:$0xff]  }
 0x164   :  { %1213 = vmatprep.subr.bf16.mxu1 %v4519_v9  ;;  %1897 = vmatpush1.bf16.msra.mxu0 %v4595_v3  ;;  %v4606_v9 = vld [vmem:[%s6499_s3 + $0x54c] ss:$24 sps:$4 sm:$0xff]  }
 0x165   :  { %1898 = vmatprep.subr.bf16.mxu0 %v4603_v6 }
 0x167   :  { %1214 = vmatpush1.bf16.msra.mxu1 %v4517_v10  ;;  %v4604_v10 = vld [vmem:[%s6499_s3 + $0x548] ss:$24 sps:$4 sm:$0xff]  }
 0x168   :  { %1215 = vmatprep.subr.bf16.mxu1 %v4522_v11  ;;  %v4609_v11 = vld [vmem:[%s6499_s3 + $0x574] ss:$24 sps:$4 sm:$0xff]   ;;  %1899 = vmatpush1.bf16.msra.mxu0 %v4601_v8 }
 0x169   :  { %1900 = vmatprep.subr.bf16.mxu0 %v4609_v11 }
 0x16b   :  { %1216 = vmatpush1.bf16.msra.mxu1 %v4520_v12  ;;  %v4607_v12 = vld [vmem:[%s6499_s3 + $0x570] ss:$24 sps:$4 sm:$0xff]  }
 0x16c   :  { %1217 = vmatprep.subr.bf16.mxu1 %v4525_v14  ;;  %v4612_v14 = vld [vmem:[%s6499_s3 + $0x57c] ss:$24 sps:$4 sm:$0xff]   ;;  %1901 = vmatpush1.bf16.msra.mxu0 %v4607_v12 }
 0x16f   :  { %1218 = vmatpush1.bf16.msra.mxu1 %v4523_v15  ;;  %v4610_v15 = vld [vmem:[%s6499_s3 + $0x578] ss:$24 sps:$4 sm:$0xff]  }
 0x170   :  { %1219 = vmatprep.subr.bf16.mxu1 %v4528_v17  ;;  %v4615_v17 = vld [vmem:[%s6499_s3 + $0x5a4] ss:$24 sps:$4 sm:$0xff]  }
 0x171   :  { %1902 = vmatprep.subr.bf16.mxu0 %v4615_v17 }
 0x172   :  { %1903 = vmatpush1.bf16.msra.mxu0 %v4613_v19 }
 0x173   :  { %1220 = vmatpush1.bf16.msra.mxu1 %v4526_v18  ;;  %v4618_v18 = vld [vmem:[%s6499_s3 + $0x5ac] ss:$24 sps:$4 sm:$0xff]  }
 0x174   :  { %1915 = vmatprep.subr.bf16.mxu1 %v4534_v22  ;;  %v4624_v22 = vld [vmem:[%s6499_s3 + $0x5dc] ss:$24 sps:$4 sm:$0xff]  }
 0x176   :  { %1222 = vmatmul.mubr.bf16.vlgmr.msra.gmra.mrb[8].mxu1 %v5481_v46  ;;  %v4568_v46 = vld [vmem:[%s6499_s3 + $0x428] ss:$24 sps:$4 sm:$0xff]  }
 0x177   :  { %1916 = vmatpush1.bf16.msra.mxu1 %v4532_v21  ;;  %v4621_v21 = vld [vmem:[%s6499_s3 + $0x5d4] ss:$24 sps:$4 sm:$0xff]  }
 0x178   :  { %1917 = vmatprep.subr.bf16.mxu1 %v4540_v24  ;;  %1904 = vmatprep.subr.bf16.mxu0 %v4621_v21  ;;  %v4622_v24 = vld [vmem:[%s6499_s3 + $0x5d8] ss:$24 sps:$4 sm:$0xff]  }
 0x179   :  { %1905 = vmatpush1.bf16.msra.mxu0 %v4619_v23  ;;  %v4628_v21 = vld [vmem:[%s6499_s3 + $0x340] ss:$24 sps:$4 sm:$0xff]   ;;  %v4631_v23 = vld [vmem:[%s6499_s3 + $0x370] ss:$24 sps:$4 sm:$0xff]  }
 0x17a   :  { %1956 = vmatprep.subr.bf16.mxu0 %v4627_v25  ;;  %v4634_v25 = vld [vmem:[%s6499_s3 + $0x3a0] ss:$24 sps:$4 sm:$0xff]  }
 0x17b   :  { %1918 = vmatpush1.bf16.msra.mxu1 %v4538_v26 }
 0x17c   :  { %1919 = vmatprep.subr.bf16.mxu1 %v4546_v28 }
 0x17f   :  { %1920 = vmatpush1.bf16.msra.mxu1 %v4544_v30 }
 0x180   :  { %1921 = vmatprep.subr.bf16.mxu1 %v4552_v32 }
 0x183   :  { %1922 = vmatpush1.bf16.msra.mxu1 %v4550_v34  ;;  %v595_v34 = vld [vmem:[%s6501_s4] sm:$0x3f] }
 0x184   :  { %1923 = vmatprep.subr.bf16.mxu1 %v4558_v36  ;;  %v600_v35 = vrot.slane %v595_v34, %v5460_v54  ;;  %v604_v36 = vrot.slane %v595_v34, %v5462_v56  ;;  %v608_v41 = vrot.slane %v595_v34, %v5466_v1  ;;  %v620_v52 = vrot.slane %v595_v34, %v5474_v16 }
 0x187   :  { %1924 = vmatpush1.bf16.msra.mxu1 %v4556_v38 }
 0x188   :  { %1925 = vmatprep.subr.bf16.mxu1 %v4564_v40 }
 0x18b   :  { %1926 = vmatpush1.bf16.msra.mxu1 %v4562_v42  ;;  %v612_v42 = vrot.slane %v595_v34, %v5468_v7 }
 0x18c   :  { %1927 = vmatprep.subr.bf16.mxu1 %v4570_v44 }
 0x18f   :  { %1928 = vmatpush1.bf16.msra.mxu1 %v4568_v46 }
 0x190   :  { %1929 = vmatprep.subr.bf16.mxu1 %v4576_v48 }
 0x193   :  { %1930 = vmatpush1.bf16.msra.mxu1 %v4574_v50  ;;  %v616_v50 = vrot.slane %v595_v34, %v5472_v13  ;;  %v4651_v34 = vld [vmem:[%s6499_s3 + $0x494] ss:$24 sps:$4 sm:$0xff]  }
 0x194   :  { %1931 = vmatprep.subr.bf16.mxu1 %v4582_v53 }
 0x197   :  { %1932 = vmatpush1.bf16.msra.mxu1 %v4580_v55 }
 0x198   :  { %1933 = vmatprep.subr.bf16.mxu1 %v4588_v59 }
 0x19b   :  { %1934 = vmatpush1.bf16.msra.mxu1 %v4586_v60 }
 0x19c   :  { %1935 = vmatprep.subr.bf16.mxu1 %v4594_v63 }
 0x19f   :  { %1936 = vmatpush1.bf16.msra.mxu1 %v4592_v0 }
 0x1a0   :  { %1937 = vmatprep.subr.bf16.mxu1 %v4600_v4 }
 0x1a3   :  { %1938 = vmatpush1.bf16.msra.mxu1 %v4598_v5 }
 0x1a4   :  { %1939 = vmatprep.subr.bf16.mxu1 %v4606_v9 }
 0x1a7   :  { %1940 = vmatpush1.bf16.msra.mxu1 %v4604_v10 }
 0x1a8   :  { %1941 = vmatprep.subr.bf16.mxu1 %v4612_v14 }
 0x1ab   :  { %1942 = vmatpush1.bf16.msra.mxu1 %v4610_v15 }
 0x1ac   :  { %1943 = vmatprep.subr.bf16.mxu1 %v4618_v18  ;;  %v4625_v18 = vld [vmem:[%s6499_s3 + $0x310] ss:$24 sps:$4 sm:$0xff]  }
 0x1af   :  { %1944 = vmatpush1.bf16.msra.mxu1 %v4616_v20  ;;  %v4630_v20 = vld [vmem:[%s6499_s3 + $0x344] ss:$24 sps:$4 sm:$0xff]  }
 0x1b0   :  { %1945 = vmatprep.subr.bf16.mxu1 %v4624_v22  ;;  %v4633_v22 = vld [vmem:[%s6499_s3 + $0x374] ss:$24 sps:$4 sm:$0xff]  }
 0x1b3   :  { %1946 = vmatpush1.bf16.msra.mxu1 %v4622_v24  ;;  %v4636_v24 = vld [vmem:[%s6499_s3 + $0x3a4] ss:$24 sps:$4 sm:$0xff]  }
 0x209   :  { %v1141_v26 = vpop.f32.mrb[4].mxu1  ;;  %v1182_v27 = vpop.f32.mrb[8].mxu0 }
 0x20a   :  { %v1143_v28 = vpop.f32.mrb[5].mxu1  ;;  %v1184_v29 = vpop.f32.mrb[9].mxu0  ;;  %v1142_v37 = vadd.f32 %v1141_v26, %v600_v35  ;;  %v1183_v43 = vadd.f32 %v1182_v27, %v608_v41  ;;  %v4639_v26 = vld [vmem:[%s6499_s3 + $0x3d4] ss:$24 sps:$4 sm:$0xff]   ;;  %v4637_v27 = vld [vmem:[%s6499_s3 + $0x3d0] ss:$24 sps:$4 sm:$0xff]  }
 0x20b   :  { %v1145_v30 = vpop.f32.mrb[6].mxu1  ;;  %v1186_v31 = vpop.f32.mrb[10].mxu0  ;;  %v1144_v38 = vadd.f32 %v1143_v28, %v604_v36  ;;  %v1185_v44 = vadd.f32 %v1184_v29, %v612_v42  ;;  %v4642_v28 = vld [vmem:[%s6499_s3 + $0x404] ss:$24 sps:$4 sm:$0xff]   ;;  %v4640_v29 = vld [vmem:[%s6499_s3 + $0x400] ss:$24 sps:$4 sm:$0xff]  }
 0x20c   :  { %v1146_v32 = vpop.f32.mrb[7].mxu1  ;;  %v1187_v33 = vpop.f32.mrb[11].mxu0  ;;  %v3717_v39 = vmul.f32 -1.442695, %v1142_v37  ;;  %v3719_v45 = vmul.f32 -1.442695, %v1183_v43 }
 0x20d   :  { %v3718_v40 = vmul.f32 -1.442695, %v1144_v38  ;;  %v3720_v47 = vmul.f32 -1.442695, %v1185_v44  ;;  %v4645_v30 = vld [vmem:[%s6499_s3 + $0x434] ss:$24 sps:$4 sm:$0xff]  }
 0x20e   :  { %4985 = vpow2.f32 %v3717_v39  ;;  %v4643_v31 = vld [vmem:[%s6499_s3 + $0x430] ss:$24 sps:$4 sm:$0xff]   ;;  %v4648_v32 = vld [vmem:[%s6499_s3 + $0x464] ss:$24 sps:$4 sm:$0xff]   ;;  %v4646_v33 = vld [vmem:[%s6499_s3 + $0x460] ss:$24 sps:$4 sm:$0xff]  }
 0x20f   :  { %4987 = vpow2.f32 %v3718_v40  ;;  %v4649_v35 = vld [vmem:[%s6499_s3 + $0x490] ss:$24 sps:$4 sm:$0xff]   ;;  %v4654_v36 = vld [vmem:[%s6499_s3 + $0x4c4] ss:$24 sps:$4 sm:$0xff]   ;;  %v4652_v37 = vld [vmem:[%s6499_s3 + $0x4c0] ss:$24 sps:$4 sm:$0xff]  }
 0x210   :  { %4989 = vpow2.f32 %v3719_v45  ;;  %v4657_v38 = vld [vmem:[%s6499_s3 + $0x4f4] ss:$24 sps:$4 sm:$0xff]   ;;  %v4655_v39 = vld [vmem:[%s6499_s3 + $0x4f0] ss:$24 sps:$4 sm:$0xff]   ;;  %v4660_v40 = vld [vmem:[%s6499_s3 + $0x524] ss:$24 sps:$4 sm:$0xff]  }
 0x211   :  { %4991 = vpow2.f32 %v3720_v47  ;;  %v4658_v41 = vld [vmem:[%s6499_s3 + $0x520] ss:$24 sps:$4 sm:$0xff]   ;;  %v4663_v42 = vld [vmem:[%s6499_s3 + $0x554] ss:$24 sps:$4 sm:$0xff]   ;;  %v4661_v43 = vld [vmem:[%s6499_s3 + $0x550] ss:$24 sps:$4 sm:$0xff]  }
 0x212   :  { %v4666_v44 = vld [vmem:[%s6499_s3 + $0x584] ss:$24 sps:$4 sm:$0xff]   ;;  %v4664_v45 = vld [vmem:[%s6499_s3 + $0x580] ss:$24 sps:$4 sm:$0xff]   ;;  %v4667_v47 = vld [vmem:[%s6499_s3 + $0x5b0] ss:$24 sps:$4 sm:$0xff]  }
 0x218   :  { %v4986_v46 = vpop.eup %4985 }
 0x219   :  { %v4988_v48 = vpop.eup %4987  ;;  %v1236_v49 = vadd.f32 1.0, %v4986_v46  ;;  %v4669_v46 = vld [vmem:[%s6499_s3 + $0x5b4] ss:$24 sps:$4 sm:$0xff]  }
 0x21a   :  { %v1237_v51 = vadd.f32 1.0, %v4988_v48  ;;  %v4990_v61 = vpop.eup %4989  ;;  %v4672_v48 = vld [vmem:[%s6499_s3 + $0x5e4] ss:$24 sps:$4 sm:$0xff]  }
 0x21b   :  { %4993 = vrcp.f32 %v1236_v49  ;;  %v4992_v62 = vpop.eup %4991  ;;  %v1248_v63 = vadd.f32 1.0, %v4990_v61  ;;  %v4670_v49 = vld [vmem:[%s6499_s3 + $0x5e0] ss:$24 sps:$4 sm:$0xff]   ;;  %v4690_v61 = vld [vmem:[%s6499_s3 + $0x66c] ss:$24 sps:$4 sm:$0xff]  }
 0x21c   :  { %4995 = vrcp.f32 %v1237_v51  ;;  %v1249_v2 = vadd.f32 1.0, %v4992_v62  ;;  %v4675_v51 = vld [vmem:[%s6499_s3 + $0x604] ss:$24 sps:$4 sm:$0xff]   ;;  %v4685_v62 = vld [vmem:[%s6499_s3 + $0x660] ss:$24 sps:$4 sm:$0xff]  }
 0x21d   :  { %2641 = vmatprep.subr.bf16.mxu1 %v4675_v51  ;;  %v4760_v51 = vld [vmem:[%s6499_s3 + $0x8a8] ss:$24 sps:$4 sm:$0xff]  }
 0x225   :  { %v4994_v0 = vpop.eup %4993 }
 0x226   :  { %v4996_v3 = vpop.eup %4995 }
 0x249   :  { %v1223_v53 = vpop.f32.mrb[8].mxu1 }
 0x24a   :  { %v1224_v55 = vadd.f32 %v1223_v53, %v616_v50  ;;  %v1225_v57 = vpop.f32.mrb[9].mxu1  ;;  %v4673_v50 = vld [vmem:[%s6499_s3 + $0x600] ss:$24 sps:$4 sm:$0xff]   ;;  %v4678_v53 = vld [vmem:[%s6499_s3 + $0x60c] ss:$24 sps:$4 sm:$0xff]  }
 0x24b   :  { %v1226_v58 = vadd.f32 %v1225_v57, %v620_v52  ;;  %v1227_v59 = vpop.f32.mrb[10].mxu1  ;;  %v4676_v52 = vld [vmem:[%s6499_s3 + $0x608] ss:$24 sps:$4 sm:$0xff]   ;;  %v4684_v57 = vld [vmem:[%s6499_s3 + $0x63c] ss:$24 sps:$4 sm:$0xff]  }
 0x24c   :  { %4997 = vtanh.f32 %v1224_v55  ;;  %v1228_v60 = vpop.f32.mrb[11].mxu1  ;;  %v4681_v55 = vld [vmem:[%s6499_s3 + $0x634] ss:$24 sps:$4 sm:$0xff]   ;;  %v4682_v59 = vld [vmem:[%s6499_s3 + $0x638] ss:$24 sps:$4 sm:$0xff]  }
 0x24d   :  { %4999 = vtanh.f32 %v1226_v58  ;;  %v4679_v58 = vld [vmem:[%s6499_s3 + $0x630] ss:$24 sps:$4 sm:$0xff]   ;;  %v4687_v60 = vld [vmem:[%s6499_s3 + $0x664] ss:$24 sps:$4 sm:$0xff]  }
 0x24e   :  { %5001 = vrcp.f32 %v1248_v63  ;;  %v4688_v63 = vld [vmem:[%s6499_s3 + $0x668] ss:$24 sps:$4 sm:$0xff]  }
 0x24f   :  { %5003 = vrcp.f32 %v1249_v2  ;;  %v4696_v2 = vld [vmem:[%s6499_s3 + $0x69c] ss:$24 sps:$4 sm:$0xff]  }
 0x256   :  { %v4998_v4 = vpop.eup %4997 }
 0x257   :  { %v5000_v5 = vpop.eup %4999  ;;  %v1256_v6 = vmul.f32 %v4998_v4, %v4994_v0  ;;  %v4693_v0 = vld [vmem:[%s6499_s3 + $0x694] ss:$24 sps:$4 sm:$0xff]   ;;  %v4694_v4 = vld [vmem:[%s6499_s3 + $0x698] ss:$24 sps:$4 sm:$0xff]  }
 0x258   :  { %v1257_v8 = vmul.f32 %v5000_v5, %v4996_v3  ;;  %v5002_v9 = vpop.eup %5001  ;;  %v4691_v3 = vld [vmem:[%s6499_s3 + $0x690] ss:$24 sps:$4 sm:$0xff]   ;;  %v4699_v5 = vld [vmem:[%s6499_s3 + $0x6c4] ss:$24 sps:$4 sm:$0xff]  }
 0x259   :  { %5005 = vtanh.f32 %v1256_v6  ;;  %v5004_v10 = vpop.eup %5003  ;;  %v4702_v6 = vld [vmem:[%s6499_s3 + $0x6cc] ss:$24 sps:$4 sm:$0xff]  }
 0x25a   :  { %5007 = vtanh.f32 %v1257_v8  ;;  %v4697_v8 = vld [vmem:[%s6499_s3 + $0x6c0] ss:$24 sps:$4 sm:$0xff]  }
 0x263   :  { %v5006_v11 = vpop.eup %5005 }
 0x264   :  { %v5008_v12 = vpop.eup %5007  ;;  %v1260_v14 = vmul.f32 %v5006_v11, %v5002_v9  ;;  %v4700_v9 = vld [vmem:[%s6499_s3 + $0x6c8] ss:$24 sps:$4 sm:$0xff]   ;;  %v4708_v11 = vld [vmem:[%s6499_s3 + $0x6fc] ss:$24 sps:$4 sm:$0xff]  }
 0x265   :  { %v1261_v15 = vmul.f32 %v5008_v12, %v5004_v10  ;;  %v4705_v10 = vld [vmem:[%s6499_s3 + $0x6f4] ss:$24 sps:$4 sm:$0xff]   ;;  %v4703_v12 = vld [vmem:[%s6499_s3 + $0x6f0] ss:$24 sps:$4 sm:$0xff]  }
 0x266   :  { %v5783_v19 = vpack.c.bf16 %v1260_v14, %v1260_v14  ;;  %v4706_v14 = vld [vmem:[%s6499_s3 + $0x6f8] ss:$24 sps:$4 sm:$0xff]  }
 0x267   :  { %v1263_v17 = vpack.c.bf16 %v1261_v15, %v1261_v15  ;;  %v4711_v15 = vld [vmem:[%s6499_s3 + $0x724] ss:$24 sps:$4 sm:$0xff]  }
 0x269   :  { %1906 = vmatprep.mubr.bf16.mxu0 %v1263_v17  ;;  %1947 = vmatprep.mubr.bf16.mxu1 %v1263_v17 }
 0x26a   :  { %1907 = vmatmul.mubr.bf16.vlgmr.msra.gmra.mrb[12].mxu0 %v5783_v19  ;;  %1948 = vmatmul.mubr.bf16.vlgmr.msra.gmra.mrb[12].mxu1 %v5783_v19 }
 0x26b   :  { %1957 = vmatpush1.bf16.msra.mxu0 %v4625_v18  ;;  %1988 = vmatprep.mubr.bf16.mxu0 %v1263_v17  ;;  %v4714_v17 = vld [vmem:[%s6499_s3 + $0x72c] ss:$24 sps:$4 sm:$0xff]   ;;  %v4709_v18 = vld [vmem:[%s6499_s3 + $0x720] ss:$24 sps:$4 sm:$0xff]  }
 0x26c   :  { %1958 = vmatprep.subr.bf16.mxu0 %v4630_v20  ;;  %2642 = vmatpush1.bf16.msra.mxu1 %v4673_v50  ;;  %v4717_v20 = vld [vmem:[%s6499_s3 + $0x754] ss:$24 sps:$4 sm:$0xff]   ;;  %v4757_v50 = vld [vmem:[%s6499_s3 + $0x8a0] ss:$24 sps:$4 sm:$0xff]  }
 0x26d   :  { %2643 = vmatprep.subr.bf16.mxu1 %v4681_v55  ;;  %v4763_v55 = vld [vmem:[%s6499_s3 + $0x8d0] ss:$24 sps:$4 sm:$0xff]  }
 0x26f   :  { %1959 = vmatpush1.bf16.msra.mxu0 %v4628_v21  ;;  %v4720_v21 = vld [vmem:[%s6499_s3 + $0x75c] ss:$24 sps:$4 sm:$0xff]  }
 0x270   :  { %1960 = vmatprep.subr.bf16.mxu0 %v4633_v22  ;;  %2644 = vmatpush1.bf16.msra.mxu1 %v4679_v58  ;;  %v4715_v22 = vld [vmem:[%s6499_s3 + $0x750] ss:$24 sps:$4 sm:$0xff]   ;;  %v4771_v58 = vld [vmem:[%s6499_s3 + $0x614] ss:$24 sps:$4 sm:$0xff]  }
 0x271   :  { %2645 = vmatprep.subr.bf16.mxu1 %v4687_v60 }
 0x273   :  { %1961 = vmatpush1.bf16.msra.mxu0 %v4631_v23  ;;  %v4718_v23 = vld [vmem:[%s6499_s3 + $0x758] ss:$24 sps:$4 sm:$0xff]  }
 0x274   :  { %1962 = vmatprep.subr.bf16.mxu0 %v4636_v24  ;;  %2646 = vmatpush1.bf16.msra.mxu1 %v4685_v62  ;;  %v4723_v24 = vld [vmem:[%s6499_s3 + $0x784] ss:$24 sps:$4 sm:$0xff]  }
 0x275   :  { %2647 = vmatprep.subr.bf16.mxu1 %v4693_v0 }
 0x277   :  { %1963 = vmatpush1.bf16.msra.mxu0 %v4634_v25  ;;  %v4721_v25 = vld [vmem:[%s6499_s3 + $0x780] ss:$24 sps:$4 sm:$0xff]  }
 0x278   :  { %1964 = vmatprep.subr.bf16.mxu0 %v4639_v26  ;;  %2648 = vmatpush1.bf16.msra.mxu1 %v4691_v3  ;;  %v4726_v26 = vld [vmem:[%s6499_s3 + $0x78c] ss:$24 sps:$4 sm:$0xff]  }
 0x279   :  { %2649 = vmatprep.subr.bf16.mxu1 %v4699_v5 }
 0x27b   :  { %1965 = vmatpush1.bf16.msra.mxu0 %v4637_v27  ;;  %v4724_v27 = vld [vmem:[%s6499_s3 + $0x788] ss:$24 sps:$4 sm:$0xff]  }
 0x27c   :  { %1966 = vmatprep.subr.bf16.mxu0 %v4642_v28  ;;  %2650 = vmatpush1.bf16.msra.mxu1 %v4697_v8  ;;  %v4729_v28 = vld [vmem:[%s6499_s3 + $0x7b4] ss:$24 sps:$4 sm:$0xff]  }
 0x27d   :  { %2651 = vmatprep.subr.bf16.mxu1 %v4705_v10 }
 0x27f   :  { %1967 = vmatpush1.bf16.msra.mxu0 %v4640_v29  ;;  %v4727_v29 = vld [vmem:[%s6499_s3 + $0x7b0] ss:$24 sps:$4 sm:$0xff]  }
 0x280   :  { %1968 = vmatprep.subr.bf16.mxu0 %v4645_v30  ;;  %2652 = vmatpush1.bf16.msra.mxu1 %v4703_v12  ;;  %v4732_v30 = vld [vmem:[%s6499_s3 + $0x7bc] ss:$24 sps:$4 sm:$0xff]  }
 0x281   :  { %2653 = vmatprep.subr.bf16.mxu1 %v4711_v15 }
 0x283   :  { %1969 = vmatpush1.bf16.msra.mxu0 %v4643_v31  ;;  %v4730_v31 = vld [vmem:[%s6499_s3 + $0x7b8] ss:$24 sps:$4 sm:$0xff]  }
 0x284   :  { %1970 = vmatprep.subr.bf16.mxu0 %v4648_v32  ;;  %2654 = vmatpush1.bf16.msra.mxu1 %v4709_v18  ;;  %v4735_v32 = vld [vmem:[%s6499_s3 + $0x7e4] ss:$24 sps:$4 sm:$0xff]  }
 0x285   :  { %2655 = vmatprep.subr.bf16.mxu1 %v4717_v20 }
 0x287   :  { %1971 = vmatpush1.bf16.msra.mxu0 %v4646_v33  ;;  %v4733_v33 = vld [vmem:[%s6499_s3 + $0x7e0] ss:$24 sps:$4 sm:$0xff]  }
 0x288   :  { %1972 = vmatprep.subr.bf16.mxu0 %v4651_v34  ;;  %2656 = vmatpush1.bf16.msra.mxu1 %v4715_v22  ;;  %v4738_v34 = vld [vmem:[%s6499_s3 + $0x7ec] ss:$24 sps:$4 sm:$0xff]  }
 0x289   :  { %2657 = vmatprep.subr.bf16.mxu1 %v4723_v24 }
 0x28b   :  { %1973 = vmatpush1.bf16.msra.mxu0 %v4649_v35  ;;  %v4736_v35 = vld [vmem:[%s6499_s3 + $0x7e8] ss:$24 sps:$4 sm:$0xff]  }
 0x28c   :  { %1974 = vmatprep.subr.bf16.mxu0 %v4654_v36  ;;  %2658 = vmatpush1.bf16.msra.mxu1 %v4721_v25  ;;  %v4741_v36 = vld [vmem:[%s6499_s3 + $0x814] ss:$24 sps:$4 sm:$0xff]  }
 0x28d   :  { %2659 = vmatprep.subr.bf16.mxu1 %v4729_v28 }
 0x28f   :  { %1975 = vmatpush1.bf16.msra.mxu0 %v4652_v37  ;;  %v4739_v37 = vld [vmem:[%s6499_s3 + $0x810] ss:$24 sps:$4 sm:$0xff]  }
 0x290   :  { %1976 = vmatprep.subr.bf16.mxu0 %v4657_v38  ;;  %2660 = vmatpush1.bf16.msra.mxu1 %v4727_v29  ;;  %v4744_v38 = vld [vmem:[%s6499_s3 + $0x81c] ss:$24 sps:$4 sm:$0xff]  }
 0x291   :  { %2661 = vmatprep.subr.bf16.mxu1 %v4735_v32 }
 0x293   :  { %1977 = vmatpush1.bf16.msra.mxu0 %v4655_v39  ;;  %v4742_v39 = vld [vmem:[%s6499_s3 + $0x818] ss:$24 sps:$4 sm:$0xff]  }
 0x294   :  { %1978 = vmatprep.subr.bf16.mxu0 %v4660_v40  ;;  %2662 = vmatpush1.bf16.msra.mxu1 %v4733_v33  ;;  %v4747_v40 = vld [vmem:[%s6499_s3 + $0x844] ss:$24 sps:$4 sm:$0xff]  }
 0x295   :  { %2663 = vmatprep.subr.bf16.mxu1 %v4741_v36 }
 0x297   :  { %1979 = vmatpush1.bf16.msra.mxu0 %v4658_v41  ;;  %v4745_v41 = vld [vmem:[%s6499_s3 + $0x840] ss:$24 sps:$4 sm:$0xff]  }
 0x298   :  { %1980 = vmatprep.subr.bf16.mxu0 %v4663_v42  ;;  %2664 = vmatpush1.bf16.msra.mxu1 %v4739_v37  ;;  %v4750_v42 = vld [vmem:[%s6499_s3 + $0x84c] ss:$24 sps:$4 sm:$0xff]  }
 0x299   :  { %2665 = vmatprep.subr.bf16.mxu1 %v4747_v40 }
 0x29b   :  { %1981 = vmatpush1.bf16.msra.mxu0 %v4661_v43  ;;  %v4748_v43 = vld [vmem:[%s6499_s3 + $0x848] ss:$24 sps:$4 sm:$0xff]  }
 0x29c   :  { %1982 = vmatprep.subr.bf16.mxu0 %v4666_v44  ;;  %v4753_v44 = vld [vmem:[%s6499_s3 + $0x874] ss:$24 sps:$4 sm:$0xff]   ;;  %2666 = vmatpush1.bf16.msra.mxu1 %v4745_v41 }
 0x29d   :  { %2667 = vmatprep.subr.bf16.mxu1 %v4753_v44 }
 0x29f   :  { %1983 = vmatpush1.bf16.msra.mxu0 %v4664_v45  ;;  %v4751_v45 = vld [vmem:[%s6499_s3 + $0x870] ss:$24 sps:$4 sm:$0xff]  }
 0x2a0   :  { %1984 = vmatprep.subr.bf16.mxu0 %v4669_v46  ;;  %v4756_v46 = vld [vmem:[%s6499_s3 + $0x87c] ss:$24 sps:$4 sm:$0xff]   ;;  %2668 = vmatpush1.bf16.msra.mxu1 %v4751_v45 }
 0x2a3   :  { %1985 = vmatpush1.bf16.msra.mxu0 %v4667_v47  ;;  %v4754_v47 = vld [vmem:[%s6499_s3 + $0x878] ss:$24 sps:$4 sm:$0xff]  }
 0x2a4   :  { %1986 = vmatprep.subr.bf16.mxu0 %v4672_v48  ;;  %v4759_v48 = vld [vmem:[%s6499_s3 + $0x8a4] ss:$24 sps:$4 sm:$0xff]  }
 0x2a5   :  { %2669 = vmatprep.subr.bf16.mxu1 %v4759_v48 }
 0x2a6   :  { %2670 = vmatpush1.bf16.msra.mxu1 %v4757_v50 }
 0x2a7   :  { %1987 = vmatpush1.bf16.msra.mxu0 %v4670_v49  ;;  %v4762_v49 = vld [vmem:[%s6499_s3 + $0x8ac] ss:$24 sps:$4 sm:$0xff]  }
 0x2a8   :  { %2682 = vmatprep.subr.bf16.mxu0 %v4678_v53  ;;  %v4768_v53 = vld [vmem:[%s6499_s3 + $0x8dc] ss:$24 sps:$4 sm:$0xff]  }
 0x2aa   :  { %1989 = vmatmul.mubr.bf16.vlgmr.msra.gmra.mrb[16].mxu0 %v5783_v19  ;;  %v4712_v19 = vld [vmem:[%s6499_s3 + $0x728] ss:$24 sps:$4 sm:$0xff]  }
 0x2ab   :  { %2683 = vmatpush1.bf16.msra.mxu0 %v4676_v52  ;;  %v4765_v52 = vld [vmem:[%s6499_s3 + $0x8d4] ss:$24 sps:$4 sm:$0xff]  }
 0x2ac   :  { %2684 = vmatprep.subr.bf16.mxu0 %v4684_v57  ;;  %2671 = vmatprep.subr.bf16.mxu1 %v4765_v52  ;;  %v4766_v57 = vld [vmem:[%s6499_s3 + $0x8d8] ss:$24 sps:$4 sm:$0xff]  }
 0x2ad   :  { %2672 = vmatpush1.bf16.msra.mxu1 %v4763_v55  ;;  %v4772_v52 = vld [vmem:[%s6499_s3 + $0x640] ss:$24 sps:$4 sm:$0xff]   ;;  %v4775_v55 = vld [vmem:[%s6499_s3 + $0x670] ss:$24 sps:$4 sm:$0xff]  }
 0x2ae   :  { %2723 = vmatprep.subr.bf16.mxu1 %v4771_v58  ;;  %v4778_v58 = vld [vmem:[%s6499_s3 + $0x6a0] ss:$24 sps:$4 sm:$0xff]  }
 0x2af   :  { %2685 = vmatpush1.bf16.msra.mxu0 %v4682_v59 }
 0x2b0   :  { %2686 = vmatprep.subr.bf16.mxu0 %v4690_v61 }
 0x2b3   :  { %2687 = vmatpush1.bf16.msra.mxu0 %v4688_v63 }
 0x2b4   :  { %2688 = vmatprep.subr.bf16.mxu0 %v4696_v2 }
 0x2b7   :  { %2689 = vmatpush1.bf16.msra.mxu0 %v4694_v4  ;;  %v3817_v4 = vld [vmem:[%s6501_s4 + $0x6] sm:$0x3f] }
 0x2b8   :  { %2690 = vmatprep.subr.bf16.mxu0 %v4702_v6  ;;  %v1367_v5 = vrot.slane %v3817_v4, %v5460_v54  ;;  %v1371_v6 = vrot.slane %v3817_v4, %v5462_v56  ;;  %v1375_v12 = vrot.slane %v3817_v4, %v5466_v1  ;;  %v1387_v25 = vrot.slane %v3817_v4, %v5474_v16 }
 0x2bb   :  { %2691 = vmatpush1.bf16.msra.mxu0 %v4700_v9 }
 0x2bc   :  { %2692 = vmatprep.subr.bf16.mxu0 %v4708_v11 }
 0x2bf   :  { %2693 = vmatpush1.bf16.msra.mxu0 %v4706_v14  ;;  %v1379_v14 = vrot.slane %v3817_v4, %v5468_v7 }
 0x2c0   :  { %2694 = vmatprep.subr.bf16.mxu0 %v4714_v17 }
 0x2c3   :  { %2695 = vmatpush1.bf16.msra.mxu0 %v4712_v19 }
 0x2c4   :  { %2696 = vmatprep.subr.bf16.mxu0 %v4720_v21 }
 0x2c7   :  { %2697 = vmatpush1.bf16.msra.mxu0 %v4718_v23  ;;  %v1383_v23 = vrot.slane %v3817_v4, %v5472_v13  ;;  %v4795_v4 = vld [vmem:[%s6499_s3 + $0x794] ss:$24 sps:$4 sm:$0xff]  }
 0x2c8   :  { %2698 = vmatprep.subr.bf16.mxu0 %v4726_v26 }
 0x2cb   :  { %2699 = vmatpush1.bf16.msra.mxu0 %v4724_v27 }
 0x2cc   :  { %2700 = vmatprep.subr.bf16.mxu0 %v4732_v30 }
 0x2cf   :  { %2701 = vmatpush1.bf16.msra.mxu0 %v4730_v31 }
 0x2d0   :  { %2702 = vmatprep.subr.bf16.mxu0 %v4738_v34 }
 0x2d3   :  { %2703 = vmatpush1.bf16.msra.mxu0 %v4736_v35 }
 0x2d4   :  { %2704 = vmatprep.subr.bf16.mxu0 %v4744_v38 }
 0x2d7   :  { %2705 = vmatpush1.bf16.msra.mxu0 %v4742_v39 }
 0x2d8   :  { %2706 = vmatprep.subr.bf16.mxu0 %v4750_v42 }
 0x2db   :  { %2707 = vmatpush1.bf16.msra.mxu0 %v4748_v43 }
 0x2dc   :  { %2708 = vmatprep.subr.bf16.mxu0 %v4756_v46 }
 0x2df   :  { %2709 = vmatpush1.bf16.msra.mxu0 %v4754_v47 }
 0x2e0   :  { %2710 = vmatprep.subr.bf16.mxu0 %v4762_v49  ;;  %v4769_v49 = vld [vmem:[%s6499_s3 + $0x610] ss:$24 sps:$4 sm:$0xff]  }
 0x2e3   :  { %2711 = vmatpush1.bf16.msra.mxu0 %v4760_v51  ;;  %v4774_v51 = vld [vmem:[%s6499_s3 + $0x644] ss:$24 sps:$4 sm:$0xff]  }
 0x2e4   :  { %2712 = vmatprep.subr.bf16.mxu0 %v4768_v53  ;;  %v4777_v53 = vld [vmem:[%s6499_s3 + $0x674] ss:$24 sps:$4 sm:$0xff]  }
 0x2e7   :  { %2713 = vmatpush1.bf16.msra.mxu0 %v4766_v57  ;;  %v4780_v57 = vld [vmem:[%s6499_s3 + $0x6a4] ss:$24 sps:$4 sm:$0xff]  }
 0x33d   :  { %v1908_v59 = vpop.f32.mrb[12].mxu0  ;;  %v1949_v60 = vpop.f32.mrb[12].mxu1 }
 0x33e   :  { %v1910_v61 = vpop.f32.mrb[13].mxu0  ;;  %v1951_v62 = vpop.f32.mrb[13].mxu1  ;;  %v1909_v8 = vadd.f32 %v1908_v59, %v1367_v5  ;;  %v1950_v15 = vadd.f32 %v1949_v60, %v1375_v12  ;;  %v4783_v59 = vld [vmem:[%s6499_s3 + $0x6d4] ss:$24 sps:$4 sm:$0xff]   ;;  %v4781_v60 = vld [vmem:[%s6499_s3 + $0x6d0] ss:$24 sps:$4 sm:$0xff]  }
 0x33f   :  { %v1912_v63 = vpop.f32.mrb[14].mxu0  ;;  %v1953_v0 = vpop.f32.mrb[14].mxu1  ;;  %v1911_v9 = vadd.f32 %v1910_v61, %v1371_v6  ;;  %v1952_v17 = vadd.f32 %v1951_v62, %v1379_v14  ;;  %v4786_v61 = vld [vmem:[%s6499_s3 + $0x704] ss:$24 sps:$4 sm:$0xff]   ;;  %v4784_v62 = vld [vmem:[%s6499_s3 + $0x700] ss:$24 sps:$4 sm:$0xff]  }
 0x340   :  { %v1913_v2 = vpop.f32.mrb[15].mxu0  ;;  %v1954_v3 = vpop.f32.mrb[15].mxu1  ;;  %v3914_v10 = vmul.f32 -1.442695, %v1909_v8  ;;  %v3916_v18 = vmul.f32 -1.442695, %v1950_v15 }
 0x341   :  { %v3915_v11 = vmul.f32 -1.442695, %v1911_v9  ;;  %v3917_v20 = vmul.f32 -1.442695, %v1952_v17  ;;  %v4789_v63 = vld [vmem:[%s6499_s3 + $0x734] ss:$24 sps:$4 sm:$0xff]  }
 0x342   :  { %5009 = vpow2.f32 %v3914_v10  ;;  %v4787_v0 = vld [vmem:[%s6499_s3 + $0x730] ss:$24 sps:$4 sm:$0xff]   ;;  %v4792_v2 = vld [vmem:[%s6499_s3 + $0x764] ss:$24 sps:$4 sm:$0xff]   ;;  %v4790_v3 = vld [vmem:[%s6499_s3 + $0x760] ss:$24 sps:$4 sm:$0xff]  }
 0x343   :  { %5011 = vpow2.f32 %v3915_v11  ;;  %v4793_v5 = vld [vmem:[%s6499_s3 + $0x790] ss:$24 sps:$4 sm:$0xff]   ;;  %v4798_v6 = vld [vmem:[%s6499_s3 + $0x7c4] ss:$24 sps:$4 sm:$0xff]   ;;  %v4796_v8 = vld [vmem:[%s6499_s3 + $0x7c0] ss:$24 sps:$4 sm:$0xff]  }
 0x344   :  { %5013 = vpow2.f32 %v3916_v18  ;;  %v4801_v9 = vld [vmem:[%s6499_s3 + $0x7f4] ss:$24 sps:$4 sm:$0xff]   ;;  %v4799_v10 = vld [vmem:[%s6499_s3 + $0x7f0] ss:$24 sps:$4 sm:$0xff]   ;;  %v4804_v11 = vld [vmem:[%s6499_s3 + $0x824] ss:$24 sps:$4 sm:$0xff]  }
 0x345   :  { %5015 = vpow2.f32 %v3917_v20  ;;  %v4802_v12 = vld [vmem:[%s6499_s3 + $0x820] ss:$24 sps:$4 sm:$0xff]   ;;  %v4807_v14 = vld [vmem:[%s6499_s3 + $0x854] ss:$24 sps:$4 sm:$0xff]   ;;  %v4805_v15 = vld [vmem:[%s6499_s3 + $0x850] ss:$24 sps:$4 sm:$0xff]  }
 0x346   :  { %v4810_v17 = vld [vmem:[%s6499_s3 + $0x884] ss:$24 sps:$4 sm:$0xff]   ;;  %v4808_v18 = vld [vmem:[%s6499_s3 + $0x880] ss:$24 sps:$4 sm:$0xff]   ;;  %v4811_v20 = vld [vmem:[%s6499_s3 + $0x8b0] ss:$24 sps:$4 sm:$0xff]  }
 0x34c   :  { %v5010_v19 = vpop.eup %5009 }
 0x34d   :  { %v5012_v21 = vpop.eup %5011  ;;  %v2003_v22 = vadd.f32 1.0, %v5010_v19  ;;  %v4813_v19 = vld [vmem:[%s6499_s3 + $0x8b4] ss:$24 sps:$4 sm:$0xff]  }
 0x34e   :  { %v2004_v24 = vadd.f32 1.0, %v5012_v21  ;;  %v5014_v32 = vpop.eup %5013  ;;  %v4816_v21 = vld [vmem:[%s6499_s3 + $0x8e4] ss:$24 sps:$4 sm:$0xff]  }
 0x34f   :  { %5017 = vrcp.f32 %v2003_v22  ;;  %v5016_v33 = vpop.eup %5015  ;;  %v2015_v34 = vadd.f32 1.0, %v5014_v32  ;;  %v4814_v22 = vld [vmem:[%s6499_s3 + $0x8e0] ss:$24 sps:$4 sm:$0xff]   ;;  %v4834_v32 = vld [vmem:[%s6499_s3 + $0x96c] ss:$24 sps:$4 sm:$0xff]  }
 0x350   :  { %5019 = vrcp.f32 %v2004_v24  ;;  %v2016_v36 = vadd.f32 1.0, %v5016_v33  ;;  %v4819_v24 = vld [vmem:[%s6499_s3 + $0x904] ss:$24 sps:$4 sm:$0xff]   ;;  %v4829_v33 = vld [vmem:[%s6499_s3 + $0x960] ss:$24 sps:$4 sm:$0xff]  }
 0x351   :  { %3408 = vmatprep.subr.bf16.mxu0 %v4819_v24  ;;  %v4904_v24 = vld [vmem:[%s6499_s3 + $0xba8] ss:$24 sps:$4 sm:$0xff]  }
 0x359   :  { %v5018_v35 = vpop.eup %5017 }
 0x35a   :  { %v5020_v37 = vpop.eup %5019 }
 0x37d   :  { %v1990_v26 = vpop.f32.mrb[16].mxu0 }
 0x37e   :  { %v1991_v27 = vadd.f32 %v1990_v26, %v1383_v23  ;;  %v1992_v28 = vpop.f32.mrb[17].mxu0  ;;  %v4817_v23 = vld [vmem:[%s6499_s3 + $0x900] ss:$24 sps:$4 sm:$0xff]   ;;  %v4822_v26 = vld [vmem:[%s6499_s3 + $0x90c] ss:$24 sps:$4 sm:$0xff]  }
 0x37f   :  { %v1993_v29 = vadd.f32 %v1992_v28, %v1387_v25  ;;  %v1994_v30 = vpop.f32.mrb[18].mxu0  ;;  %v4820_v25 = vld [vmem:[%s6499_s3 + $0x908] ss:$24 sps:$4 sm:$0xff]   ;;  %v4828_v28 = vld [vmem:[%s6499_s3 + $0x93c] ss:$24 sps:$4 sm:$0xff]  }
 0x380   :  { %5021 = vtanh.f32 %v1991_v27  ;;  %v1995_v31 = vpop.f32.mrb[19].mxu0  ;;  %v4825_v27 = vld [vmem:[%s6499_s3 + $0x934] ss:$24 sps:$4 sm:$0xff]   ;;  %v4826_v30 = vld [vmem:[%s6499_s3 + $0x938] ss:$24 sps:$4 sm:$0xff]  }
 0x381   :  { %5023 = vtanh.f32 %v1993_v29  ;;  %v4823_v29 = vld [vmem:[%s6499_s3 + $0x930] ss:$24 sps:$4 sm:$0xff]   ;;  %v4831_v31 = vld [vmem:[%s6499_s3 + $0x964] ss:$24 sps:$4 sm:$0xff]  }
 0x382   :  { %5025 = vrcp.f32 %v2015_v34  ;;  %v4832_v34 = vld [vmem:[%s6499_s3 + $0x968] ss:$24 sps:$4 sm:$0xff]  }
 0x383   :  { %5027 = vrcp.f32 %v2016_v36  ;;  %v4840_v36 = vld [vmem:[%s6499_s3 + $0x99c] ss:$24 sps:$4 sm:$0xff]  }
 0x38a   :  { %v5022_v38 = vpop.eup %5021 }
 0x38b   :  { %v5024_v39 = vpop.eup %5023  ;;  %v2023_v40 = vmul.f32 %v5022_v38, %v5018_v35  ;;  %v4837_v35 = vld [vmem:[%s6499_s3 + $0x994] ss:$24 sps:$4 sm:$0xff]   ;;  %v4838_v38 = vld [vmem:[%s6499_s3 + $0x998] ss:$24 sps:$4 sm:$0xff]  }
 0x38c   :  { %v2024_v41 = vmul.f32 %v5024_v39, %v5020_v37  ;;  %v5026_v42 = vpop.eup %5025  ;;  %v4835_v37 = vld [vmem:[%s6499_s3 + $0x990] ss:$24 sps:$4 sm:$0xff]   ;;  %v4843_v39 = vld [vmem:[%s6499_s3 + $0x9c4] ss:$24 sps:$4 sm:$0xff]  }
 0x38d   :  { %5029 = vtanh.f32 %v2023_v40  ;;  %v5028_v43 = vpop.eup %5027  ;;  %v4846_v40 = vld [vmem:[%s6499_s3 + $0x9cc] ss:$24 sps:$4 sm:$0xff]  }
 0x38e   :  { %5031 = vtanh.f32 %v2024_v41  ;;  %v4841_v41 = vld [vmem:[%s6499_s3 + $0x9c0] ss:$24 sps:$4 sm:$0xff]  }
 0x397   :  { %v5030_v44 = vpop.eup %5029 }
 0x398   :  { %v5032_v45 = vpop.eup %5031  ;;  %v2027_v46 = vmul.f32 %v5030_v44, %v5026_v42  ;;  %v4844_v42 = vld [vmem:[%s6499_s3 + $0x9c8] ss:$24 sps:$4 sm:$0xff]   ;;  %v4852_v44 = vld [vmem:[%s6499_s3 + $0x9fc] ss:$24 sps:$4 sm:$0xff]  }
 0x399   :  { %v2028_v47 = vmul.f32 %v5032_v45, %v5028_v43  ;;  %v4849_v43 = vld [vmem:[%s6499_s3 + $0x9f4] ss:$24 sps:$4 sm:$0xff]   ;;  %v4847_v45 = vld [vmem:[%s6499_s3 + $0x9f0] ss:$24 sps:$4 sm:$0xff]  }
 0x39a   :  { %v6085_v50 = vpack.c.bf16 %v2027_v46, %v2027_v46  ;;  %v4850_v46 = vld [vmem:[%s6499_s3 + $0x9f8] ss:$24 sps:$4 sm:$0xff]  }
 0x39b   :  { %v2030_v48 = vpack.c.bf16 %v2028_v47, %v2028_v47  ;;  %v4855_v47 = vld [vmem:[%s6499_s3 + $0xa24] ss:$24 sps:$4 sm:$0xff]  }
 0x39d   :  { %2673 = vmatprep.mubr.bf16.mxu1 %v2030_v48  ;;  %2714 = vmatprep.mubr.bf16.mxu0 %v2030_v48 }
 0x39e   :  { %2674 = vmatmul.mubr.bf16.vlgmr.msra.gmra.mrb[16].mxu1 %v6085_v50  ;;  %2715 = vmatmul.mubr.bf16.vlgmr.msra.gmra.mrb[20].mxu0 %v6085_v50 }
 0x39f   :  { %2724 = vmatpush1.bf16.msra.mxu1 %v4769_v49  ;;  %2755 = vmatprep.mubr.bf16.mxu1 %v2030_v48  ;;  %v4858_v48 = vld [vmem:[%s6499_s3 + $0xa2c] ss:$24 sps:$4 sm:$0xff]   ;;  %v4853_v49 = vld [vmem:[%s6499_s3 + $0xa20] ss:$24 sps:$4 sm:$0xff]  }
 0x3a0   :  { %2725 = vmatprep.subr.bf16.mxu1 %v4774_v51  ;;  %3409 = vmatpush1.bf16.msra.mxu0 %v4817_v23  ;;  %v4861_v51 = vld [vmem:[%s6499_s3 + $0xa54] ss:$24 sps:$4 sm:$0xff]   ;;  %v4901_v23 = vld [vmem:[%s6499_s3 + $0xba0] ss:$24 sps:$4 sm:$0xff]  }
 0x3a1   :  { %3410 = vmatprep.subr.bf16.mxu0 %v4825_v27  ;;  %v4907_v27 = vld [vmem:[%s6499_s3 + $0xbd0] ss:$24 sps:$4 sm:$0xff]  }
 0x3a3   :  { %2726 = vmatpush1.bf16.msra.mxu1 %v4772_v52  ;;  %v4864_v52 = vld [vmem:[%s6499_s3 + $0xa5c] ss:$24 sps:$4 sm:$0xff]  }
 0x3a4   :  { %2727 = vmatprep.subr.bf16.mxu1 %v4777_v53  ;;  %3411 = vmatpush1.bf16.msra.mxu0 %v4823_v29  ;;  %v4859_v53 = vld [vmem:[%s6499_s3 + $0xa50] ss:$24 sps:$4 sm:$0xff]   ;;  %v4915_v29 = vld [vmem:[%s6499_s3 + $0x914] ss:$24 sps:$4 sm:$0xff]  }
 0x3a5   :  { %3412 = vmatprep.subr.bf16.mxu0 %v4831_v31 }
 0x3a7   :  { %2728 = vmatpush1.bf16.msra.mxu1 %v4775_v55  ;;  %v4862_v55 = vld [vmem:[%s6499_s3 + $0xa58] ss:$24 sps:$4 sm:$0xff]  }
 0x3a8   :  { %2729 = vmatprep.subr.bf16.mxu1 %v4780_v57  ;;  %3413 = vmatpush1.bf16.msra.mxu0 %v4829_v33  ;;  %v4867_v57 = vld [vmem:[%s6499_s3 + $0xa84] ss:$24 sps:$4 sm:$0xff]  }
 0x3a9   :  { %3414 = vmatprep.subr.bf16.mxu0 %v4837_v35 }
 0x3ab   :  { %2730 = vmatpush1.bf16.msra.mxu1 %v4778_v58  ;;  %v4865_v58 = vld [vmem:[%s6499_s3 + $0xa80] ss:$24 sps:$4 sm:$0xff]  }
 0x3ac   :  { %2731 = vmatprep.subr.bf16.mxu1 %v4783_v59  ;;  %3415 = vmatpush1.bf16.msra.mxu0 %v4835_v37  ;;  %v4870_v59 = vld [vmem:[%s6499_s3 + $0xa8c] ss:$24 sps:$4 sm:$0xff]  }
 0x3ad   :  { %3416 = vmatprep.subr.bf16.mxu0 %v4843_v39 }
 0x3af   :  { %2732 = vmatpush1.bf16.msra.mxu1 %v4781_v60  ;;  %v4868_v60 = vld [vmem:[%s6499_s3 + $0xa88] ss:$24 sps:$4 sm:$0xff]  }
 0x3b0   :  { %2733 = vmatprep.subr.bf16.mxu1 %v4786_v61  ;;  %3417 = vmatpush1.bf16.msra.mxu0 %v4841_v41  ;;  %v4873_v61 = vld [vmem:[%s6499_s3 + $0xab4] ss:$24 sps:$4 sm:$0xff]  }
 0x3b1   :  { %3418 = vmatprep.subr.bf16.mxu0 %v4849_v43 }
 0x3b3   :  { %2734 = vmatpush1.bf16.msra.mxu1 %v4784_v62  ;;  %v4871_v62 = vld [vmem:[%s6499_s3 + $0xab0] ss:$24 sps:$4 sm:$0xff]  }
 0x3b4   :  { %2735 = vmatprep.subr.bf16.mxu1 %v4789_v63  ;;  %3419 = vmatpush1.bf16.msra.mxu0 %v4847_v45  ;;  %v4876_v63 = vld [vmem:[%s6499_s3 + $0xabc] ss:$24 sps:$4 sm:$0xff]  }
 0x3b5   :  { %3420 = vmatprep.subr.bf16.mxu0 %v4855_v47 }
 0x3b7   :  { %2736 = vmatpush1.bf16.msra.mxu1 %v4787_v0  ;;  %v4874_v0 = vld [vmem:[%s6499_s3 + $0xab8] ss:$24 sps:$4 sm:$0xff]  }
 0x3b8   :  { %2737 = vmatprep.subr.bf16.mxu1 %v4792_v2  ;;  %3421 = vmatpush1.bf16.msra.mxu0 %v4853_v49  ;;  %v4879_v2 = vld [vmem:[%s6499_s3 + $0xae4] ss:$24 sps:$4 sm:$0xff]  }
 0x3b9   :  { %3422 = vmatprep.subr.bf16.mxu0 %v4861_v51 }
 0x3bb   :  { %2738 = vmatpush1.bf16.msra.mxu1 %v4790_v3  ;;  %v4877_v3 = vld [vmem:[%s6499_s3 + $0xae0] ss:$24 sps:$4 sm:$0xff]  }
 0x3bc   :  { %2739 = vmatprep.subr.bf16.mxu1 %v4795_v4  ;;  %3423 = vmatpush1.bf16.msra.mxu0 %v4859_v53  ;;  %v4882_v4 = vld [vmem:[%s6499_s3 + $0xaec] ss:$24 sps:$4 sm:$0xff]  }
 0x3bd   :  { %3424 = vmatprep.subr.bf16.mxu0 %v4867_v57 }
 0x3bf   :  { %2740 = vmatpush1.bf16.msra.mxu1 %v4793_v5  ;;  %v4880_v5 = vld [vmem:[%s6499_s3 + $0xae8] ss:$24 sps:$4 sm:$0xff]  }
 0x3c0   :  { %2741 = vmatprep.subr.bf16.mxu1 %v4798_v6  ;;  %3425 = vmatpush1.bf16.msra.mxu0 %v4865_v58  ;;  %v4885_v6 = vld [vmem:[%s6499_s3 + $0xb14] ss:$24 sps:$4 sm:$0xff]  }
 0x3c1   :  { %3426 = vmatprep.subr.bf16.mxu0 %v4873_v61 }
 0x3c3   :  { %2742 = vmatpush1.bf16.msra.mxu1 %v4796_v8  ;;  %v4883_v8 = vld [vmem:[%s6499_s3 + $0xb10] ss:$24 sps:$4 sm:$0xff]  }
 0x3c4   :  { %2743 = vmatprep.subr.bf16.mxu1 %v4801_v9  ;;  %3427 = vmatpush1.bf16.msra.mxu0 %v4871_v62  ;;  %v4888_v9 = vld [vmem:[%s6499_s3 + $0xb1c] ss:$24 sps:$4 sm:$0xff]  }
 0x3c5   :  { %3428 = vmatprep.subr.bf16.mxu0 %v4879_v2 }
 0x3c7   :  { %2744 = vmatpush1.bf16.msra.mxu1 %v4799_v10  ;;  %v4886_v10 = vld [vmem:[%s6499_s3 + $0xb18] ss:$24 sps:$4 sm:$0xff]  }
 0x3c8   :  { %2745 = vmatprep.subr.bf16.mxu1 %v4804_v11  ;;  %3429 = vmatpush1.bf16.msra.mxu0 %v4877_v3  ;;  %v4891_v11 = vld [vmem:[%s6499_s3 + $0xb44] ss:$24 sps:$4 sm:$0xff]  }
 0x3c9   :  { %3430 = vmatprep.subr.bf16.mxu0 %v4885_v6 }
 0x3cb   :  { %2746 = vmatpush1.bf16.msra.mxu1 %v4802_v12  ;;  %v4889_v12 = vld [vmem:[%s6499_s3 + $0xb40] ss:$24 sps:$4 sm:$0xff]  }
 0x3cc   :  { %2747 = vmatprep.subr.bf16.mxu1 %v4807_v14  ;;  %3431 = vmatpush1.bf16.msra.mxu0 %v4883_v8  ;;  %v4894_v14 = vld [vmem:[%s6499_s3 + $0xb4c] ss:$24 sps:$4 sm:$0xff]  }
 0x3cd   :  { %3432 = vmatprep.subr.bf16.mxu0 %v4891_v11 }
 0x3cf   :  { %2748 = vmatpush1.bf16.msra.mxu1 %v4805_v15  ;;  %v4892_v15 = vld [vmem:[%s6499_s3 + $0xb48] ss:$24 sps:$4 sm:$0xff]  }
 0x3d0   :  { %2749 = vmatprep.subr.bf16.mxu1 %v4810_v17  ;;  %v4897_v17 = vld [vmem:[%s6499_s3 + $0xb74] ss:$24 sps:$4 sm:$0xff]   ;;  %3433 = vmatpush1.bf16.msra.mxu0 %v4889_v12 }
 0x3d1   :  { %3434 = vmatprep.subr.bf16.mxu0 %v4897_v17 }
 0x3d3   :  { %2750 = vmatpush1.bf16.msra.mxu1 %v4808_v18  ;;  %v4895_v18 = vld [vmem:[%s6499_s3 + $0xb70] ss:$24 sps:$4 sm:$0xff]  }
 0x3d4   :  { %2751 = vmatprep.subr.bf16.mxu1 %v4813_v19  ;;  %v4900_v19 = vld [vmem:[%s6499_s3 + $0xb7c] ss:$24 sps:$4 sm:$0xff]   ;;  %3435 = vmatpush1.bf16.msra.mxu0 %v4895_v18 }
 0x3d7   :  { %2752 = vmatpush1.bf16.msra.mxu1 %v4811_v20  ;;  %v4898_v20 = vld [vmem:[%s6499_s3 + $0xb78] ss:$24 sps:$4 sm:$0xff]  }
 0x3d8   :  { %2753 = vmatprep.subr.bf16.mxu1 %v4816_v21  ;;  %v4903_v21 = vld [vmem:[%s6499_s3 + $0xba4] ss:$24 sps:$4 sm:$0xff]  }
 0x3d9   :  { %3436 = vmatprep.subr.bf16.mxu0 %v4903_v21 }
 0x3da   :  { %3437 = vmatpush1.bf16.msra.mxu0 %v4901_v23 }
 0x3db   :  { %2754 = vmatpush1.bf16.msra.mxu1 %v4814_v22  ;;  %v4906_v22 = vld [vmem:[%s6499_s3 + $0xbac] ss:$24 sps:$4 sm:$0xff]  }
 0x3dc   :  { %3449 = vmatprep.subr.bf16.mxu1 %v4822_v26  ;;  %v4912_v26 = vld [vmem:[%s6499_s3 + $0xbdc] ss:$24 sps:$4 sm:$0xff]  }
 0x3de   :  { %2756 = vmatmul.mubr.bf16.vlgmr.msra.gmra.mrb[20].mxu1 %v6085_v50  ;;  %v4856_v50 = vld [vmem:[%s6499_s3 + $0xa28] ss:$24 sps:$4 sm:$0xff]  }
 0x3df   :  { %3450 = vmatpush1.bf16.msra.mxu1 %v4820_v25  ;;  %v4909_v25 = vld [vmem:[%s6499_s3 + $0xbd4] ss:$24 sps:$4 sm:$0xff]  }
 0x3e0   :  { %3451 = vmatprep.subr.bf16.mxu1 %v4828_v28  ;;  %3438 = vmatprep.subr.bf16.mxu0 %v4909_v25  ;;  %v4910_v28 = vld [vmem:[%s6499_s3 + $0xbd8] ss:$24 sps:$4 sm:$0xff]  }
 0x3e1   :  { %3439 = vmatpush1.bf16.msra.mxu0 %v4907_v27  ;;  %v4916_v25 = vld [vmem:[%s6499_s3 + $0x940] ss:$24 sps:$4 sm:$0xff]   ;;  %v4919_v27 = vld [vmem:[%s6499_s3 + $0x970] ss:$24 sps:$4 sm:$0xff]  }
 0x3e2   :  { %3490 = vmatprep.subr.bf16.mxu0 %v4915_v29  ;;  %v4922_v29 = vld [vmem:[%s6499_s3 + $0x9a0] ss:$24 sps:$4 sm:$0xff]  }
 0x3e3   :  { %3452 = vmatpush1.bf16.msra.mxu1 %v4826_v30 }
 0x3e4   :  { %3453 = vmatprep.subr.bf16.mxu1 %v4834_v32 }
 0x3e7   :  { %3454 = vmatpush1.bf16.msra.mxu1 %v4832_v34 }
 0x3e8   :  { %3455 = vmatprep.subr.bf16.mxu1 %v4840_v36 }
 0x3eb   :  { %3456 = vmatpush1.bf16.msra.mxu1 %v4838_v38  ;;  %v4014_v38 = vld [vmem:[%s6501_s4 + $0xc] sm:$0x3f] }
 0x3ec   :  { %3457 = vmatprep.subr.bf16.mxu1 %v4846_v40  ;;  %v2134_v39 = vrot.slane %v4014_v38, %v5460_v54  ;;  %v2138_v40 = vrot.slane %v4014_v38, %v5462_v56  ;;  %v2142_v45 = vrot.slane %v4014_v38, %v5466_v1  ;;  %v2154_v58 = vrot.slane %v4014_v38, %v5474_v16 }
 0x3ef   :  { %3458 = vmatpush1.bf16.msra.mxu1 %v4844_v42 }
 0x3f0   :  { %3459 = vmatprep.subr.bf16.mxu1 %v4852_v44 }
 0x3f3   :  { %3460 = vmatpush1.bf16.msra.mxu1 %v4850_v46  ;;  %v2146_v46 = vrot.slane %v4014_v38, %v5468_v7 }
 0x3f4   :  { %3461 = vmatprep.subr.bf16.mxu1 %v4858_v48 }
 0x3f7   :  { %3462 = vmatpush1.bf16.msra.mxu1 %v4856_v50 }
 0x3f8   :  { %3463 = vmatprep.subr.bf16.mxu1 %v4864_v52 }
 0x3fb   :  { %3464 = vmatpush1.bf16.msra.mxu1 %v4862_v55  ;;  %v2150_v55 = vrot.slane %v4014_v38, %v5472_v13  ;;  %v4939_v38 = vld [vmem:[%s6499_s3 + $0xa94] ss:$24 sps:$4 sm:$0xff]  }
 0x3fc   :  { %3465 = vmatprep.subr.bf16.mxu1 %v4870_v59 }
 0x3ff   :  { %3466 = vmatpush1.bf16.msra.mxu1 %v4868_v60 }
 0x400   :  { %3467 = vmatprep.subr.bf16.mxu1 %v4876_v63 }
 0x403   :  { %3468 = vmatpush1.bf16.msra.mxu1 %v4874_v0 }
 0x404   :  { %3469 = vmatprep.subr.bf16.mxu1 %v4882_v4 }
 0x407   :  { %3470 = vmatpush1.bf16.msra.mxu1 %v4880_v5 }
 0x408   :  { %3471 = vmatprep.subr.bf16.mxu1 %v4888_v9 }
 0x40b   :  { %3472 = vmatpush1.bf16.msra.mxu1 %v4886_v10 }
 0x40c   :  { %3473 = vmatprep.subr.bf16.mxu1 %v4894_v14 }
 0x40f   :  { %3474 = vmatpush1.bf16.msra.mxu1 %v4892_v15 }
 0x410   :  { %3475 = vmatprep.subr.bf16.mxu1 %v4900_v19 }
 0x413   :  { %3476 = vmatpush1.bf16.msra.mxu1 %v4898_v20 }
 0x414   :  { %3477 = vmatprep.subr.bf16.mxu1 %v4906_v22  ;;  %v4913_v22 = vld [vmem:[%s6499_s3 + $0x910] ss:$24 sps:$4 sm:$0xff]  }
 0x417   :  { %3478 = vmatpush1.bf16.msra.mxu1 %v4904_v24  ;;  %v4918_v24 = vld [vmem:[%s6499_s3 + $0x944] ss:$24 sps:$4 sm:$0xff]  }
 0x418   :  { %3479 = vmatprep.subr.bf16.mxu1 %v4912_v26  ;;  %v4921_v26 = vld [vmem:[%s6499_s3 + $0x974] ss:$24 sps:$4 sm:$0xff]  }
 0x41b   :  { %3480 = vmatpush1.bf16.msra.mxu1 %v4910_v28  ;;  %v4924_v28 = vld [vmem:[%s6499_s3 + $0x9a4] ss:$24 sps:$4 sm:$0xff]  }
 0x471   :  { %v2675_v30 = vpop.f32.mrb[16].mxu1  ;;  %v2716_v31 = vpop.f32.mrb[20].mxu0 }
 0x472   :  { %v2677_v32 = vpop.f32.mrb[17].mxu1  ;;  %v2718_v33 = vpop.f32.mrb[21].mxu0  ;;  %v2676_v41 = vadd.f32 %v2675_v30, %v2134_v39  ;;  %v2717_v47 = vadd.f32 %v2716_v31, %v2142_v45  ;;  %v4927_v30 = vld [vmem:[%s6499_s3 + $0x9d4] ss:$24 sps:$4 sm:$0xff]   ;;  %v4925_v31 = vld [vmem:[%s6499_s3 + $0x9d0] ss:$24 sps:$4 sm:$0xff]  }
 0x473   :  { %v2679_v34 = vpop.f32.mrb[18].mxu1  ;;  %v2720_v35 = vpop.f32.mrb[22].mxu0  ;;  %v2678_v42 = vadd.f32 %v2677_v32, %v2138_v40  ;;  %v2719_v48 = vadd.f32 %v2718_v33, %v2146_v46  ;;  %v4930_v32 = vld [vmem:[%s6499_s3 + $0xa04] ss:$24 sps:$4 sm:$0xff]   ;;  %v4928_v33 = vld [vmem:[%s6499_s3 + $0xa00] ss:$24 sps:$4 sm:$0xff]  }
 0x474   :  { %v2680_v36 = vpop.f32.mrb[19].mxu1  ;;  %v2721_v37 = vpop.f32.mrb[23].mxu0  ;;  %v4111_v43 = vmul.f32 -1.442695, %v2676_v41  ;;  %v4113_v49 = vmul.f32 -1.442695, %v2717_v47 }
 0x475   :  { %v4112_v44 = vmul.f32 -1.442695, %v2678_v42  ;;  %v4114_v51 = vmul.f32 -1.442695, %v2719_v48  ;;  %v4933_v34 = vld [vmem:[%s6499_s3 + $0xa34] ss:$24 sps:$4 sm:$0xff]  }
 0x476   :  { %5033 = vpow2.f32 %v4111_v43  ;;  %v4931_v35 = vld [vmem:[%s6499_s3 + $0xa30] ss:$24 sps:$4 sm:$0xff]   ;;  %v4936_v36 = vld [vmem:[%s6499_s3 + $0xa64] ss:$24 sps:$4 sm:$0xff]   ;;  %v4934_v37 = vld [vmem:[%s6499_s3 + $0xa60] ss:$24 sps:$4 sm:$0xff]  }
 0x477   :  { %5035 = vpow2.f32 %v4112_v44  ;;  %v4937_v39 = vld [vmem:[%s6499_s3 + $0xa90] ss:$24 sps:$4 sm:$0xff]   ;;  %v4942_v40 = vld [vmem:[%s6499_s3 + $0xac4] ss:$24 sps:$4 sm:$0xff]   ;;  %v4940_v41 = vld [vmem:[%s6499_s3 + $0xac0] ss:$24 sps:$4 sm:$0xff]  }
 0x478   :  { %5037 = vpow2.f32 %v4113_v49  ;;  %v4945_v42 = vld [vmem:[%s6499_s3 + $0xaf4] ss:$24 sps:$4 sm:$0xff]   ;;  %v4943_v43 = vld [vmem:[%s6499_s3 + $0xaf0] ss:$24 sps:$4 sm:$0xff]   ;;  %v4948_v44 = vld [vmem:[%s6499_s3 + $0xb24] ss:$24 sps:$4 sm:$0xff]  }
 0x479   :  { %5039 = vpow2.f32 %v4114_v51  ;;  %v4946_v45 = vld [vmem:[%s6499_s3 + $0xb20] ss:$24 sps:$4 sm:$0xff]   ;;  %v4951_v46 = vld [vmem:[%s6499_s3 + $0xb54] ss:$24 sps:$4 sm:$0xff]   ;;  %v4949_v47 = vld [vmem:[%s6499_s3 + $0xb50] ss:$24 sps:$4 sm:$0xff]  }
 0x47a   :  { %v4954_v48 = vld [vmem:[%s6499_s3 + $0xb84] ss:$24 sps:$4 sm:$0xff]   ;;  %v4952_v49 = vld [vmem:[%s6499_s3 + $0xb80] ss:$24 sps:$4 sm:$0xff]   ;;  %v4955_v51 = vld [vmem:[%s6499_s3 + $0xbb0] ss:$24 sps:$4 sm:$0xff]  }
 0x480   :  { %v5034_v50 = vpop.eup %5033 }
 0x481   :  { %v5036_v52 = vpop.eup %5035  ;;  %v2770_v53 = vadd.f32 1.0, %v5034_v50  ;;  %v4957_v50 = vld [vmem:[%s6499_s3 + $0xbb4] ss:$24 sps:$4 sm:$0xff]  }
 0x482   :  { %v2771_v57 = vadd.f32 1.0, %v5036_v52  ;;  %v5038_v2 = vpop.eup %5037  ;;  %v4960_v52 = vld [vmem:[%s6499_s3 + $0xbe4] ss:$24 sps:$4 sm:$0xff]  }
 0x483   :  { %5041 = vrcp.f32 %v2770_v53  ;;  %v5040_v3 = vpop.eup %5039  ;;  %v2782_v4 = vadd.f32 1.0, %v5038_v2  ;;  %v4958_v53 = vld [vmem:[%s6499_s3 + $0xbe0] ss:$24 sps:$4 sm:$0xff]  }
 0x484   :  { %5043 = vrcp.f32 %v2771_v57  ;;  %v2783_v6 = vadd.f32 1.0, %v5040_v3 }
 0x48d   :  { %v5042_v5 = vpop.eup %5041 }
 0x48e   :  { %v5044_v8 = vpop.eup %5043 }
 0x4b1   :  { %v2757_v59 = vpop.f32.mrb[20].mxu1 }
 0x4b2   :  { %v2758_v60 = vadd.f32 %v2757_v59, %v2150_v55  ;;  %v2759_v61 = vpop.f32.mrb[21].mxu1 }
 0x4b3   :  { %v2760_v62 = vadd.f32 %v2759_v61, %v2154_v58  ;;  %v2761_v63 = vpop.f32.mrb[22].mxu1 }
 0x4b4   :  { %5045 = vtanh.f32 %v2758_v60  ;;  %v2762_v0 = vpop.f32.mrb[23].mxu1 }
 0x4b5   :  { %5047 = vtanh.f32 %v2760_v62  ;;  %v4211_v0 = vld [vmem:[%s6501_s4 + $0x12] sm:$0x3f] }
 0x4b6   :  { %5049 = vrcp.f32 %v2782_v4  ;;  %v2901_v2 = vrot.slane %v4211_v0, %v5460_v54  ;;  %v2905_v3 = vrot.slane %v4211_v0, %v5462_v56  ;;  %v2917_v54 = vrot.slane %v4211_v0, %v5472_v13 }
 0x4b7   :  { %5051 = vrcp.f32 %v2783_v6 }
 0x4be   :  { %v5046_v9 = vpop.eup %5045 }
 0x4bf   :  { %v5048_v10 = vpop.eup %5047  ;;  %v2790_v11 = vmul.f32 %v5046_v9, %v5042_v5  ;;  %v2909_v9 = vrot.slane %v4211_v0, %v5466_v1 }
 0x4c0   :  { %v2791_v12 = vmul.f32 %v5048_v10, %v5044_v8  ;;  %v5050_v14 = vpop.eup %5049  ;;  %v2913_v10 = vrot.slane %v4211_v0, %v5468_v7 }
 0x4c1   :  { %5053 = vtanh.f32 %v2790_v11  ;;  %v5052_v15 = vpop.eup %5051 }
 0x4c2   :  { %5055 = vtanh.f32 %v2791_v12 }
 0x4cb   :  { %v5054_v17 = vpop.eup %5053 }
 0x4cc   :  { %v5056_v18 = vpop.eup %5055  ;;  %v2794_v19 = vmul.f32 %v5054_v17, %v5050_v14 }
 0x4cd   :  { %v2795_v20 = vmul.f32 %v5056_v18, %v5052_v15 }
 0x4ce   :  { %v6387_v23 = vpack.c.bf16 %v2794_v19, %v2794_v19 }
 0x4cf   :  { %v2797_v21 = vpack.c.bf16 %v2795_v20, %v2795_v20  ;;  %v2921_v20 = vrot.slane %v4211_v0, %v5474_v16 }
 0x4d1   :  { %3440 = vmatprep.mubr.bf16.mxu0 %v2797_v21  ;;  %3481 = vmatprep.mubr.bf16.mxu1 %v2797_v21 }
 0x4d2   :  { %3441 = vmatmul.mubr.bf16.vlgmr.msra.gmra.mrb[24].mxu0 %v6387_v23  ;;  %3482 = vmatmul.mubr.bf16.vlgmr.msra.gmra.mrb[24].mxu1 %v6387_v23 }
 0x4d3   :  { %3491 = vmatpush1.bf16.msra.mxu0 %v4913_v22  ;;  %3522 = vmatprep.mubr.bf16.mxu0 %v2797_v21 }
 0x4d4   :  { %3492 = vmatprep.subr.bf16.mxu0 %v4918_v24 }
 0x4d7   :  { %3493 = vmatpush1.bf16.msra.mxu0 %v4916_v25 }
 0x4d8   :  { %3494 = vmatprep.subr.bf16.mxu0 %v4921_v26 }
 0x4db   :  { %3495 = vmatpush1.bf16.msra.mxu0 %v4919_v27 }
 0x4dc   :  { %3496 = vmatprep.subr.bf16.mxu0 %v4924_v28 }
 0x4df   :  { %3497 = vmatpush1.bf16.msra.mxu0 %v4922_v29 }
 0x4e0   :  { %3498 = vmatprep.subr.bf16.mxu0 %v4927_v30 }
 0x4e3   :  { %3499 = vmatpush1.bf16.msra.mxu0 %v4925_v31 }
 0x4e4   :  { %3500 = vmatprep.subr.bf16.mxu0 %v4930_v32 }
 0x4e7   :  { %3501 = vmatpush1.bf16.msra.mxu0 %v4928_v33 }
 0x4e8   :  { %3502 = vmatprep.subr.bf16.mxu0 %v4933_v34 }
 0x4eb   :  { %3503 = vmatpush1.bf16.msra.mxu0 %v4931_v35 }
 0x4ec   :  { %3504 = vmatprep.subr.bf16.mxu0 %v4936_v36 }
 0x4ef   :  { %3505 = vmatpush1.bf16.msra.mxu0 %v4934_v37 }
 0x4f0   :  { %3506 = vmatprep.subr.bf16.mxu0 %v4939_v38 }
 0x4f3   :  { %3507 = vmatpush1.bf16.msra.mxu0 %v4937_v39 }
 0x4f4   :  { %3508 = vmatprep.subr.bf16.mxu0 %v4942_v40 }
 0x4f7   :  { %3509 = vmatpush1.bf16.msra.mxu0 %v4940_v41 }
 0x4f8   :  { %3510 = vmatprep.subr.bf16.mxu0 %v4945_v42 }
 0x4fb   :  { %3511 = vmatpush1.bf16.msra.mxu0 %v4943_v43 }
 0x4fc   :  { %3512 = vmatprep.subr.bf16.mxu0 %v4948_v44 }
 0x4ff   :  { %3513 = vmatpush1.bf16.msra.mxu0 %v4946_v45 }
 0x500   :  { %3514 = vmatprep.subr.bf16.mxu0 %v4951_v46 }
 0x503   :  { %3515 = vmatpush1.bf16.msra.mxu0 %v4949_v47 }
 0x504   :  { %3516 = vmatprep.subr.bf16.mxu0 %v4954_v48 }
 0x507   :  { %3517 = vmatpush1.bf16.msra.mxu0 %v4952_v49 }
 0x508   :  { %3518 = vmatprep.subr.bf16.mxu0 %v4957_v50 }
 0x50b   :  { %3519 = vmatpush1.bf16.msra.mxu0 %v4955_v51 }
 0x50c   :  { %3520 = vmatprep.subr.bf16.mxu0 %v4960_v52 }
 0x50f   :  { %3521 = vmatpush1.bf16.msra.mxu0 %v4958_v53 }
 0x512   :  { %3523 = vmatmul.mubr.bf16.vlgmr.msra.gmra.mrb[28].mxu0 %v6387_v23 }
 0x5a5   :  { %v3442_v55 = vpop.f32.mrb[24].mxu0  ;;  %v3483_v57 = vpop.f32.mrb[24].mxu1 }
 0x5a6   :  { %v3444_v58 = vpop.f32.mrb[25].mxu0  ;;  %v3485_v59 = vpop.f32.mrb[25].mxu1  ;;  %v3443_v4 = vadd.f32 %v3442_v55, %v2901_v2  ;;  %v3484_v11 = vadd.f32 %v3483_v57, %v2909_v9 }
 0x5a7   :  { %v3446_v60 = vpop.f32.mrb[26].mxu0  ;;  %v3487_v61 = vpop.f32.mrb[26].mxu1  ;;  %v3445_v5 = vadd.f32 %v3444_v58, %v2905_v3  ;;  %v3486_v12 = vadd.f32 %v3485_v59, %v2913_v10 }
 0x5a8   :  { %v3447_v62 = vpop.f32.mrb[27].mxu0  ;;  %v3488_v63 = vpop.f32.mrb[27].mxu1  ;;  %v4308_v6 = vmul.f32 -1.442695, %v3443_v4  ;;  %v4310_v14 = vmul.f32 -1.442695, %v3484_v11 }
 0x5a9   :  { %v4309_v8 = vmul.f32 -1.442695, %v3445_v5  ;;  %v4311_v17 = vmul.f32 -1.442695, %v3486_v12 }
 0x5aa   :  { %5057 = vpow2.f32 %v4308_v6 }
 0x5ab   :  { %5059 = vpow2.f32 %v4309_v8 }
 0x5ac   :  { %5061 = vpow2.f32 %v4310_v14 }
 0x5ad   :  { %5063 = vpow2.f32 %v4311_v17 }
 0x5b4   :  { %v5058_v15 = vpop.eup %5057 }
 0x5b5   :  { %v5060_v18 = vpop.eup %5059  ;;  %v3537_v19 = vadd.f32 1.0, %v5058_v15 }
 0x5b6   :  { %v3538_v56 = vadd.f32 1.0, %v5060_v18  ;;  %v5062_v25 = vpop.eup %5061 }
 0x5b7   :  { %5065 = vrcp.f32 %v3537_v19  ;;  %v5064_v26 = vpop.eup %5063  ;;  %v3549_v27 = vadd.f32 1.0, %v5062_v25 }
 0x5b8   :  { %5067 = vrcp.f32 %v3538_v56  ;;  %v3550_v29 = vadd.f32 1.0, %v5064_v26 }
 0x5c1   :  { %v5066_v28 = vpop.eup %5065 }
 0x5c2   :  { %v5068_v13 = vpop.eup %5067 }
 0x5e5   :  { %v3524_v21 = vpop.f32.mrb[28].mxu0 }
 0x5e6   :  { %v3525_v1 = vadd.f32 %v3524_v21, %v2917_v54  ;;  %v3526_v22 = vpop.f32.mrb[29].mxu0 }
 0x5e7   :  { %v3527_v7 = vadd.f32 %v3526_v22, %v2921_v20  ;;  %v3528_v23 = vpop.f32.mrb[30].mxu0 }
 0x5e8   :  { %5069 = vtanh.f32 %v3525_v1  ;;  %v3529_v24 = vpop.f32.mrb[31].mxu0 }
 0x5e9   :  { %5071 = vtanh.f32 %v3527_v7 }
 0x5ea   :  { %5073 = vrcp.f32 %v3549_v27 }
 0x5eb   :  { %5075 = vrcp.f32 %v3550_v29 }
 0x5f2   :  { %v5070_v30 = vpop.eup %5069 }
 0x5f3   :  { %v5072_v31 = vpop.eup %5071  ;;  %v3557_v16 = vmul.f32 %v5070_v30, %v5066_v28 }
 0x5f4   :  { %v3558_v32 = vmul.f32 %v5072_v31, %v5068_v13  ;;  %v5074_v33 = vpop.eup %5073 }
 0x5f5   :  { %5077 = vtanh.f32 %v3557_v16  ;;  %v5076_v34 = vpop.eup %5075 }
 0x5f6   :  { %5079 = vtanh.f32 %v3558_v32 }
 0x5ff   :  { %v5078_v35 = vpop.eup %5077 }
 0x600   :  { %v5080_v36 = vpop.eup %5079  ;;  %v3561_v37 = vmul.f32 %v5078_v35, %v5074_v33 }
 0x601   :  { %v3562_v38 = vmul.f32 %v5080_v36, %v5076_v34 }
 0x602   :  { %3563 = vst [vmem:[%s6502_s5] sm:$0xff] %v3561_v37 }
 0x603   :  { %3564 = vst [vmem:[%s6502_s5 + $0x8] sm:$0xff] %v3562_v38 }

</bundles_post_ra>
